<compile_context>
chip_gen: v5e
topology: v5e:2x2
jax: 0.10.0
libtpu: 0.0.40
codegen_flags: <defaults>
</compile_context>

<pallas_src>
import functools
import math

import jax
import jax.numpy as jnp
from jax.experimental import pallas as pl
from jax.experimental.pallas import tpu as pltpu

# ----------------------------- configuration --------------------------------
NUM_FRAMES = 8          # original: number_of_couples = 32
IN_H = IN_W = 16        # original: 128 x 128 input frames
IMG = 32                # original: resized to 224
TUBE_T, TUBE_S = 2, 16  # tubelet (2, 16, 16), unchanged
T_GROUPS = NUM_FRAMES // TUBE_T      # original: 16
P_ROW = IMG // TUBE_S                # patches per row; original: 14
NUM_PATCH_TOKENS = T_GROUPS * P_ROW * P_ROW      # 16
SEQ = NUM_PATCH_TOKENS + 1                        # 17 = CLS + patch tokens
S_PAD = 24                                        # padded to sublane multiple of 8
HIDDEN = 128            # original: 768
NUM_HEADS = 4           # original: 12
HEAD_DIM = HIDDEN // NUM_HEADS
NUM_LAYERS = 2          # original: 12
MLP_DIM = 256           # original: 3072
CUBE = 3                # original: 9  (patch -> 9x9x9 cube)
OUT = 16                # original: 64 (final (64,64,64) volume)
LN_EPS = 1e-6
TUBELET_DIM = 3 * TUBE_T * TUBE_S * TUBE_S        # 1536 flattened (C,t,h,w) tubelet
ATTN_SCALE = 1.0 / math.sqrt(HEAD_DIM)


# --------------------------- in-kernel helpers -------------------------------
def _ln(x, g, b):
    mu = jnp.mean(x, axis=-1, keepdims=True)
    xc = x - mu
    var = jnp.mean(xc * xc, axis=-1, keepdims=True)
    return xc * jax.lax.rsqrt(var + LN_EPS) * g + b


def _gelu_tanh(x):
    # HF "gelu_fast" (tanh approximation) used by ViViT.
    return 0.5 * x * (1.0 + jnp.tanh(
        x * 0.7978845608028654 * (1.0 + 0.044715 * x * x)))


def _bf16_dot(x, w_bf16):
    # bf16 operands, f32 accumulation (MXU-native on v6e/v7x).
    return jnp.dot(x.astype(jnp.bfloat16), w_bf16,
                   preferred_element_type=jnp.float32)


# --------------------------- fused ViViT kernel -------------------------------
def _fused_vivit_kernel(tokens_ref, base_ref, patch_w_ref,
                        ln1_g_ref, ln1_b_ref, wqkv_ref, bqkv_ref,
                        wo_ref, bo_ref, ln2_g_ref, ln2_b_ref,
                        w1_ref, b1_ref, w2_ref, b2_ref,
                        lnf_g_ref, lnf_b_ref, o_ref):
    """One grid step == one video. tokens_ref: (S_PAD, TUBELET_DIM) with the
    CLS row (0) and padding rows (17..23) zeroed; base = cls/pos/patch-bias."""
    # Tubelet (Conv3d) embedding + CLS + position embeddings, all fused.
    x = _bf16_dot(tokens_ref[...], patch_w_ref[...]) + base_ref[...]   # (S_PAD,H)

    # Key-validity mask: padded rows (>= SEQ) must not influence real queries.
    key_valid = jax.lax.broadcasted_iota(jnp.int32, (S_PAD, S_PAD), 1) < SEQ

    for l in range(NUM_LAYERS):
        # ----------------- self-attention block (pre-norm) -------------------
        xn = _ln(x, ln1_g_ref[l], ln1_b_ref[l])
        qkv = _bf16_dot(xn, wqkv_ref[l]) + bqkv_ref[l]                 # (S_PAD,3H)
        q = qkv[:, 0:HIDDEN]
        k = qkv[:, HIDDEN:2 * HIDDEN]
        v = qkv[:, 2 * HIDDEN:3 * HIDDEN]
        wo_l = wo_ref[l]                                               # (H,H) bf16
        attn_out = bo_ref[l]                                           # (1,H) -> bcast
        for h in range(NUM_HEADS):
            lo, hi = h * HEAD_DIM, (h + 1) * HEAD_DIM
            qh = q[:, lo:hi]
            kh = k[:, lo:hi]
            vh = v[:, lo:hi]
            s = jnp.dot(qh, kh.T, preferred_element_type=jnp.float32) * ATTN_SCALE
            s = jnp.where(key_valid, s, -1e30)
            s = s - jnp.max(s, axis=-1, keepdims=True)
            p = jnp.exp(s)
            p = p * pl.reciprocal(jnp.sum(p, axis=-1, keepdims=True), approx=True)
            oh = jnp.dot(p, vh, preferred_element_type=jnp.float32)    # (S_PAD,Dh)
            # Output projection fused per head (lane-dense (S_PAD, HIDDEN) result):
            #   attn @ Wo == sum_h  oh @ Wo[h*Dh:(h+1)*Dh, :]
            attn_out = attn_out + _bf16_dot(oh, wo_l[lo:hi, :])
        x = x + attn_out                                               # residual

        # --------------------------- MLP block --------------------------------
        xn2 = _ln(x, ln2_g_ref[l], ln2_b_ref[l])
        m = _gelu_tanh(_bf16_dot(xn2, w1_ref[l]) + b1_ref[l])
        x = x + _bf16_dot(m, w2_ref[l]) + b2_ref[l]                    # residual

    x = _ln(x, lnf_g_ref[...], lnf_b_ref[...])                         # final LN
    o_ref[...] = x.astype(o_ref.dtype)


def fused_vivit(tokens_pad, w):
    """tokens_pad: (B, S_PAD, TUBELET_DIM) -> last_hidden_state (B, S_PAD, HIDDEN)."""
    B = tokens_pad.shape[0]

    def resident(shape):
        # Same block for every grid step -> weights stay resident in VMEM.
        return pl.BlockSpec(shape, lambda b: (0,) * len(shape))

    in_specs = [
        pl.BlockSpec((None, S_PAD, TUBELET_DIM), lambda b: (b, 0, 0)),  # tokens
        resident((S_PAD, HIDDEN)),                       # base (cls+pos+patch bias)
        resident((TUBELET_DIM, HIDDEN)),                 # patch_w (bf16)
        resident((NUM_LAYERS, 1, HIDDEN)),               # ln1_g
        resident((NUM_LAYERS, 1, HIDDEN)),               # ln1_b
        resident((NUM_LAYERS, HIDDEN, 3 * HIDDEN)),      # wqkv (bf16)
        resident((NUM_LAYERS, 1, 3 * HIDDEN)),           # bqkv
        resident((NUM_LAYERS, HIDDEN, HIDDEN)),          # wo (bf16)
        resident((NUM_LAYERS, 1, HIDDEN)),               # bo
        resident((NUM_LAYERS, 1, HIDDEN)),               # ln2_g
        resident((NUM_LAYERS, 1, HIDDEN)),               # ln2_b
        resident((NUM_LAYERS, HIDDEN, MLP_DIM)),         # w1 (bf16)
        resident((NUM_LAYERS, 1, MLP_DIM)),              # b1
        resident((NUM_LAYERS, MLP_DIM, HIDDEN)),         # w2 (bf16)
        resident((NUM_LAYERS, 1, HIDDEN)),               # b2
        resident((1, HIDDEN)),                           # lnf_g
        resident((1, HIDDEN)),                           # lnf_b
    ]
    return pl.pallas_call(
        _fused_vivit_kernel,
        out_shape=jax.ShapeDtypeStruct((B, S_PAD, HIDDEN), jnp.float32),
        grid=(B,),
        in_specs=in_specs,
        out_specs=pl.BlockSpec((None, S_PAD, HIDDEN), lambda b: (b, 0, 0)),
        compiler_params=pltpu.CompilerParams(
            dimension_semantics=("parallel",)),   # batch axis -> megacore on v7x
    )(tokens_pad,
      w["base"], w["patch_w"],
      w["ln1_g"], w["ln1_b"], w["wqkv"], w["bqkv"], w["wo"], w["bo"],
      w["ln2_g"], w["ln2_b"], w["w1"], w["b1"], w["w2"], w["b2"],
      w["lnf_g"], w["lnf_b"])


# ------------------------------ parameters ------------------------------------
def init_params(key):
    def nrm(k, shape, s=0.02):
        return (jax.random.normal(k, shape) * s).astype(jnp.float32)

    ks = jax.random.split(key, 4 + NUM_LAYERS)
    params = {
        "patch_w": nrm(ks[0], (TUBELET_DIM, HIDDEN)),   # Conv3d weight, (C,t,h,w) flat
        "patch_b": jnp.zeros((HIDDEN,), jnp.float32),
        "cls": nrm(ks[1], (1, HIDDEN)),
        "pos": nrm(ks[2], (SEQ, HIDDEN)),
        "lnf_g": jnp.ones((HIDDEN,), jnp.float32),
        "lnf_b": jnp.zeros((HIDDEN,), jnp.float32),
        "layers": [],
    }
    for l in range(NUM_LAYERS):
        kk = jax.random.split(ks[4 + l], 4)
        params["layers"].append(dict(
            ln1_g=jnp.ones((HIDDEN,), jnp.float32),
            ln1_b=jnp.zeros((HIDDEN,), jnp.float32),
            wqkv=nrm(kk[0], (HIDDEN, 3 * HIDDEN)),
            bqkv=jnp.zeros((3 * HIDDEN,), jnp.float32),
            wo=nrm(kk[1], (HIDDEN, HIDDEN)),
            bo=jnp.zeros((HIDDEN,), jnp.float32),
            ln2_g=jnp.ones((HIDDEN,), jnp.float32),
            ln2_b=jnp.zeros((HIDDEN,), jnp.float32),
            w1=nrm(kk[2], (HIDDEN, MLP_DIM)),
            b1=jnp.zeros((MLP_DIM,), jnp.float32),
            w2=nrm(kk[3], (MLP_DIM, HIDDEN)),
            b2=jnp.zeros((HIDDEN,), jnp.float32),
        ))
    return params


def pack_params(params):
    """Stack per-layer weights, fold cls/pos/patch-bias into one `base` slab,
    and cast matmul weights to bf16 for the fused kernel."""
    def stack(name):
        return jnp.stack([lp[name] for lp in params["layers"]], axis=0)

    base = jnp.zeros((S_PAD, HIDDEN), jnp.float32)
    base = base.at[0].set(params["cls"][0] + params["pos"][0])
    base = base.at[1:SEQ].set(params["pos"][1:SEQ] + params["patch_b"][None, :])

    return dict(
        base=base,
        patch_w=params["patch_w"].astype(jnp.bfloat16),
        ln1_g=stack("ln1_g").reshape(NUM_LAYERS, 1, HIDDEN),
        ln1_b=stack("ln1_b").reshape(NUM_LAYERS, 1, HIDDEN),
        wqkv=stack("wqkv").astype(jnp.bfloat16),
        bqkv=stack("bqkv").reshape(NUM_LAYERS, 1, 3 * HIDDEN),
        wo=stack("wo").astype(jnp.bfloat16),
        bo=stack("bo").reshape(NUM_LAYERS, 1, HIDDEN),
        ln2_g=stack("ln2_g").reshape(NUM_LAYERS, 1, HIDDEN),
        ln2_b=stack("ln2_b").reshape(NUM_LAYERS, 1, HIDDEN),
        w1=stack("w1").astype(jnp.bfloat16),
        b1=stack("b1").reshape(NUM_LAYERS, 1, MLP_DIM),
        w2=stack("w2").astype(jnp.bfloat16),
        b2=stack("b2").reshape(NUM_LAYERS, 1, HIDDEN),
        lnf_g=params["lnf_g"].reshape(1, HIDDEN),
        lnf_b=params["lnf_b"].reshape(1, HIDDEN),
    )


# ------------------------------ full forward ----------------------------------
def frames_vit_forward(frames, w):
    """frames: (B, 1, 4*NUM_FRAMES, IN_H, IN_W) -> (B, 1, OUT, OUT, OUT)."""
    B = frames.shape[0]
    # torch.stack([frames[:,:,c:c+3].permute(0,1,3,4,2).squeeze(1) for c in 0:4N:4], 1)
    sel = jnp.stack(
        [frames[:, 0, c:c + 3].transpose(0, 2, 3, 1)
         for c in range(0, NUM_FRAMES * 4, 4)], axis=1)        # (B, F, H, W, 3)

    # image processor: bilinear resize + rescale to [-1, 1]  (XLA glue)
    imgs = jax.image.resize(sel, (B, NUM_FRAMES, IMG, IMG, 3), method="bilinear")
    pixel = imgs.transpose(0, 1, 4, 2, 3) * (1.0 / 127.5) - 1.0   # (B,F,3,IMG,IMG)

    # Tubelet extraction == Conv3d(kernel=stride=(2,16,16)) realised as a matmul
    # inside the fused kernel; here we only lay out the flattened tubelets.
    x = pixel.reshape(B, T_GROUPS, TUBE_T, 3, P_ROW, TUBE_S, P_ROW, TUBE_S)
    x = x.transpose(0, 1, 4, 6, 3, 2, 5, 7)            # (B, t, ph, pw, C, tt, th, tw)
    tokens = x.reshape(B, NUM_PATCH_TOKENS, TUBELET_DIM)
    # row 0 reserved for CLS, rows SEQ..S_PAD-1 are sublane padding (zeros)
    tokens_pad = jnp.pad(tokens, ((0, 0), (1, S_PAD - SEQ), (0, 0)))

    hidden = fused_vivit(tokens_pad, w)                # (B, S_PAD, HIDDEN)

    # ---- post-processing (tiny gathers / reshapes; XLA glue) ----
    tok = hidden[:, 1:SEQ, :]                          # drop CLS + padding rows
    # nn.functional.interpolate(..., CUBE**3), mode='nearest' along features
    idx = jnp.floor(jnp.arange(CUBE ** 3) * (HIDDEN / (CUBE ** 3))).astype(jnp.int32)
    resized = tok[:, :, idx]                           # (B, N, CUBE^3)
    # reverse_patching: each patch -> (CUBE,CUBE,CUBE) cube, tiled over patch grid
    cube = resized.reshape(B, T_GROUPS, P_ROW, P_ROW, CUBE, CUBE, CUBE)
    rev = cube.transpose(0, 1, 4, 2, 5, 3, 6).reshape(
        B, T_GROUPS * CUBE, P_ROW * CUBE, P_ROW * CUBE)
    # nn.functional.interpolate(..., (OUT,OUT,OUT)), mode='nearest'
    di = jnp.floor(jnp.arange(OUT) * (T_GROUPS * CUBE / OUT)).astype(jnp.int32)
    hi = jnp.floor(jnp.arange(OUT) * (P_ROW * CUBE / OUT)).astype(jnp.int32)
    vol = rev[:, di][:, :, hi][:, :, :, hi]            # (B, OUT, OUT, OUT)
    return vol[:, None]                                # (B, 1, OUT, OUT, OUT)


# ----------------------------------- main --------------------------------------
if __name__ == "__main__":
    key = jax.random.PRNGKey(0)
    k_frames, k_params = jax.random.split(key)

    B = 2
    frames = jax.random.uniform(
        k_frames, (B, 1, NUM_FRAMES * 4, IN_H, IN_W),
        minval=0.0, maxval=255.0, dtype=jnp.float32)
    params = init_params(k_params)
    packed = pack_params(params)

    fwd = jax.jit(frames_vit_forward)
    out = jax.block_until_ready(fwd(frames, packed))

    assert out.shape == (B, 1, OUT, OUT, OUT), out.shape
    assert out.dtype == jnp.float32
    assert bool(jnp.all(jnp.isfinite(out)))
    print("KERNEL_OK")
</pallas_src>

<mosaic_0001>
module attributes {stable_mosaic.version = 11 : i64} {
  func.func @_fused_vivit_kernel(%arg0: i32, %arg1: memref<1x24x1536xf32, #tpu.memory_space<vmem>>, %arg2: memref<24x128xf32, #tpu.memory_space<vmem>>, %arg3: memref<1536x128xbf16, #tpu.memory_space<vmem>>, %arg4: memref<2x1x128xf32, #tpu.memory_space<vmem>>, %arg5: memref<2x1x128xf32, #tpu.memory_space<vmem>>, %arg6: memref<2x128x384xbf16, #tpu.memory_space<vmem>>, %arg7: memref<2x1x384xf32, #tpu.memory_space<vmem>>, %arg8: memref<2x128x128xbf16, #tpu.memory_space<vmem>>, %arg9: memref<2x1x128xf32, #tpu.memory_space<vmem>>, %arg10: memref<2x1x128xf32, #tpu.memory_space<vmem>>, %arg11: memref<2x1x128xf32, #tpu.memory_space<vmem>>, %arg12: memref<2x128x256xbf16, #tpu.memory_space<vmem>>, %arg13: memref<2x1x256xf32, #tpu.memory_space<vmem>>, %arg14: memref<2x256x128xbf16, #tpu.memory_space<vmem>>, %arg15: memref<2x1x128xf32, #tpu.memory_space<vmem>>, %arg16: memref<1x128xf32, #tpu.memory_space<vmem>>, %arg17: memref<1x128xf32, #tpu.memory_space<vmem>>, %arg18: memref<1x24x128xf32, #tpu.memory_space<vmem>>) attributes {dimension_semantics = [#tpu.dimension_semantics<parallel>], iteration_bounds = array<i64: 2>, scalar_prefetch = 0 : i64, scratch_operands = 0 : i64, tpu.core_type = #tpu.core_type<tc>, window_params = [{transform_indices = @transform_0, window_bounds = array<i64: 1, 24, 1536>}, {pipeline_mode = #tpu.pipeline_mode<synchronous>, transform_indices = @transform_1, window_bounds = array<i64: 24, 128>}, {pipeline_mode = #tpu.pipeline_mode<synchronous>, transform_indices = @transform_2, window_bounds = array<i64: 1536, 128>}, {pipeline_mode = #tpu.pipeline_mode<synchronous>, transform_indices = @transform_3, window_bounds = array<i64: 2, 1, 128>}, {pipeline_mode = #tpu.pipeline_mode<synchronous>, transform_indices = @transform_4, window_bounds = array<i64: 2, 1, 128>}, {pipeline_mode = #tpu.pipeline_mode<synchronous>, transform_indices = @transform_5, window_bounds = array<i64: 2, 128, 384>}, {pipeline_mode = #tpu.pipeline_mode<synchronous>, transform_indices = @transform_6, window_bounds = array<i64: 2, 1, 384>}, {pipeline_mode = #tpu.pipeline_mode<synchronous>, transform_indices = @transform_7, window_bounds = array<i64: 2, 128, 128>}, {pipeline_mode = #tpu.pipeline_mode<synchronous>, transform_indices = @transform_8, window_bounds = array<i64: 2, 1, 128>}, {pipeline_mode = #tpu.pipeline_mode<synchronous>, transform_indices = @transform_9, window_bounds = array<i64: 2, 1, 128>}, {pipeline_mode = #tpu.pipeline_mode<synchronous>, transform_indices = @transform_10, window_bounds = array<i64: 2, 1, 128>}, {pipeline_mode = #tpu.pipeline_mode<synchronous>, transform_indices = @transform_11, window_bounds = array<i64: 2, 128, 256>}, {pipeline_mode = #tpu.pipeline_mode<synchronous>, transform_indices = @transform_12, window_bounds = array<i64: 2, 1, 256>}, {pipeline_mode = #tpu.pipeline_mode<synchronous>, transform_indices = @transform_13, window_bounds = array<i64: 2, 256, 128>}, {pipeline_mode = #tpu.pipeline_mode<synchronous>, transform_indices = @transform_14, window_bounds = array<i64: 2, 1, 128>}, {pipeline_mode = #tpu.pipeline_mode<synchronous>, transform_indices = @transform_15, window_bounds = array<i64: 1, 128>}, {pipeline_mode = #tpu.pipeline_mode<synchronous>, transform_indices = @transform_16, window_bounds = array<i64: 1, 128>}, {transform_indices = @transform_17, window_bounds = array<i64: 1, 24, 128>}]} {
    %c0 = arith.constant 0 : index
    %c0_0 = arith.constant 0 : index
    %c0_1 = arith.constant 0 : index
    %0 = vector.load %arg1[%c0, %c0_0, %c0_1] : memref<1x24x1536xf32, #tpu.memory_space<vmem>>, vector<1x24x1536xf32>
    %1 = vector.shape_cast %0 : vector<1x24x1536xf32> to vector<24x1536xf32>
    %c0_2 = arith.constant 0 : index
    %c0_3 = arith.constant 0 : index
    %2 = vector.load %arg3[%c0_2, %c0_3] : memref<1536x128xbf16, #tpu.memory_space<vmem>>, vector<1536x128xbf16>
    %3 = arith.truncf %1 : vector<24x1536xf32> to vector<24x1536xbf16>
    %cst = arith.constant dense<0.000000e+00> : vector<24x128xf32>
    %4 = tpu.matmul %3, %2, %cst {dimension_numbers = #tpu.dot_dimension_numbers<[1], [0], [0], [1], [0, 0, 1, 1], [], []>} : vector<24x1536xbf16>, vector<1536x128xbf16>, vector<24x128xf32> -> vector<24x128xf32>
    %c0_4 = arith.constant 0 : index
    %c0_5 = arith.constant 0 : index
    %5 = vector.load %arg2[%c0_4, %c0_5] : memref<24x128xf32, #tpu.memory_space<vmem>>, vector<24x128xf32>
    %6 = arith.addf %4, %5 : vector<24x128xf32>
    %7 = tpu.iota {dimensions = array<i32: 1>} : vector<24x24xi32>
    %c17_i32 = arith.constant 17 : i32
    %8 = vector.broadcast %c17_i32 : i32 to vector<24x24xi32>
    %9 = arith.cmpi slt, %7, %8 : vector<24x24xi32>
    %c0_6 = arith.constant 0 : index
    %c0_7 = arith.constant 0 : index
    %c0_8 = arith.constant 0 : index
    %10 = vector.load %arg4[%c0_6, %c0_7, %c0_8] : memref<2x1x128xf32, #tpu.memory_space<vmem>>, vector<1x1x128xf32>
    %11 = vector.shape_cast %10 : vector<1x1x128xf32> to vector<1x128xf32>
    %c0_9 = arith.constant 0 : index
    %c0_10 = arith.constant 0 : index
    %c0_11 = arith.constant 0 : index
    %12 = vector.load %arg5[%c0_9, %c0_10, %c0_11] : memref<2x1x128xf32, #tpu.memory_space<vmem>>, vector<1x1x128xf32>
    %13 = vector.shape_cast %12 : vector<1x1x128xf32> to vector<1x128xf32>
    %cst_12 = arith.constant dense<0.000000e+00> : vector<24xf32>
    %14 = vector.multi_reduction <add>, %6, %cst_12 [1] : vector<24x128xf32> to vector<24xf32>
    %15 = vector.shape_cast %14 : vector<24xf32> to vector<24x1xf32>
    %cst_13 = arith.constant 1.280000e+02 : f32
    %16 = vector.broadcast %cst_13 : f32 to vector<24x1xf32>
    %17 = arith.divf %15, %16 : vector<24x1xf32>
    %18 = vector.broadcast %17 : vector<24x1xf32> to vector<24x128xf32>
    %19 = arith.subf %6, %18 : vector<24x128xf32>
    %20 = arith.mulf %19, %19 : vector<24x128xf32>
    %cst_14 = arith.constant dense<0.000000e+00> : vector<24xf32>
    %21 = vector.multi_reduction <add>, %20, %cst_14 [1] : vector<24x128xf32> to vector<24xf32>
    %22 = vector.shape_cast %21 : vector<24xf32> to vector<24x1xf32>
    %cst_15 = arith.constant 1.280000e+02 : f32
    %23 = vector.broadcast %cst_15 : f32 to vector<24x1xf32>
    %24 = arith.divf %22, %23 : vector<24x1xf32>
    %cst_16 = arith.constant 9.99999997E-7 : f32
    %25 = vector.broadcast %cst_16 : f32 to vector<24x1xf32>
    %26 = arith.addf %24, %25 : vector<24x1xf32>
    %27 = math.rsqrt %26 : vector<24x1xf32>
    %28 = vector.broadcast %27 : vector<24x1xf32> to vector<24x128xf32>
    %29 = arith.mulf %19, %28 : vector<24x128xf32>
    %30 = vector.broadcast %11 : vector<1x128xf32> to vector<24x128xf32>
    %31 = arith.mulf %29, %30 : vector<24x128xf32>
    %32 = vector.broadcast %13 : vector<1x128xf32> to vector<24x128xf32>
    %33 = arith.addf %31, %32 : vector<24x128xf32>
    %c0_17 = arith.constant 0 : index
    %c0_18 = arith.constant 0 : index
    %c0_19 = arith.constant 0 : index
    %34 = vector.load %arg6[%c0_17, %c0_18, %c0_19] : memref<2x128x384xbf16, #tpu.memory_space<vmem>>, vector<1x128x384xbf16>
    %35 = vector.shape_cast %34 : vector<1x128x384xbf16> to vector<128x384xbf16>
    %36 = arith.truncf %33 : vector<24x128xf32> to vector<24x128xbf16>
    %cst_20 = arith.constant dense<0.000000e+00> : vector<24x384xf32>
    %37 = tpu.matmul %36, %35, %cst_20 {dimension_numbers = #tpu.dot_dimension_numbers<[1], [0], [0], [1], [0, 0, 1, 1], [], []>} : vector<24x128xbf16>, vector<128x384xbf16>, vector<24x384xf32> -> vector<24x384xf32>
    %c0_21 = arith.constant 0 : index
    %c0_22 = arith.constant 0 : index
    %c0_23 = arith.constant 0 : index
    %38 = vector.load %arg7[%c0_21, %c0_22, %c0_23] : memref<2x1x384xf32, #tpu.memory_space<vmem>>, vector<1x1x384xf32>
    %39 = vector.shape_cast %38 : vector<1x1x384xf32> to vector<1x384xf32>
    %40 = vector.broadcast %39 : vector<1x384xf32> to vector<24x384xf32>
    %41 = arith.addf %37, %40 : vector<24x384xf32>
    %42 = vector.extract_strided_slice %41 {offsets = [0, 0], sizes = [24, 128], strides = [1, 1]} : vector<24x384xf32> to vector<24x128xf32>
    %43 = vector.extract_strided_slice %41 {offsets = [0, 128], sizes = [24, 128], strides = [1, 1]} : vector<24x384xf32> to vector<24x128xf32>
    %44 = vector.extract_strided_slice %41 {offsets = [0, 256], sizes = [24, 128], strides = [1, 1]} : vector<24x384xf32> to vector<24x128xf32>
    %c0_24 = arith.constant 0 : index
    %c0_25 = arith.constant 0 : index
    %c0_26 = arith.constant 0 : index
    %45 = vector.load %arg8[%c0_24, %c0_25, %c0_26] : memref<2x128x128xbf16, #tpu.memory_space<vmem>>, vector<1x128x128xbf16>
    %46 = vector.shape_cast %45 : vector<1x128x128xbf16> to vector<128x128xbf16>
    %c0_27 = arith.constant 0 : index
    %c0_28 = arith.constant 0 : index
    %c0_29 = arith.constant 0 : index
    %47 = vector.load %arg9[%c0_27, %c0_28, %c0_29] : memref<2x1x128xf32, #tpu.memory_space<vmem>>, vector<1x1x128xf32>
    %48 = vector.shape_cast %47 : vector<1x1x128xf32> to vector<1x128xf32>
    %49 = vector.extract_strided_slice %42 {offsets = [0, 0], sizes = [24, 32], strides = [1, 1]} : vector<24x128xf32> to vector<24x32xf32>
    %50 = vector.extract_strided_slice %43 {offsets = [0, 0], sizes = [24, 32], strides = [1, 1]} : vector<24x128xf32> to vector<24x32xf32>
    %51 = vector.extract_strided_slice %44 {offsets = [0, 0], sizes = [24, 32], strides = [1, 1]} : vector<24x128xf32> to vector<24x32xf32>
    %52 = tpu.transpose %50, [1, 0] : vector<24x32xf32> -> vector<32x24xf32>
    %cst_30 = arith.constant dense<0.000000e+00> : vector<24x24xf32>
    %53 = tpu.matmul %49, %52, %cst_30 {dimension_numbers = #tpu.dot_dimension_numbers<[1], [0], [0], [1], [0, 0, 1, 1], [], []>} : vector<24x32xf32>, vector<32x24xf32>, vector<24x24xf32> -> vector<24x24xf32>
    %cst_31 = arith.constant 0.176776692 : f32
    %54 = vector.broadcast %cst_31 : f32 to vector<24x24xf32>
    %55 = arith.mulf %53, %54 : vector<24x24xf32>
    %cst_32 = arith.constant -1.000000e+30 : f32
    %56 = vector.broadcast %cst_32 : f32 to vector<24x24xf32>
    %57 = arith.select %9, %55, %56 : vector<24x24xi1>, vector<24x24xf32>
    %cst_33 = arith.constant dense<0xFF800000> : vector<24xf32>
    %58 = vector.multi_reduction <maximumf>, %57, %cst_33 [1] : vector<24x24xf32> to vector<24xf32>
    %59 = vector.shape_cast %58 : vector<24xf32> to vector<24x1xf32>
    %60 = vector.broadcast %59 : vector<24x1xf32> to vector<24x24xf32>
    %61 = arith.subf %57, %60 : vector<24x24xf32>
    %62 = math.exp %61 : vector<24x24xf32>
    %cst_34 = arith.constant dense<0.000000e+00> : vector<24xf32>
    %63 = vector.multi_reduction <add>, %62, %cst_34 [1] : vector<24x24xf32> to vector<24xf32>
    %64 = vector.shape_cast %63 : vector<24xf32> to vector<24x1xf32>
    %65 = tpu.reciprocal %64 {approx = true} : vector<24x1xf32> -> vector<24x1xf32>
    %66 = vector.broadcast %65 : vector<24x1xf32> to vector<24x24xf32>
    %67 = arith.mulf %62, %66 : vector<24x24xf32>
    %cst_35 = arith.constant dense<0.000000e+00> : vector<24x32xf32>
    %68 = tpu.matmul %67, %51, %cst_35 {dimension_numbers = #tpu.dot_dimension_numbers<[1], [0], [0], [1], [0, 0, 1, 1], [], []>} : vector<24x24xf32>, vector<24x32xf32>, vector<24x32xf32> -> vector<24x32xf32>
    %69 = vector.extract_strided_slice %46 {offsets = [0, 0], sizes = [32, 128], strides = [1, 1]} : vector<128x128xbf16> to vector<32x128xbf16>
    %70 = arith.truncf %68 : vector<24x32xf32> to vector<24x32xbf16>
    %cst_36 = arith.constant dense<0.000000e+00> : vector<24x128xf32>
    %71 = tpu.matmul %70, %69, %cst_36 {dimension_numbers = #tpu.dot_dimension_numbers<[1], [0], [0], [1], [0, 0, 1, 1], [], []>} : vector<24x32xbf16>, vector<32x128xbf16>, vector<24x128xf32> -> vector<24x128xf32>
    %72 = vector.broadcast %48 : vector<1x128xf32> to vector<24x128xf32>
    %73 = arith.addf %72, %71 : vector<24x128xf32>
    %74 = vector.extract_strided_slice %42 {offsets = [0, 32], sizes = [24, 32], strides = [1, 1]} : vector<24x128xf32> to vector<24x32xf32>
    %75 = vector.extract_strided_slice %43 {offsets = [0, 32], sizes = [24, 32], strides = [1, 1]} : vector<24x128xf32> to vector<24x32xf32>
    %76 = vector.extract_strided_slice %44 {offsets = [0, 32], sizes = [24, 32], strides = [1, 1]} : vector<24x128xf32> to vector<24x32xf32>
    %77 = tpu.transpose %75, [1, 0] : vector<24x32xf32> -> vector<32x24xf32>
    %cst_37 = arith.constant dense<0.000000e+00> : vector<24x24xf32>
    %78 = tpu.matmul %74, %77, %cst_37 {dimension_numbers = #tpu.dot_dimension_numbers<[1], [0], [0], [1], [0, 0, 1, 1], [], []>} : vector<24x32xf32>, vector<32x24xf32>, vector<24x24xf32> -> vector<24x24xf32>
    %cst_38 = arith.constant 0.176776692 : f32
    %79 = vector.broadcast %cst_38 : f32 to vector<24x24xf32>
    %80 = arith.mulf %78, %79 : vector<24x24xf32>
    %cst_39 = arith.constant -1.000000e+30 : f32
    %81 = vector.broadcast %cst_39 : f32 to vector<24x24xf32>
    %82 = arith.select %9, %80, %81 : vector<24x24xi1>, vector<24x24xf32>
    %cst_40 = arith.constant dense<0xFF800000> : vector<24xf32>
    %83 = vector.multi_reduction <maximumf>, %82, %cst_40 [1] : vector<24x24xf32> to vector<24xf32>
    %84 = vector.shape_cast %83 : vector<24xf32> to vector<24x1xf32>
    %85 = vector.broadcast %84 : vector<24x1xf32> to vector<24x24xf32>
    %86 = arith.subf %82, %85 : vector<24x24xf32>
    %87 = math.exp %86 : vector<24x24xf32>
    %cst_41 = arith.constant dense<0.000000e+00> : vector<24xf32>
    %88 = vector.multi_reduction <add>, %87, %cst_41 [1] : vector<24x24xf32> to vector<24xf32>
    %89 = vector.shape_cast %88 : vector<24xf32> to vector<24x1xf32>
    %90 = tpu.reciprocal %89 {approx = true} : vector<24x1xf32> -> vector<24x1xf32>
    %91 = vector.broadcast %90 : vector<24x1xf32> to vector<24x24xf32>
    %92 = arith.mulf %87, %91 : vector<24x24xf32>
    %cst_42 = arith.constant dense<0.000000e+00> : vector<24x32xf32>
    %93 = tpu.matmul %92, %76, %cst_42 {dimension_numbers = #tpu.dot_dimension_numbers<[1], [0], [0], [1], [0, 0, 1, 1], [], []>} : vector<24x24xf32>, vector<24x32xf32>, vector<24x32xf32> -> vector<24x32xf32>
    %94 = vector.extract_strided_slice %46 {offsets = [32, 0], sizes = [32, 128], strides = [1, 1]} : vector<128x128xbf16> to vector<32x128xbf16>
    %95 = arith.truncf %93 : vector<24x32xf32> to vector<24x32xbf16>
    %cst_43 = arith.constant dense<0.000000e+00> : vector<24x128xf32>
    %96 = tpu.matmul %95, %94, %cst_43 {dimension_numbers = #tpu.dot_dimension_numbers<[1], [0], [0], [1], [0, 0, 1, 1], [], []>} : vector<24x32xbf16>, vector<32x128xbf16>, vector<24x128xf32> -> vector<24x128xf32>
    %97 = arith.addf %73, %96 : vector<24x128xf32>
    %98 = vector.extract_strided_slice %42 {offsets = [0, 64], sizes = [24, 32], strides = [1, 1]} : vector<24x128xf32> to vector<24x32xf32>
    %99 = vector.extract_strided_slice %43 {offsets = [0, 64], sizes = [24, 32], strides = [1, 1]} : vector<24x128xf32> to vector<24x32xf32>
    %100 = vector.extract_strided_slice %44 {offsets = [0, 64], sizes = [24, 32], strides = [1, 1]} : vector<24x128xf32> to vector<24x32xf32>
    %101 = tpu.transpose %99, [1, 0] : vector<24x32xf32> -> vector<32x24xf32>
    %cst_44 = arith.constant dense<0.000000e+00> : vector<24x24xf32>
    %102 = tpu.matmul %98, %101, %cst_44 {dimension_numbers = #tpu.dot_dimension_numbers<[1], [0], [0], [1], [0, 0, 1, 1], [], []>} : vector<24x32xf32>, vector<32x24xf32>, vector<24x24xf32> -> vector<24x24xf32>
    %cst_45 = arith.constant 0.176776692 : f32
    %103 = vector.broadcast %cst_45 : f32 to vector<24x24xf32>
    %104 = arith.mulf %102, %103 : vector<24x24xf32>
    %cst_46 = arith.constant -1.000000e+30 : f32
    %105 = vector.broadcast %cst_46 : f32 to vector<24x24xf32>
    %106 = arith.select %9, %104, %105 : vector<24x24xi1>, vector<24x24xf32>
    %cst_47 = arith.constant dense<0xFF800000> : vector<24xf32>
    %107 = vector.multi_reduction <maximumf>, %106, %cst_47 [1] : vector<24x24xf32> to vector<24xf32>
    %108 = vector.shape_cast %107 : vector<24xf32> to vector<24x1xf32>
    %109 = vector.broadcast %108 : vector<24x1xf32> to vector<24x24xf32>
    %110 = arith.subf %106, %109 : vector<24x24xf32>
    %111 = math.exp %110 : vector<24x24xf32>
    %cst_48 = arith.constant dense<0.000000e+00> : vector<24xf32>
    %112 = vector.multi_reduction <add>, %111, %cst_48 [1] : vector<24x24xf32> to vector<24xf32>
    %113 = vector.shape_cast %112 : vector<24xf32> to vector<24x1xf32>
    %114 = tpu.reciprocal %113 {approx = true} : vector<24x1xf32> -> vector<24x1xf32>
    %115 = vector.broadcast %114 : vector<24x1xf32> to vector<24x24xf32>
    %116 = arith.mulf %111, %115 : vector<24x24xf32>
    %cst_49 = arith.constant dense<0.000000e+00> : vector<24x32xf32>
    %117 = tpu.matmul %116, %100, %cst_49 {dimension_numbers = #tpu.dot_dimension_numbers<[1], [0], [0], [1], [0, 0, 1, 1], [], []>} : vector<24x24xf32>, vector<24x32xf32>, vector<24x32xf32> -> vector<24x32xf32>
    %118 = vector.extract_strided_slice %46 {offsets = [64, 0], sizes = [32, 128], strides = [1, 1]} : vector<128x128xbf16> to vector<32x128xbf16>
    %119 = arith.truncf %117 : vector<24x32xf32> to vector<24x32xbf16>
    %cst_50 = arith.constant dense<0.000000e+00> : vector<24x128xf32>
    %120 = tpu.matmul %119, %118, %cst_50 {dimension_numbers = #tpu.dot_dimension_numbers<[1], [0], [0], [1], [0, 0, 1, 1], [], []>} : vector<24x32xbf16>, vector<32x128xbf16>, vector<24x128xf32> -> vector<24x128xf32>
    %121 = arith.addf %97, %120 : vector<24x128xf32>
    %122 = vector.extract_strided_slice %42 {offsets = [0, 96], sizes = [24, 32], strides = [1, 1]} : vector<24x128xf32> to vector<24x32xf32>
    %123 = vector.extract_strided_slice %43 {offsets = [0, 96], sizes = [24, 32], strides = [1, 1]} : vector<24x128xf32> to vector<24x32xf32>
    %124 = vector.extract_strided_slice %44 {offsets = [0, 96], sizes = [24, 32], strides = [1, 1]} : vector<24x128xf32> to vector<24x32xf32>
    %125 = tpu.transpose %123, [1, 0] : vector<24x32xf32> -> vector<32x24xf32>
    %cst_51 = arith.constant dense<0.000000e+00> : vector<24x24xf32>
    %126 = tpu.matmul %122, %125, %cst_51 {dimension_numbers = #tpu.dot_dimension_numbers<[1], [0], [0], [1], [0, 0, 1, 1], [], []>} : vector<24x32xf32>, vector<32x24xf32>, vector<24x24xf32> -> vector<24x24xf32>
    %cst_52 = arith.constant 0.176776692 : f32
    %127 = vector.broadcast %cst_52 : f32 to vector<24x24xf32>
    %128 = arith.mulf %126, %127 : vector<24x24xf32>
    %cst_53 = arith.constant -1.000000e+30 : f32
    %129 = vector.broadcast %cst_53 : f32 to vector<24x24xf32>
    %130 = arith.select %9, %128, %129 : vector<24x24xi1>, vector<24x24xf32>
    %cst_54 = arith.constant dense<0xFF800000> : vector<24xf32>
    %131 = vector.multi_reduction <maximumf>, %130, %cst_54 [1] : vector<24x24xf32> to vector<24xf32>
    %132 = vector.shape_cast %131 : vector<24xf32> to vector<24x1xf32>
    %133 = vector.broadcast %132 : vector<24x1xf32> to vector<24x24xf32>
    %134 = arith.subf %130, %133 : vector<24x24xf32>
    %135 = math.exp %134 : vector<24x24xf32>
    %cst_55 = arith.constant dense<0.000000e+00> : vector<24xf32>
    %136 = vector.multi_reduction <add>, %135, %cst_55 [1] : vector<24x24xf32> to vector<24xf32>
    %137 = vector.shape_cast %136 : vector<24xf32> to vector<24x1xf32>
    %138 = tpu.reciprocal %137 {approx = true} : vector<24x1xf32> -> vector<24x1xf32>
    %139 = vector.broadcast %138 : vector<24x1xf32> to vector<24x24xf32>
    %140 = arith.mulf %135, %139 : vector<24x24xf32>
    %cst_56 = arith.constant dense<0.000000e+00> : vector<24x32xf32>
    %141 = tpu.matmul %140, %124, %cst_56 {dimension_numbers = #tpu.dot_dimension_numbers<[1], [0], [0], [1], [0, 0, 1, 1], [], []>} : vector<24x24xf32>, vector<24x32xf32>, vector<24x32xf32> -> vector<24x32xf32>
    %142 = vector.extract_strided_slice %46 {offsets = [96, 0], sizes = [32, 128], strides = [1, 1]} : vector<128x128xbf16> to vector<32x128xbf16>
    %143 = arith.truncf %141 : vector<24x32xf32> to vector<24x32xbf16>
    %cst_57 = arith.constant dense<0.000000e+00> : vector<24x128xf32>
    %144 = tpu.matmul %143, %142, %cst_57 {dimension_numbers = #tpu.dot_dimension_numbers<[1], [0], [0], [1], [0, 0, 1, 1], [], []>} : vector<24x32xbf16>, vector<32x128xbf16>, vector<24x128xf32> -> vector<24x128xf32>
    %145 = arith.addf %121, %144 : vector<24x128xf32>
    %146 = arith.addf %6, %145 : vector<24x128xf32>
    %c0_58 = arith.constant 0 : index
    %c0_59 = arith.constant 0 : index
    %c0_60 = arith.constant 0 : index
    %147 = vector.load %arg10[%c0_58, %c0_59, %c0_60] : memref<2x1x128xf32, #tpu.memory_space<vmem>>, vector<1x1x128xf32>
    %148 = vector.shape_cast %147 : vector<1x1x128xf32> to vector<1x128xf32>
    %c0_61 = arith.constant 0 : index
    %c0_62 = arith.constant 0 : index
    %c0_63 = arith.constant 0 : index
    %149 = vector.load %arg11[%c0_61, %c0_62, %c0_63] : memref<2x1x128xf32, #tpu.memory_space<vmem>>, vector<1x1x128xf32>
    %150 = vector.shape_cast %149 : vector<1x1x128xf32> to vector<1x128xf32>
    %cst_64 = arith.constant dense<0.000000e+00> : vector<24xf32>
    %151 = vector.multi_reduction <add>, %146, %cst_64 [1] : vector<24x128xf32> to vector<24xf32>
    %152 = vector.shape_cast %151 : vector<24xf32> to vector<24x1xf32>
    %cst_65 = arith.constant 1.280000e+02 : f32
    %153 = vector.broadcast %cst_65 : f32 to vector<24x1xf32>
    %154 = arith.divf %152, %153 : vector<24x1xf32>
    %155 = vector.broadcast %154 : vector<24x1xf32> to vector<24x128xf32>
    %156 = arith.subf %146, %155 : vector<24x128xf32>
    %157 = arith.mulf %156, %156 : vector<24x128xf32>
    %cst_66 = arith.constant dense<0.000000e+00> : vector<24xf32>
    %158 = vector.multi_reduction <add>, %157, %cst_66 [1] : vector<24x128xf32> to vector<24xf32>
    %159 = vector.shape_cast %158 : vector<24xf32> to vector<24x1xf32>
    %cst_67 = arith.constant 1.280000e+02 : f32
    %160 = vector.broadcast %cst_67 : f32 to vector<24x1xf32>
    %161 = arith.divf %159, %160 : vector<24x1xf32>
    %cst_68 = arith.constant 9.99999997E-7 : f32
    %162 = vector.broadcast %cst_68 : f32 to vector<24x1xf32>
    %163 = arith.addf %161, %162 : vector<24x1xf32>
    %164 = math.rsqrt %163 : vector<24x1xf32>
    %165 = vector.broadcast %164 : vector<24x1xf32> to vector<24x128xf32>
    %166 = arith.mulf %156, %165 : vector<24x128xf32>
    %167 = vector.broadcast %148 : vector<1x128xf32> to vector<24x128xf32>
    %168 = arith.mulf %166, %167 : vector<24x128xf32>
    %169 = vector.broadcast %150 : vector<1x128xf32> to vector<24x128xf32>
    %170 = arith.addf %168, %169 : vector<24x128xf32>
    %c0_69 = arith.constant 0 : index
    %c0_70 = arith.constant 0 : index
    %c0_71 = arith.constant 0 : index
    %171 = vector.load %arg12[%c0_69, %c0_70, %c0_71] : memref<2x128x256xbf16, #tpu.memory_space<vmem>>, vector<1x128x256xbf16>
    %172 = vector.shape_cast %171 : vector<1x128x256xbf16> to vector<128x256xbf16>
    %173 = arith.truncf %170 : vector<24x128xf32> to vector<24x128xbf16>
    %cst_72 = arith.constant dense<0.000000e+00> : vector<24x256xf32>
    %174 = tpu.matmul %173, %172, %cst_72 {dimension_numbers = #tpu.dot_dimension_numbers<[1], [0], [0], [1], [0, 0, 1, 1], [], []>} : vector<24x128xbf16>, vector<128x256xbf16>, vector<24x256xf32> -> vector<24x256xf32>
    %c0_73 = arith.constant 0 : index
    %c0_74 = arith.constant 0 : index
    %c0_75 = arith.constant 0 : index
    %175 = vector.load %arg13[%c0_73, %c0_74, %c0_75] : memref<2x1x256xf32, #tpu.memory_space<vmem>>, vector<1x1x256xf32>
    %176 = vector.shape_cast %175 : vector<1x1x256xf32> to vector<1x256xf32>
    %177 = vector.broadcast %176 : vector<1x256xf32> to vector<24x256xf32>
    %178 = arith.addf %174, %177 : vector<24x256xf32>
    %cst_76 = arith.constant 5.000000e-01 : f32
    %179 = vector.broadcast %cst_76 : f32 to vector<24x256xf32>
    %180 = arith.mulf %179, %178 : vector<24x256xf32>
    %cst_77 = arith.constant 0.797884583 : f32
    %181 = vector.broadcast %cst_77 : f32 to vector<24x256xf32>
    %182 = arith.mulf %178, %181 : vector<24x256xf32>
    %cst_78 = arith.constant 4.471500e-02 : f32
    %183 = vector.broadcast %cst_78 : f32 to vector<24x256xf32>
    %184 = arith.mulf %183, %178 : vector<24x256xf32>
    %185 = arith.mulf %184, %178 : vector<24x256xf32>
    %cst_79 = arith.constant 1.000000e+00 : f32
    %186 = vector.broadcast %cst_79 : f32 to vector<24x256xf32>
    %187 = arith.addf %186, %185 : vector<24x256xf32>
    %188 = arith.mulf %182, %187 : vector<24x256xf32>
    %189 = math.tanh %188 : vector<24x256xf32>
    %cst_80 = arith.constant 1.000000e+00 : f32
    %190 = vector.broadcast %cst_80 : f32 to vector<24x256xf32>
    %191 = arith.addf %190, %189 : vector<24x256xf32>
    %192 = arith.mulf %180, %191 : vector<24x256xf32>
    %c0_81 = arith.constant 0 : index
    %c0_82 = arith.constant 0 : index
    %c0_83 = arith.constant 0 : index
    %193 = vector.load %arg14[%c0_81, %c0_82, %c0_83] : memref<2x256x128xbf16, #tpu.memory_space<vmem>>, vector<1x256x128xbf16>
    %194 = vector.shape_cast %193 : vector<1x256x128xbf16> to vector<256x128xbf16>
    %195 = arith.truncf %192 : vector<24x256xf32> to vector<24x256xbf16>
    %cst_84 = arith.constant dense<0.000000e+00> : vector<24x128xf32>
    %196 = tpu.matmul %195, %194, %cst_84 {dimension_numbers = #tpu.dot_dimension_numbers<[1], [0], [0], [1], [0, 0, 1, 1], [], []>} : vector<24x256xbf16>, vector<256x128xbf16>, vector<24x128xf32> -> vector<24x128xf32>
    %197 = arith.addf %146, %196 : vector<24x128xf32>
    %c0_85 = arith.constant 0 : index
    %c0_86 = arith.constant 0 : index
    %c0_87 = arith.constant 0 : index
    %198 = vector.load %arg15[%c0_85, %c0_86, %c0_87] : memref<2x1x128xf32, #tpu.memory_space<vmem>>, vector<1x1x128xf32>
    %199 = vector.shape_cast %198 : vector<1x1x128xf32> to vector<1x128xf32>
    %200 = vector.broadcast %199 : vector<1x128xf32> to vector<24x128xf32>
    %201 = arith.addf %197, %200 : vector<24x128xf32>
    %c1 = arith.constant 1 : index
    %c0_88 = arith.constant 0 : index
    %c0_89 = arith.constant 0 : index
    %202 = vector.load %arg4[%c1, %c0_88, %c0_89] : memref<2x1x128xf32, #tpu.memory_space<vmem>>, vector<1x1x128xf32>
    %203 = vector.shape_cast %202 : vector<1x1x128xf32> to vector<1x128xf32>
    %c1_90 = arith.constant 1 : index
    %c0_91 = arith.constant 0 : index
    %c0_92 = arith.constant 0 : index
    %204 = vector.load %arg5[%c1_90, %c0_91, %c0_92] : memref<2x1x128xf32, #tpu.memory_space<vmem>>, vector<1x1x128xf32>
    %205 = vector.shape_cast %204 : vector<1x1x128xf32> to vector<1x128xf32>
    %cst_93 = arith.constant dense<0.000000e+00> : vector<24xf32>
    %206 = vector.multi_reduction <add>, %201, %cst_93 [1] : vector<24x128xf32> to vector<24xf32>
    %207 = vector.shape_cast %206 : vector<24xf32> to vector<24x1xf32>
    %cst_94 = arith.constant 1.280000e+02 : f32
    %208 = vector.broadcast %cst_94 : f32 to vector<24x1xf32>
    %209 = arith.divf %207, %208 : vector<24x1xf32>
    %210 = vector.broadcast %209 : vector<24x1xf32> to vector<24x128xf32>
    %211 = arith.subf %201, %210 : vector<24x128xf32>
    %212 = arith.mulf %211, %211 : vector<24x128xf32>
    %cst_95 = arith.constant dense<0.000000e+00> : vector<24xf32>
    %213 = vector.multi_reduction <add>, %212, %cst_95 [1] : vector<24x128xf32> to vector<24xf32>
    %214 = vector.shape_cast %213 : vector<24xf32> to vector<24x1xf32>
    %cst_96 = arith.constant 1.280000e+02 : f32
    %215 = vector.broadcast %cst_96 : f32 to vector<24x1xf32>
    %216 = arith.divf %214, %215 : vector<24x1xf32>
    %cst_97 = arith.constant 9.99999997E-7 : f32
    %217 = vector.broadcast %cst_97 : f32 to vector<24x1xf32>
    %218 = arith.addf %216, %217 : vector<24x1xf32>
    %219 = math.rsqrt %218 : vector<24x1xf32>
    %220 = vector.broadcast %219 : vector<24x1xf32> to vector<24x128xf32>
    %221 = arith.mulf %211, %220 : vector<24x128xf32>
    %222 = vector.broadcast %203 : vector<1x128xf32> to vector<24x128xf32>
    %223 = arith.mulf %221, %222 : vector<24x128xf32>
    %224 = vector.broadcast %205 : vector<1x128xf32> to vector<24x128xf32>
    %225 = arith.addf %223, %224 : vector<24x128xf32>
    %c1_98 = arith.constant 1 : index
    %c0_99 = arith.constant 0 : index
    %c0_100 = arith.constant 0 : index
    %226 = vector.load %arg6[%c1_98, %c0_99, %c0_100] : memref<2x128x384xbf16, #tpu.memory_space<vmem>>, vector<1x128x384xbf16>
    %227 = vector.shape_cast %226 : vector<1x128x384xbf16> to vector<128x384xbf16>
    %228 = arith.truncf %225 : vector<24x128xf32> to vector<24x128xbf16>
    %cst_101 = arith.constant dense<0.000000e+00> : vector<24x384xf32>
    %229 = tpu.matmul %228, %227, %cst_101 {dimension_numbers = #tpu.dot_dimension_numbers<[1], [0], [0], [1], [0, 0, 1, 1], [], []>} : vector<24x128xbf16>, vector<128x384xbf16>, vector<24x384xf32> -> vector<24x384xf32>
    %c1_102 = arith.constant 1 : index
    %c0_103 = arith.constant 0 : index
    %c0_104 = arith.constant 0 : index
    %230 = vector.load %arg7[%c1_102, %c0_103, %c0_104] : memref<2x1x384xf32, #tpu.memory_space<vmem>>, vector<1x1x384xf32>
    %231 = vector.shape_cast %230 : vector<1x1x384xf32> to vector<1x384xf32>
    %232 = vector.broadcast %231 : vector<1x384xf32> to vector<24x384xf32>
    %233 = arith.addf %229, %232 : vector<24x384xf32>
    %234 = vector.extract_strided_slice %233 {offsets = [0, 0], sizes = [24, 128], strides = [1, 1]} : vector<24x384xf32> to vector<24x128xf32>
    %235 = vector.extract_strided_slice %233 {offsets = [0, 128], sizes = [24, 128], strides = [1, 1]} : vector<24x384xf32> to vector<24x128xf32>
    %236 = vector.extract_strided_slice %233 {offsets = [0, 256], sizes = [24, 128], strides = [1, 1]} : vector<24x384xf32> to vector<24x128xf32>
    %c1_105 = arith.constant 1 : index
    %c0_106 = arith.constant 0 : index
    %c0_107 = arith.constant 0 : index
    %237 = vector.load %arg8[%c1_105, %c0_106, %c0_107] : memref<2x128x128xbf16, #tpu.memory_space<vmem>>, vector<1x128x128xbf16>
    %238 = vector.shape_cast %237 : vector<1x128x128xbf16> to vector<128x128xbf16>
    %c1_108 = arith.constant 1 : index
    %c0_109 = arith.constant 0 : index
    %c0_110 = arith.constant 0 : index
    %239 = vector.load %arg9[%c1_108, %c0_109, %c0_110] : memref<2x1x128xf32, #tpu.memory_space<vmem>>, vector<1x1x128xf32>
    %240 = vector.shape_cast %239 : vector<1x1x128xf32> to vector<1x128xf32>
    %241 = vector.extract_strided_slice %234 {offsets = [0, 0], sizes = [24, 32], strides = [1, 1]} : vector<24x128xf32> to vector<24x32xf32>
    %242 = vector.extract_strided_slice %235 {offsets = [0, 0], sizes = [24, 32], strides = [1, 1]} : vector<24x128xf32> to vector<24x32xf32>
    %243 = vector.extract_strided_slice %236 {offsets = [0, 0], sizes = [24, 32], strides = [1, 1]} : vector<24x128xf32> to vector<24x32xf32>
    %244 = tpu.transpose %242, [1, 0] : vector<24x32xf32> -> vector<32x24xf32>
    %cst_111 = arith.constant dense<0.000000e+00> : vector<24x24xf32>
    %245 = tpu.matmul %241, %244, %cst_111 {dimension_numbers = #tpu.dot_dimension_numbers<[1], [0], [0], [1], [0, 0, 1, 1], [], []>} : vector<24x32xf32>, vector<32x24xf32>, vector<24x24xf32> -> vector<24x24xf32>
    %cst_112 = arith.constant 0.176776692 : f32
    %246 = vector.broadcast %cst_112 : f32 to vector<24x24xf32>
    %247 = arith.mulf %245, %246 : vector<24x24xf32>
    %cst_113 = arith.constant -1.000000e+30 : f32
    %248 = vector.broadcast %cst_113 : f32 to vector<24x24xf32>
    %249 = arith.select %9, %247, %248 : vector<24x24xi1>, vector<24x24xf32>
    %cst_114 = arith.constant dense<0xFF800000> : vector<24xf32>
    %250 = vector.multi_reduction <maximumf>, %249, %cst_114 [1] : vector<24x24xf32> to vector<24xf32>
    %251 = vector.shape_cast %250 : vector<24xf32> to vector<24x1xf32>
    %252 = vector.broadcast %251 : vector<24x1xf32> to vector<24x24xf32>
    %253 = arith.subf %249, %252 : vector<24x24xf32>
    %254 = math.exp %253 : vector<24x24xf32>
    %cst_115 = arith.constant dense<0.000000e+00> : vector<24xf32>
    %255 = vector.multi_reduction <add>, %254, %cst_115 [1] : vector<24x24xf32> to vector<24xf32>
    %256 = vector.shape_cast %255 : vector<24xf32> to vector<24x1xf32>
    %257 = tpu.reciprocal %256 {approx = true} : vector<24x1xf32> -> vector<24x1xf32>
    %258 = vector.broadcast %257 : vector<24x1xf32> to vector<24x24xf32>
    %259 = arith.mulf %254, %258 : vector<24x24xf32>
    %cst_116 = arith.constant dense<0.000000e+00> : vector<24x32xf32>
    %260 = tpu.matmul %259, %243, %cst_116 {dimension_numbers = #tpu.dot_dimension_numbers<[1], [0], [0], [1], [0, 0, 1, 1], [], []>} : vector<24x24xf32>, vector<24x32xf32>, vector<24x32xf32> -> vector<24x32xf32>
    %261 = vector.extract_strided_slice %238 {offsets = [0, 0], sizes = [32, 128], strides = [1, 1]} : vector<128x128xbf16> to vector<32x128xbf16>
    %262 = arith.truncf %260 : vector<24x32xf32> to vector<24x32xbf16>
    %cst_117 = arith.constant dense<0.000000e+00> : vector<24x128xf32>
    %263 = tpu.matmul %262, %261, %cst_117 {dimension_numbers = #tpu.dot_dimension_numbers<[1], [0], [0], [1], [0, 0, 1, 1], [], []>} : vector<24x32xbf16>, vector<32x128xbf16>, vector<24x128xf32> -> vector<24x128xf32>
    %264 = vector.broadcast %240 : vector<1x128xf32> to vector<24x128xf32>
    %265 = arith.addf %264, %263 : vector<24x128xf32>
    %266 = vector.extract_strided_slice %234 {offsets = [0, 32], sizes = [24, 32], strides = [1, 1]} : vector<24x128xf32> to vector<24x32xf32>
    %267 = vector.extract_strided_slice %235 {offsets = [0, 32], sizes = [24, 32], strides = [1, 1]} : vector<24x128xf32> to vector<24x32xf32>
    %268 = vector.extract_strided_slice %236 {offsets = [0, 32], sizes = [24, 32], strides = [1, 1]} : vector<24x128xf32> to vector<24x32xf32>
    %269 = tpu.transpose %267, [1, 0] : vector<24x32xf32> -> vector<32x24xf32>
    %cst_118 = arith.constant dense<0.000000e+00> : vector<24x24xf32>
    %270 = tpu.matmul %266, %269, %cst_118 {dimension_numbers = #tpu.dot_dimension_numbers<[1], [0], [0], [1], [0, 0, 1, 1], [], []>} : vector<24x32xf32>, vector<32x24xf32>, vector<24x24xf32> -> vector<24x24xf32>
    %cst_119 = arith.constant 0.176776692 : f32
    %271 = vector.broadcast %cst_119 : f32 to vector<24x24xf32>
    %272 = arith.mulf %270, %271 : vector<24x24xf32>
    %cst_120 = arith.constant -1.000000e+30 : f32
    %273 = vector.broadcast %cst_120 : f32 to vector<24x24xf32>
    %274 = arith.select %9, %272, %273 : vector<24x24xi1>, vector<24x24xf32>
    %cst_121 = arith.constant dense<0xFF800000> : vector<24xf32>
    %275 = vector.multi_reduction <maximumf>, %274, %cst_121 [1] : vector<24x24xf32> to vector<24xf32>
    %276 = vector.shape_cast %275 : vector<24xf32> to vector<24x1xf32>
    %277 = vector.broadcast %276 : vector<24x1xf32> to vector<24x24xf32>
    %278 = arith.subf %274, %277 : vector<24x24xf32>
    %279 = math.exp %278 : vector<24x24xf32>
    %cst_122 = arith.constant dense<0.000000e+00> : vector<24xf32>
    %280 = vector.multi_reduction <add>, %279, %cst_122 [1] : vector<24x24xf32> to vector<24xf32>
    %281 = vector.shape_cast %280 : vector<24xf32> to vector<24x1xf32>
    %282 = tpu.reciprocal %281 {approx = true} : vector<24x1xf32> -> vector<24x1xf32>
    %283 = vector.broadcast %282 : vector<24x1xf32> to vector<24x24xf32>
    %284 = arith.mulf %279, %283 : vector<24x24xf32>
    %cst_123 = arith.constant dense<0.000000e+00> : vector<24x32xf32>
    %285 = tpu.matmul %284, %268, %cst_123 {dimension_numbers = #tpu.dot_dimension_numbers<[1], [0], [0], [1], [0, 0, 1, 1], [], []>} : vector<24x24xf32>, vector<24x32xf32>, vector<24x32xf32> -> vector<24x32xf32>
    %286 = vector.extract_strided_slice %238 {offsets = [32, 0], sizes = [32, 128], strides = [1, 1]} : vector<128x128xbf16> to vector<32x128xbf16>
    %287 = arith.truncf %285 : vector<24x32xf32> to vector<24x32xbf16>
    %cst_124 = arith.constant dense<0.000000e+00> : vector<24x128xf32>
    %288 = tpu.matmul %287, %286, %cst_124 {dimension_numbers = #tpu.dot_dimension_numbers<[1], [0], [0], [1], [0, 0, 1, 1], [], []>} : vector<24x32xbf16>, vector<32x128xbf16>, vector<24x128xf32> -> vector<24x128xf32>
    %289 = arith.addf %265, %288 : vector<24x128xf32>
    %290 = vector.extract_strided_slice %234 {offsets = [0, 64], sizes = [24, 32], strides = [1, 1]} : vector<24x128xf32> to vector<24x32xf32>
    %291 = vector.extract_strided_slice %235 {offsets = [0, 64], sizes = [24, 32], strides = [1, 1]} : vector<24x128xf32> to vector<24x32xf32>
    %292 = vector.extract_strided_slice %236 {offsets = [0, 64], sizes = [24, 32], strides = [1, 1]} : vector<24x128xf32> to vector<24x32xf32>
    %293 = tpu.transpose %291, [1, 0] : vector<24x32xf32> -> vector<32x24xf32>
    %cst_125 = arith.constant dense<0.000000e+00> : vector<24x24xf32>
    %294 = tpu.matmul %290, %293, %cst_125 {dimension_numbers = #tpu.dot_dimension_numbers<[1], [0], [0], [1], [0, 0, 1, 1], [], []>} : vector<24x32xf32>, vector<32x24xf32>, vector<24x24xf32> -> vector<24x24xf32>
    %cst_126 = arith.constant 0.176776692 : f32
    %295 = vector.broadcast %cst_126 : f32 to vector<24x24xf32>
    %296 = arith.mulf %294, %295 : vector<24x24xf32>
    %cst_127 = arith.constant -1.000000e+30 : f32
    %297 = vector.broadcast %cst_127 : f32 to vector<24x24xf32>
    %298 = arith.select %9, %296, %297 : vector<24x24xi1>, vector<24x24xf32>
    %cst_128 = arith.constant dense<0xFF800000> : vector<24xf32>
    %299 = vector.multi_reduction <maximumf>, %298, %cst_128 [1] : vector<24x24xf32> to vector<24xf32>
    %300 = vector.shape_cast %299 : vector<24xf32> to vector<24x1xf32>
    %301 = vector.broadcast %300 : vector<24x1xf32> to vector<24x24xf32>
    %302 = arith.subf %298, %301 : vector<24x24xf32>
    %303 = math.exp %302 : vector<24x24xf32>
    %cst_129 = arith.constant dense<0.000000e+00> : vector<24xf32>
    %304 = vector.multi_reduction <add>, %303, %cst_129 [1] : vector<24x24xf32> to vector<24xf32>
    %305 = vector.shape_cast %304 : vector<24xf32> to vector<24x1xf32>
    %306 = tpu.reciprocal %305 {approx = true} : vector<24x1xf32> -> vector<24x1xf32>
    %307 = vector.broadcast %306 : vector<24x1xf32> to vector<24x24xf32>
    %308 = arith.mulf %303, %307 : vector<24x24xf32>
    %cst_130 = arith.constant dense<0.000000e+00> : vector<24x32xf32>
    %309 = tpu.matmul %308, %292, %cst_130 {dimension_numbers = #tpu.dot_dimension_numbers<[1], [0], [0], [1], [0, 0, 1, 1], [], []>} : vector<24x24xf32>, vector<24x32xf32>, vector<24x32xf32> -> vector<24x32xf32>
    %310 = vector.extract_strided_slice %238 {offsets = [64, 0], sizes = [32, 128], strides = [1, 1]} : vector<128x128xbf16> to vector<32x128xbf16>
    %311 = arith.truncf %309 : vector<24x32xf32> to vector<24x32xbf16>
    %cst_131 = arith.constant dense<0.000000e+00> : vector<24x128xf32>
    %312 = tpu.matmul %311, %310, %cst_131 {dimension_numbers = #tpu.dot_dimension_numbers<[1], [0], [0], [1], [0, 0, 1, 1], [], []>} : vector<24x32xbf16>, vector<32x128xbf16>, vector<24x128xf32> -> vector<24x128xf32>
    %313 = arith.addf %289, %312 : vector<24x128xf32>
    %314 = vector.extract_strided_slice %234 {offsets = [0, 96], sizes = [24, 32], strides = [1, 1]} : vector<24x128xf32> to vector<24x32xf32>
    %315 = vector.extract_strided_slice %235 {offsets = [0, 96], sizes = [24, 32], strides = [1, 1]} : vector<24x128xf32> to vector<24x32xf32>
    %316 = vector.extract_strided_slice %236 {offsets = [0, 96], sizes = [24, 32], strides = [1, 1]} : vector<24x128xf32> to vector<24x32xf32>
    %317 = tpu.transpose %315, [1, 0] : vector<24x32xf32> -> vector<32x24xf32>
    %cst_132 = arith.constant dense<0.000000e+00> : vector<24x24xf32>
    %318 = tpu.matmul %314, %317, %cst_132 {dimension_numbers = #tpu.dot_dimension_numbers<[1], [0], [0], [1], [0, 0, 1, 1], [], []>} : vector<24x32xf32>, vector<32x24xf32>, vector<24x24xf32> -> vector<24x24xf32>
    %cst_133 = arith.constant 0.176776692 : f32
    %319 = vector.broadcast %cst_133 : f32 to vector<24x24xf32>
    %320 = arith.mulf %318, %319 : vector<24x24xf32>
    %cst_134 = arith.constant -1.000000e+30 : f32
    %321 = vector.broadcast %cst_134 : f32 to vector<24x24xf32>
    %322 = arith.select %9, %320, %321 : vector<24x24xi1>, vector<24x24xf32>
    %cst_135 = arith.constant dense<0xFF800000> : vector<24xf32>
    %323 = vector.multi_reduction <maximumf>, %322, %cst_135 [1] : vector<24x24xf32> to vector<24xf32>
    %324 = vector.shape_cast %323 : vector<24xf32> to vector<24x1xf32>
    %325 = vector.broadcast %324 : vector<24x1xf32> to vector<24x24xf32>
    %326 = arith.subf %322, %325 : vector<24x24xf32>
    %327 = math.exp %326 : vector<24x24xf32>
    %cst_136 = arith.constant dense<0.000000e+00> : vector<24xf32>
    %328 = vector.multi_reduction <add>, %327, %cst_136 [1] : vector<24x24xf32> to vector<24xf32>
    %329 = vector.shape_cast %328 : vector<24xf32> to vector<24x1xf32>
    %330 = tpu.reciprocal %329 {approx = true} : vector<24x1xf32> -> vector<24x1xf32>
    %331 = vector.broadcast %330 : vector<24x1xf32> to vector<24x24xf32>
    %332 = arith.mulf %327, %331 : vector<24x24xf32>
    %cst_137 = arith.constant dense<0.000000e+00> : vector<24x32xf32>
    %333 = tpu.matmul %332, %316, %cst_137 {dimension_numbers = #tpu.dot_dimension_numbers<[1], [0], [0], [1], [0, 0, 1, 1], [], []>} : vector<24x24xf32>, vector<24x32xf32>, vector<24x32xf32> -> vector<24x32xf32>
    %334 = vector.extract_strided_slice %238 {offsets = [96, 0], sizes = [32, 128], strides = [1, 1]} : vector<128x128xbf16> to vector<32x128xbf16>
    %335 = arith.truncf %333 : vector<24x32xf32> to vector<24x32xbf16>
    %cst_138 = arith.constant dense<0.000000e+00> : vector<24x128xf32>
    %336 = tpu.matmul %335, %334, %cst_138 {dimension_numbers = #tpu.dot_dimension_numbers<[1], [0], [0], [1], [0, 0, 1, 1], [], []>} : vector<24x32xbf16>, vector<32x128xbf16>, vector<24x128xf32> -> vector<24x128xf32>
    %337 = arith.addf %313, %336 : vector<24x128xf32>
    %338 = arith.addf %201, %337 : vector<24x128xf32>
    %c1_139 = arith.constant 1 : index
    %c0_140 = arith.constant 0 : index
    %c0_141 = arith.constant 0 : index
    %339 = vector.load %arg10[%c1_139, %c0_140, %c0_141] : memref<2x1x128xf32, #tpu.memory_space<vmem>>, vector<1x1x128xf32>
    %340 = vector.shape_cast %339 : vector<1x1x128xf32> to vector<1x128xf32>
    %c1_142 = arith.constant 1 : index
    %c0_143 = arith.constant 0 : index
    %c0_144 = arith.constant 0 : index
    %341 = vector.load %arg11[%c1_142, %c0_143, %c0_144] : memref<2x1x128xf32, #tpu.memory_space<vmem>>, vector<1x1x128xf32>
    %342 = vector.shape_cast %341 : vector<1x1x128xf32> to vector<1x128xf32>
    %cst_145 = arith.constant dense<0.000000e+00> : vector<24xf32>
    %343 = vector.multi_reduction <add>, %338, %cst_145 [1] : vector<24x128xf32> to vector<24xf32>
    %344 = vector.shape_cast %343 : vector<24xf32> to vector<24x1xf32>
    %cst_146 = arith.constant 1.280000e+02 : f32
    %345 = vector.broadcast %cst_146 : f32 to vector<24x1xf32>
    %346 = arith.divf %344, %345 : vector<24x1xf32>
    %347 = vector.broadcast %346 : vector<24x1xf32> to vector<24x128xf32>
    %348 = arith.subf %338, %347 : vector<24x128xf32>
    %349 = arith.mulf %348, %348 : vector<24x128xf32>
    %cst_147 = arith.constant dense<0.000000e+00> : vector<24xf32>
    %350 = vector.multi_reduction <add>, %349, %cst_147 [1] : vector<24x128xf32> to vector<24xf32>
    %351 = vector.shape_cast %350 : vector<24xf32> to vector<24x1xf32>
    %cst_148 = arith.constant 1.280000e+02 : f32
    %352 = vector.broadcast %cst_148 : f32 to vector<24x1xf32>
    %353 = arith.divf %351, %352 : vector<24x1xf32>
    %cst_149 = arith.constant 9.99999997E-7 : f32
    %354 = vector.broadcast %cst_149 : f32 to vector<24x1xf32>
    %355 = arith.addf %353, %354 : vector<24x1xf32>
    %356 = math.rsqrt %355 : vector<24x1xf32>
    %357 = vector.broadcast %356 : vector<24x1xf32> to vector<24x128xf32>
    %358 = arith.mulf %348, %357 : vector<24x128xf32>
    %359 = vector.broadcast %340 : vector<1x128xf32> to vector<24x128xf32>
    %360 = arith.mulf %358, %359 : vector<24x128xf32>
    %361 = vector.broadcast %342 : vector<1x128xf32> to vector<24x128xf32>
    %362 = arith.addf %360, %361 : vector<24x128xf32>
    %c1_150 = arith.constant 1 : index
    %c0_151 = arith.constant 0 : index
    %c0_152 = arith.constant 0 : index
    %363 = vector.load %arg12[%c1_150, %c0_151, %c0_152] : memref<2x128x256xbf16, #tpu.memory_space<vmem>>, vector<1x128x256xbf16>
    %364 = vector.shape_cast %363 : vector<1x128x256xbf16> to vector<128x256xbf16>
    %365 = arith.truncf %362 : vector<24x128xf32> to vector<24x128xbf16>
    %cst_153 = arith.constant dense<0.000000e+00> : vector<24x256xf32>
    %366 = tpu.matmul %365, %364, %cst_153 {dimension_numbers = #tpu.dot_dimension_numbers<[1], [0], [0], [1], [0, 0, 1, 1], [], []>} : vector<24x128xbf16>, vector<128x256xbf16>, vector<24x256xf32> -> vector<24x256xf32>
    %c1_154 = arith.constant 1 : index
    %c0_155 = arith.constant 0 : index
    %c0_156 = arith.constant 0 : index
    %367 = vector.load %arg13[%c1_154, %c0_155, %c0_156] : memref<2x1x256xf32, #tpu.memory_space<vmem>>, vector<1x1x256xf32>
    %368 = vector.shape_cast %367 : vector<1x1x256xf32> to vector<1x256xf32>
    %369 = vector.broadcast %368 : vector<1x256xf32> to vector<24x256xf32>
    %370 = arith.addf %366, %369 : vector<24x256xf32>
    %cst_157 = arith.constant 5.000000e-01 : f32
    %371 = vector.broadcast %cst_157 : f32 to vector<24x256xf32>
    %372 = arith.mulf %371, %370 : vector<24x256xf32>
    %cst_158 = arith.constant 0.797884583 : f32
    %373 = vector.broadcast %cst_158 : f32 to vector<24x256xf32>
    %374 = arith.mulf %370, %373 : vector<24x256xf32>
    %cst_159 = arith.constant 4.471500e-02 : f32
    %375 = vector.broadcast %cst_159 : f32 to vector<24x256xf32>
    %376 = arith.mulf %375, %370 : vector<24x256xf32>
    %377 = arith.mulf %376, %370 : vector<24x256xf32>
    %cst_160 = arith.constant 1.000000e+00 : f32
    %378 = vector.broadcast %cst_160 : f32 to vector<24x256xf32>
    %379 = arith.addf %378, %377 : vector<24x256xf32>
    %380 = arith.mulf %374, %379 : vector<24x256xf32>
    %381 = math.tanh %380 : vector<24x256xf32>
    %cst_161 = arith.constant 1.000000e+00 : f32
    %382 = vector.broadcast %cst_161 : f32 to vector<24x256xf32>
    %383 = arith.addf %382, %381 : vector<24x256xf32>
    %384 = arith.mulf %372, %383 : vector<24x256xf32>
    %c1_162 = arith.constant 1 : index
    %c0_163 = arith.constant 0 : index
    %c0_164 = arith.constant 0 : index
    %385 = vector.load %arg14[%c1_162, %c0_163, %c0_164] : memref<2x256x128xbf16, #tpu.memory_space<vmem>>, vector<1x256x128xbf16>
    %386 = vector.shape_cast %385 : vector<1x256x128xbf16> to vector<256x128xbf16>
    %387 = arith.truncf %384 : vector<24x256xf32> to vector<24x256xbf16>
    %cst_165 = arith.constant dense<0.000000e+00> : vector<24x128xf32>
    %388 = tpu.matmul %387, %386, %cst_165 {dimension_numbers = #tpu.dot_dimension_numbers<[1], [0], [0], [1], [0, 0, 1, 1], [], []>} : vector<24x256xbf16>, vector<256x128xbf16>, vector<24x128xf32> -> vector<24x128xf32>
    %389 = arith.addf %338, %388 : vector<24x128xf32>
    %c1_166 = arith.constant 1 : index
    %c0_167 = arith.constant 0 : index
    %c0_168 = arith.constant 0 : index
    %390 = vector.load %arg15[%c1_166, %c0_167, %c0_168] : memref<2x1x128xf32, #tpu.memory_space<vmem>>, vector<1x1x128xf32>
    %391 = vector.shape_cast %390 : vector<1x1x128xf32> to vector<1x128xf32>
    %392 = vector.broadcast %391 : vector<1x128xf32> to vector<24x128xf32>
    %393 = arith.addf %389, %392 : vector<24x128xf32>
    %c0_169 = arith.constant 0 : index
    %c0_170 = arith.constant 0 : index
    %394 = vector.load %arg16[%c0_169, %c0_170] : memref<1x128xf32, #tpu.memory_space<vmem>>, vector<1x128xf32>
    %c0_171 = arith.constant 0 : index
    %c0_172 = arith.constant 0 : index
    %395 = vector.load %arg17[%c0_171, %c0_172] : memref<1x128xf32, #tpu.memory_space<vmem>>, vector<1x128xf32>
    %cst_173 = arith.constant dense<0.000000e+00> : vector<24xf32>
    %396 = vector.multi_reduction <add>, %393, %cst_173 [1] : vector<24x128xf32> to vector<24xf32>
    %397 = vector.shape_cast %396 : vector<24xf32> to vector<24x1xf32>
    %cst_174 = arith.constant 1.280000e+02 : f32
    %398 = vector.broadcast %cst_174 : f32 to vector<24x1xf32>
    %399 = arith.divf %397, %398 : vector<24x1xf32>
    %400 = vector.broadcast %399 : vector<24x1xf32> to vector<24x128xf32>
    %401 = arith.subf %393, %400 : vector<24x128xf32>
    %402 = arith.mulf %401, %401 : vector<24x128xf32>
    %cst_175 = arith.constant dense<0.000000e+00> : vector<24xf32>
    %403 = vector.multi_reduction <add>, %402, %cst_175 [1] : vector<24x128xf32> to vector<24xf32>
    %404 = vector.shape_cast %403 : vector<24xf32> to vector<24x1xf32>
    %cst_176 = arith.constant 1.280000e+02 : f32
    %405 = vector.broadcast %cst_176 : f32 to vector<24x1xf32>
    %406 = arith.divf %404, %405 : vector<24x1xf32>
    %cst_177 = arith.constant 9.99999997E-7 : f32
    %407 = vector.broadcast %cst_177 : f32 to vector<24x1xf32>
    %408 = arith.addf %406, %407 : vector<24x1xf32>
    %409 = math.rsqrt %408 : vector<24x1xf32>
    %410 = vector.broadcast %409 : vector<24x1xf32> to vector<24x128xf32>
    %411 = arith.mulf %401, %410 : vector<24x128xf32>
    %412 = vector.broadcast %394 : vector<1x128xf32> to vector<24x128xf32>
    %413 = arith.mulf %411, %412 : vector<24x128xf32>
    %414 = vector.broadcast %395 : vector<1x128xf32> to vector<24x128xf32>
    %415 = arith.addf %413, %414 : vector<24x128xf32>
    %c0_178 = arith.constant 0 : index
    %c0_179 = arith.constant 0 : index
    %c0_180 = arith.constant 0 : index
    %416 = vector.load %arg18[%c0_178, %c0_179, %c0_180] : memref<1x24x128xf32, #tpu.memory_space<vmem>>, vector<1x24x128xf32>
    %417 = vector.shape_cast %416 : vector<1x24x128xf32> to vector<24x128xf32>
    %418 = vector.shape_cast %415 : vector<24x128xf32> to vector<1x24x128xf32>
    tpu.vector_store %arg18[%c0_178, %c0_179, %c0_180], %418 {strides = array<i32>} : memref<1x24x128xf32, #tpu.memory_space<vmem>>, vector<1x24x128xf32>,
    return
  }
  func.func @transform_0(%arg0: i32) -> (i32, i32, i32) {
    %c0_i32 = arith.constant 0 : i32
    %c0_i32_0 = arith.constant 0 : i32
    %c0_i32_1 = arith.constant 0 : i32
    return %arg0, %c0_i32, %c0_i32_0 : i32, i32, i32
  }
  func.func @transform_1(%arg0: i32) -> (i32, i32) {
    %c0_i32 = arith.constant 0 : i32
    %c0_i32_0 = arith.constant 0 : i32
    %c0_i32_1 = arith.constant 0 : i32
    return %c0_i32, %c0_i32_0 : i32, i32
  }
  func.func @transform_2(%arg0: i32) -> (i32, i32) {
    %c0_i32 = arith.constant 0 : i32
    %c0_i32_0 = arith.constant 0 : i32
    %c0_i32_1 = arith.constant 0 : i32
    return %c0_i32, %c0_i32_0 : i32, i32
  }
  func.func @transform_3(%arg0: i32) -> (i32, i32, i32) {
    %c0_i32 = arith.constant 0 : i32
    %c0_i32_0 = arith.constant 0 : i32
    %c0_i32_1 = arith.constant 0 : i32
    %c0_i32_2 = arith.constant 0 : i32
    return %c0_i32, %c0_i32_0, %c0_i32_1 : i32, i32, i32
  }
  func.func @transform_4(%arg0: i32) -> (i32, i32, i32) {
    %c0_i32 = arith.constant 0 : i32
    %c0_i32_0 = arith.constant 0 : i32
    %c0_i32_1 = arith.constant 0 : i32
    %c0_i32_2 = arith.constant 0 : i32
    return %c0_i32, %c0_i32_0, %c0_i32_1 : i32, i32, i32
  }
  func.func @transform_5(%arg0: i32) -> (i32, i32, i32) {
    %c0_i32 = arith.constant 0 : i32
    %c0_i32_0 = arith.constant 0 : i32
    %c0_i32_1 = arith.constant 0 : i32
    %c0_i32_2 = arith.constant 0 : i32
    return %c0_i32, %c0_i32_0, %c0_i32_1 : i32, i32, i32
  }
  func.func @transform_6(%arg0: i32) -> (i32, i32, i32) {
    %c0_i32 = arith.constant 0 : i32
    %c0_i32_0 = arith.constant 0 : i32
    %c0_i32_1 = arith.constant 0 : i32
    %c0_i32_2 = arith.constant 0 : i32
    return %c0_i32, %c0_i32_0, %c0_i32_1 : i32, i32, i32
  }
  func.func @transform_7(%arg0: i32) -> (i32, i32, i32) {
    %c0_i32 = arith.constant 0 : i32
    %c0_i32_0 = arith.constant 0 : i32
    %c0_i32_1 = arith.constant 0 : i32
    %c0_i32_2 = arith.constant 0 : i32
    return %c0_i32, %c0_i32_0, %c0_i32_1 : i32, i32, i32
  }
  func.func @transform_8(%arg0: i32) -> (i32, i32, i32) {
    %c0_i32 = arith.constant 0 : i32
    %c0_i32_0 = arith.constant 0 : i32
    %c0_i32_1 = arith.constant 0 : i32
    %c0_i32_2 = arith.constant 0 : i32
    return %c0_i32, %c0_i32_0, %c0_i32_1 : i32, i32, i32
  }
  func.func @transform_9(%arg0: i32) -> (i32, i32, i32) {
    %c0_i32 = arith.constant 0 : i32
    %c0_i32_0 = arith.constant 0 : i32
    %c0_i32_1 = arith.constant 0 : i32
    %c0_i32_2 = arith.constant 0 : i32
    return %c0_i32, %c0_i32_0, %c0_i32_1 : i32, i32, i32
  }
  func.func @transform_10(%arg0: i32) -> (i32, i32, i32) {
    %c0_i32 = arith.constant 0 : i32
    %c0_i32_0 = arith.constant 0 : i32
    %c0_i32_1 = arith.constant 0 : i32
    %c0_i32_2 = arith.constant 0 : i32
    return %c0_i32, %c0_i32_0, %c0_i32_1 : i32, i32, i32
  }
  func.func @transform_11(%arg0: i32) -> (i32, i32, i32) {
    %c0_i32 = arith.constant 0 : i32
    %c0_i32_0 = arith.constant 0 : i32
    %c0_i32_1 = arith.constant 0 : i32
    %c0_i32_2 = arith.constant 0 : i32
    return %c0_i32, %c0_i32_0, %c0_i32_1 : i32, i32, i32
  }
  func.func @transform_12(%arg0: i32) -> (i32, i32, i32) {
    %c0_i32 = arith.constant 0 : i32
    %c0_i32_0 = arith.constant 0 : i32
    %c0_i32_1 = arith.constant 0 : i32
    %c0_i32_2 = arith.constant 0 : i32
    return %c0_i32, %c0_i32_0, %c0_i32_1 : i32, i32, i32
  }
  func.func @transform_13(%arg0: i32) -> (i32, i32, i32) {
    %c0_i32 = arith.constant 0 : i32
    %c0_i32_0 = arith.constant 0 : i32
    %c0_i32_1 = arith.constant 0 : i32
    %c0_i32_2 = arith.constant 0 : i32
    return %c0_i32, %c0_i32_0, %c0_i32_1 : i32, i32, i32
  }
  func.func @transform_14(%arg0: i32) -> (i32, i32, i32) {
    %c0_i32 = arith.constant 0 : i32
    %c0_i32_0 = arith.constant 0 : i32
    %c0_i32_1 = arith.constant 0 : i32
    %c0_i32_2 = arith.constant 0 : i32
    return %c0_i32, %c0_i32_0, %c0_i32_1 : i32, i32, i32
  }
  func.func @transform_15(%arg0: i32) -> (i32, i32) {
    %c0_i32 = arith.constant 0 : i32
    %c0_i32_0 = arith.constant 0 : i32
    %c0_i32_1 = arith.constant 0 : i32
    return %c0_i32, %c0_i32_0 : i32, i32
  }
  func.func @transform_16(%arg0: i32) -> (i32, i32) {
    %c0_i32 = arith.constant 0 : i32
    %c0_i32_0 = arith.constant 0 : i32
    %c0_i32_1 = arith.constant 0 : i32
    return %c0_i32, %c0_i32_0 : i32, i32
  }
  func.func @transform_17(%arg0: i32) -> (i32, i32, i32) {
    %c0_i32 = arith.constant 0 : i32
    %c0_i32_0 = arith.constant 0 : i32
    %c0_i32_1 = arith.constant 0 : i32
    return %arg0, %c0_i32, %c0_i32_0 : i32, i32, i32
  }
}

</mosaic_0001>

<bundles_post_ra>
// kernel: frames_vit_forward.1
= control target key start
LH: loop header
LB: loop body
LE: loop exit
PB: predicated region body
PF: predicated region fallthrough
CT: control target
= control target key end

     0   :  { %s6299_s24 = smov 0   ;;  %s7892_s0 = inlined_call_operand.vmem [shape: f32[2,24,1536], index: 0, kind: input, shape index: {}]   ;;  %s7893_s1 = inlined_call_operand.vmem [shape: f32[24,128], index: 1, kind: input, shape index: {}]   ;;  %s7894_s2 = inlined_call_operand.vmem [shape: bf16[1536,128], index: 2, kind: input, shape index: {}]   ;;  %s7895_s3 = inlined_call_operand.vmem [shape: f32[2,1,128], index: 3, kind: input, shape index: {}]   ;;  %s7896_s4 = inlined_call_operand.vmem [shape: f32[2,1,128], index: 4, kind: input, shape index: {}]   ;;  %s7897_s5 = inlined_call_operand.vmem [shape: bf16[2,128,384], index: 5, kind: input, shape index: {}]   ;;  %s7898_s6 = inlined_call_operand.vmem [shape: f32[2,1,384], index: 6, kind: input, shape index: {}]   ;;  %s7899_s7 = inlined_call_operand.vmem [shape: bf16[2,128,128], index: 7, kind: input, shape index: {}]   ;;  %s7900_s8 = inlined_call_operand.vmem [shape: f32[2,1,128], index: 8, kind: input, shape index: {}]   ;;  %s7901_s9 = inlined_call_operand.vmem [shape: f32[2,1,128], index: 9, kind: input, shape index: {}]   ;;  %s7902_s10 = inlined_call_operand.vmem [shape: f32[2,1,128], index: 10, kind: input, shape index: {}]   ;;  %s7903_s11 = inlined_call_operand.vmem [shape: bf16[2,128,256], index: 11, kind: input, shape index: {}]   ;;  %s7904_s12 = inlined_call_operand.vmem [shape: f32[2,1,256], index: 12, kind: input, shape index: {}]   ;;  %s7905_s13 = inlined_call_operand.vmem [shape: bf16[2,256,128], index: 13, kind: input, shape index: {}]   ;;  %s7906_s14 = inlined_call_operand.vmem [shape: f32[2,1,128], index: 14, kind: input, shape index: {}]   ;;  %s7907_s15 = inlined_call_operand.vmem [shape: f32[1,128], index: 15, kind: input, shape index: {}]   ;;  %s7908_s16 = inlined_call_operand.vmem [shape: f32[1,128], index: 16, kind: input, shape index: {}]   ;;  %s7909_s17 = inlined_call_operand.vmem [shape: f32[2,24,128], index: 17, kind: output, shape index: {}]  }
   0x1   :  { %7915 = sst [smem:[#allocation2_spill]] %s7892_s0 }
   0x2   :  { %7916 = sst [smem:[#allocation3_spill]] %s7893_s1 }
   0x3 LB: > { %s4655_s25 = sadd.s32 4294967295, %s6203_s24   ;;  %p4659_p0 = scmp.ge.s32.totalorder %s6203_s24, 1  ;;  %s6203_s24 = sphi %s6299_s24, %s27_s24  }
   0x4   : > { %p487_p1 = scmp.lt.s32.totalorder %s6203_s24, 3 }
   0x6   : > { %p488_p2 = pnand %p4659_p0, %p487_p1 }
   0x7   : > { %p539_p3 = scmp.lt.s32.totalorder (!%p488_p2), %s4655_s25, 1  ;;  %s7917_s28 = sld [smem:[#allocation2_spill]] (!%p488_p2) }
   0x8   : > { %491 = sbr.rel (%p488_p2) target bundleno = 4919 (0x1337), region = 88  ;;  %s7918_s0 = sld [smem:[#allocation3_spill]] (!%p488_p2) }
   0x9   : > { %s6206_s26 = smov (!%p488_p2), 96   ;;  %s7919_s22 = smov (!%p488_p2), 64  }
   0xd   : > { %v5759_v0 = vld [vmem:[%s7894_s2 + $0x38] sm:$0xff]  ;;  %v5758_v4 = vld [vmem:[%s7894_s2 + $0x30] sm:$0xff]  ;;  %v5757_v8 = vld [vmem:[%s7894_s2 + $0x28] sm:$0xff]  ;;  %s7922_s25 = smov (!%p539_p3, %s4655_s25), 1  ;;  %vm1922_vm10 = vcmask 261120   ;;  %vm1973_vm12 = vcmask 195584  }
   0xe   : > { %v5767_v1 = vld [vmem:[%s7894_s2 + $0x78] sm:$0xff]  ;;  %1381 = vmatpush.bf16.msra.mxu0 %v5759_v0  ;;  %v5766_v5 = vld [vmem:[%s7894_s2 + $0x70] sm:$0xff]  ;;  %v5765_v9 = vld [vmem:[%s7894_s2 + $0x68] sm:$0xff]  ;;  %s5987_s27 = smul.u32 288, %s7922_s25 }
   0xf   : > { %v5775_v2 = vld [vmem:[%s7894_s2 + $0xb8] sm:$0xff]  ;;  %1399 = vmatpush.bf16.msra.mxu1 %v5767_v1  ;;  %v5774_v6 = vld [vmem:[%s7894_s2 + $0xb0] sm:$0xff]  ;;  %v5773_v10 = vld [vmem:[%s7894_s2 + $0xa8] sm:$0xff]  ;;  %s5988_s18 = smul.u32 24, %s7922_s25 }
  0x10   : > { %v5783_v3 = vld [vmem:[%s7894_s2 + $0xf8] sm:$0xff]  ;;  %1417 = vmatpush.bf16.msra.mxu2 %v5775_v2  ;;  %v5782_v7 = vld [vmem:[%s7894_s2 + $0xf0] sm:$0xff]  ;;  %v5781_v11 = vld [vmem:[%s7894_s2 + $0xe8] sm:$0xff]  ;;  %s6392_s29 = scalar_lea.vmem %s7917_s28, %s5987_s27  ;;  %s7913_s28 = smov 64  }
  0x11   : > { %1435 = vmatpush.bf16.msra.mxu3 %v5783_v3  ;;  %v5756_v12 = vld [vmem:[%s7894_s2 + $0x20] sm:$0xff]  ;;  %v5755_v16 = vld [vmem:[%s7894_s2 + $0x18] sm:$0xff]  ;;  %v5754_v20 = vld [vmem:[%s7894_s2 + $0x10] sm:$0xff]  ;;  %s548_s21 = scalar_lea.vmem %s7909_s17, %s5988_s18 }
  0x12   : > { %1382 = vmatpush.bf16.msra.mxu0 %v5758_v4  ;;  %v5764_v13 = vld [vmem:[%s7894_s2 + $0x60] sm:$0xff]  ;;  %v5763_v17 = vld [vmem:[%s7894_s2 + $0x58] sm:$0xff]  ;;  %v5762_v21 = vld [vmem:[%s7894_s2 + $0x50] sm:$0xff] }
  0x13   : > { %1400 = vmatpush.bf16.msra.mxu1 %v5766_v5  ;;  %v5772_v14 = vld [vmem:[%s7894_s2 + $0xa0] sm:$0xff]  ;;  %v5771_v18 = vld [vmem:[%s7894_s2 + $0x98] sm:$0xff]  ;;  %v5770_v22 = vld [vmem:[%s7894_s2 + $0x90] sm:$0xff] }
  0x14   : > { %1418 = vmatpush.bf16.msra.mxu2 %v5774_v6  ;;  %v5780_v15 = vld [vmem:[%s7894_s2 + $0xe0] sm:$0xff]  ;;  %v5779_v19 = vld [vmem:[%s7894_s2 + $0xd8] sm:$0xff]  ;;  %v5778_v23 = vld [vmem:[%s7894_s2 + $0xd0] sm:$0xff] }
  0x15   : > { %1436 = vmatpush.bf16.msra.mxu3 %v5782_v7  ;;  %v5753_v24 = vld [vmem:[%s7894_s2 + $0x8] sm:$0xff]  ;;  %v5752_v28 = vld [vmem:[%s7894_s2] sm:$0xff]  ;;  %v552_v36 = vld [vmem:[%s6392_s29 + $0x10] sm:$0xff] }
  0x16   : > { %1383 = vmatpush.bf16.msra.mxu0 %v5757_v8  ;;  %v5761_v25 = vld [vmem:[%s7894_s2 + $0x48] sm:$0xff]  ;;  %v5760_v29 = vld [vmem:[%s7894_s2 + $0x40] sm:$0xff]  ;;  %v564_v37 = vld [vmem:[%s6392_s29 + $0x70] sm:$0xff] }
  0x17   : > { %1401 = vmatpush.bf16.msra.mxu1 %v5765_v9  ;;  %v5769_v26 = vld [vmem:[%s7894_s2 + $0x88] sm:$0xff]  ;;  %v550_v30 = vld [vmem:[%s6392_s29] sm:$0xff]  ;;  %v553_v38 = vld [vmem:[%s6392_s29 + $0x18] sm:$0xff]  ;;  %v780_v44 = vpack.c.bf16 %v564_v37, %v552_v36 }
  0x18   : > { %1419 = vmatpush.bf16.msra.mxu2 %v5773_v10  ;;  %v5777_v27 = vld [vmem:[%s7894_s2 + $0xc8] sm:$0xff]  ;;  %v562_v31 = vld [vmem:[%s6392_s29 + $0x60] sm:$0xff]  ;;  %v565_v39 = vld [vmem:[%s6392_s29 + $0x78] sm:$0xff] }
  0x19   : > { %1437 = vmatpush.bf16.msra.mxu3 %v5781_v11  ;;  %v551_v32 = vld [vmem:[%s6392_s29 + $0x8] sm:$0xff]  ;;  %v5768_v34 = vld [vmem:[%s7894_s2 + $0x80] sm:$0xff]  ;;  %v5791_v40 = vld [vmem:[%s7894_s2 + $0x138] sm:$0xff]  ;;  %v778_v42 = vpack.c.bf16 %v562_v31, %v550_v30  ;;  %v781_v45 = vpack.c.bf16 %v565_v39, %v553_v38 }
  0x1a   : > { %1384 = vmatpush.bf16.msra.mxu0 %v5756_v12  ;;  %v563_v33 = vld [vmem:[%s6392_s29 + $0x68] sm:$0xff]  ;;  %v5776_v35 = vld [vmem:[%s7894_s2 + $0xc0] sm:$0xff]  ;;  %v5799_v41 = vld [vmem:[%s7894_s2 + $0x178] sm:$0xff] }
  0x1b   : > { %1402 = vmatpush.bf16.msra.mxu1 %v5764_v13  ;;  %v779_v43 = vpack.c.bf16 %v563_v33, %v551_v32  ;;  %v5807_v46 = vld [vmem:[%s7894_s2 + $0x1b8] sm:$0xff]  ;;  %v5790_v48 = vld [vmem:[%s7894_s2 + $0x130] sm:$0xff]  ;;  %v5789_v52 = vld [vmem:[%s7894_s2 + $0x128] sm:$0xff] }
  0x1c   : > { %1420 = vmatpush.bf16.msra.mxu2 %v5772_v14  ;;  %v5815_v47 = vld [vmem:[%s7894_s2 + $0x1f8] sm:$0xff]  ;;  %v5798_v49 = vld [vmem:[%s7894_s2 + $0x170] sm:$0xff]  ;;  %v5797_v53 = vld [vmem:[%s7894_s2 + $0x168] sm:$0xff] }
  0x1d   : > { %1438 = vmatpush.bf16.msra.mxu3 %v5780_v15  ;;  %v5806_v50 = vld [vmem:[%s7894_s2 + $0x1b0] sm:$0xff]  ;;  %v5805_v54 = vld [vmem:[%s7894_s2 + $0x1a8] sm:$0xff]  ;;  %v5788_v56 = vld [vmem:[%s7894_s2 + $0x120] sm:$0xff] }
  0x1e   : > { %1385 = vmatpush.bf16.msra.mxu0 %v5755_v16  ;;  %v5814_v51 = vld [vmem:[%s7894_s2 + $0x1f0] sm:$0xff]  ;;  %v5813_v55 = vld [vmem:[%s7894_s2 + $0x1e8] sm:$0xff]  ;;  %v5796_v57 = vld [vmem:[%s7894_s2 + $0x160] sm:$0xff] }
  0x1f   : > { %1403 = vmatpush.bf16.msra.mxu1 %v5763_v17  ;;  %v5804_v58 = vld [vmem:[%s7894_s2 + $0x1a0] sm:$0xff]  ;;  %v575_v60 = vld [vmem:[%s6392_s29 + $0xc8] sm:$0xff]  ;;  %v576_v62 = vld [vmem:[%s6392_s29 + $0xd0] sm:$0xff] }
  0x20   : > { %1421 = vmatpush.bf16.msra.mxu2 %v5771_v18  ;;  %v574_v59 = vld [vmem:[%s6392_s29 + $0xc0] sm:$0xff]  ;;  %v577_v63 = vld [vmem:[%s6392_s29 + $0xd8] sm:$0xff]  ;;  %v791_v3 = vpack.c.bf16 %v575_v60, %v575_v60  ;;  %v792_v4 = vpack.c.bf16 %v576_v62, %v576_v62  ;;  %v5786_v8 = vld [vmem:[%s7894_s2 + $0x110] sm:$0xff] }
  0x21   : > { %1439 = vmatpush.bf16.msra.mxu3 %v5779_v19  ;;  %v5812_v61 = vld [vmem:[%s7894_s2 + $0x1e0] sm:$0xff]  ;;  %v5787_v0 = vld [vmem:[%s7894_s2 + $0x118] sm:$0xff]  ;;  %v790_v2 = vpack.c.bf16 %v574_v59, %v574_v59  ;;  %v793_v5 = vpack.c.bf16 %v577_v63, %v577_v63  ;;  %v5794_v9 = vld [vmem:[%s7894_s2 + $0x150] sm:$0xff] }
  0x22   : > { %1386 = vmatpush.bf16.msra.mxu0 %v5754_v20  ;;  %v5795_v1 = vld [vmem:[%s7894_s2 + $0x158] sm:$0xff]  ;;  %v5802_v10 = vld [vmem:[%s7894_s2 + $0x190] sm:$0xff]  ;;  %v5785_v12 = vld [vmem:[%s7894_s2 + $0x108] sm:$0xff] }
  0x23   : > { %1404 = vmatpush.bf16.msra.mxu1 %v5762_v21  ;;  %v5803_v6 = vld [vmem:[%s7894_s2 + $0x198] sm:$0xff]  ;;  %v5810_v11 = vld [vmem:[%s7894_s2 + $0x1d0] sm:$0xff]  ;;  %v5793_v13 = vld [vmem:[%s7894_s2 + $0x148] sm:$0xff] }
  0x24   : > { %1422 = vmatpush.bf16.msra.mxu2 %v5770_v22  ;;  %v5811_v7 = vld [vmem:[%s7894_s2 + $0x1d8] sm:$0xff]  ;;  %v5801_v14 = vld [vmem:[%s7894_s2 + $0x188] sm:$0xff]  ;;  %v5784_v16 = vld [vmem:[%s7894_s2 + $0x100] sm:$0xff] }
  0x25   : > { %1440 = vmatpush.bf16.msra.mxu3 %v5778_v23  ;;  %v5809_v15 = vld [vmem:[%s7894_s2 + $0x1c8] sm:$0xff]  ;;  %v5792_v17 = vld [vmem:[%s7894_s2 + $0x140] sm:$0xff]  ;;  %v5823_v22 = vld [vmem:[%s7894_s2 + $0x238] sm:$0xff] }
  0x26   : > { %1387 = vmatpush.bf16.msra.mxu0 %v5753_v24  ;;  %v554_v18 = vld [vmem:[%s6392_s29 + $0x20] sm:$0xff]  ;;  %v5831_v23 = vld [vmem:[%s7894_s2 + $0x278] sm:$0xff]  ;;  %v555_v24 = vld [vmem:[%s6392_s29 + $0x28] sm:$0xff] }
  0x27   : > { %1405 = vmatpush.bf16.msra.mxu1 %v5761_v25  ;;  %v5800_v19 = vld [vmem:[%s7894_s2 + $0x180] sm:$0xff]  ;;  %v567_v25 = vld [vmem:[%s6392_s29 + $0x88] sm:$0xff]  ;;  %v5839_v30 = vld [vmem:[%s7894_s2 + $0x2b8] sm:$0xff] }
  0x28   : > { %1423 = vmatpush.bf16.msra.mxu2 %v5769_v26  ;;  %v5808_v20 = vld [vmem:[%s7894_s2 + $0x1c0] sm:$0xff]  ;;  %v556_v26 = vld [vmem:[%s6392_s29 + $0x30] sm:$0xff]  ;;  %v5847_v31 = vld [vmem:[%s7894_s2 + $0x2f8] sm:$0xff]  ;;  %v783_v33 = vpack.c.bf16 %v567_v25, %v555_v24 }
  0x29   : > { %1441 = vmatpush.bf16.msra.mxu3 %v5777_v27  ;;  %v566_v21 = vld [vmem:[%s6392_s29 + $0x80] sm:$0xff]  ;;  %v568_v27 = vld [vmem:[%s6392_s29 + $0x90] sm:$0xff] }
  0x2a   : > { %1388 = vmatpush.bf16.msra.mxu0 %v5752_v28  ;;  %v557_v28 = vld [vmem:[%s6392_s29 + $0x38] sm:$0xff]  ;;  %v782_v32 = vpack.c.bf16 %v566_v21, %v554_v18  ;;  %v5822_v36 = vld [vmem:[%s7894_s2 + $0x230] sm:$0xff]  ;;  %v583_v21 = vld [vmem:[%s6392_s29 + $0x108] sm:$0xff] }
  0x2b   : > { %1406 = vmatpush.bf16.msra.mxu1 %v5760_v29  ;;  %v569_v29 = vld [vmem:[%s6392_s29 + $0x98] sm:$0xff]  ;;  %v5830_v37 = vld [vmem:[%s7894_s2 + $0x270] sm:$0xff]  ;;  %v799_v25 = vpack.c.bf16 %v583_v21, %v583_v21 }
  0x2c   : > { %1424 = vmatpush.bf16.msra.mxu2 %v5768_v34  ;;  %v784_v34 = vpack.c.bf16 %v568_v27, %v556_v26  ;;  %v5838_v38 = vld [vmem:[%s7894_s2 + $0x2b0] sm:$0xff] }
  0x2d   : > { %1442 = vmatpush.bf16.msra.mxu3 %v5776_v35  ;;  %1389 = vmatmul.bf16.vlgmr.msra.gmra.mxu0 %v778_v42  ;;  %v785_v35 = vpack.c.bf16 %v569_v29, %v557_v28  ;;  %v5846_v39 = vld [vmem:[%s7894_s2 + $0x2f0] sm:$0xff]  ;;  %v5837_v42 = vld [vmem:[%s7894_s2 + $0x2a8] sm:$0xff]  ;;  %v802_v28 = vld [vmem:[%s7918_s0] sm:$0xff] }
  0x2e   : > { %1453 = vmatpush.bf16.msrb.mxu0 %v5791_v40  ;;  %1407 = vmatmul.bf16.vlgmr.msra.gmra.mxu1 %v779_v43  ;;  %v5821_v40 = vld [vmem:[%s7894_s2 + $0x228] sm:$0xff]  ;;  %v5818_v60 = vld [vmem:[%s7894_s2 + $0x210] sm:$0xff] }
  0x2f   : > { %1471 = vmatpush.bf16.msrb.mxu1 %v5799_v41  ;;  %1425 = vmatmul.bf16.vlgmr.msra.gmra.mxu2 %v780_v44  ;;  %v5829_v41 = vld [vmem:[%s7894_s2 + $0x268] sm:$0xff]  ;;  %v5820_v44 = vld [vmem:[%s7894_s2 + $0x220] sm:$0xff]  ;;  %v5834_v62 = vld [vmem:[%s7894_s2 + $0x290] sm:$0xff] }
  0x30   : > { %1443 = vmatmul.bf16.vlgmr.msra.gmra.mxu3 %v781_v45  ;;  %1489 = vmatpush.bf16.msrb.mxu2 %v5807_v46  ;;  %v5845_v43 = vld [vmem:[%s7894_s2 + $0x2e8] sm:$0xff]  ;;  %v5828_v45 = vld [vmem:[%s7894_s2 + $0x260] sm:$0xff]  ;;  %v5842_v63 = vld [vmem:[%s7894_s2 + $0x2d0] sm:$0xff] }
  0x31   : > { %1507 = vmatpush.bf16.msrb.mxu3 %v5815_v47  ;;  %v5836_v46 = vld [vmem:[%s7894_s2 + $0x2a0] sm:$0xff] }
  0x32   : > { %1454 = vmatpush.bf16.msrb.mxu0 %v5790_v48  ;;  %v5844_v47 = vld [vmem:[%s7894_s2 + $0x2e0] sm:$0xff] }
  0x33   : > { %1472 = vmatpush.bf16.msrb.mxu1 %v5798_v49  ;;  %v578_v48 = vld [vmem:[%s6392_s29 + $0xe0] sm:$0xff]  ;;  %v579_v49 = vld [vmem:[%s6392_s29 + $0xe8] sm:$0xff] }
  0x34   : > { %1490 = vmatpush.bf16.msrb.mxu2 %v5806_v50  ;;  %v580_v50 = vld [vmem:[%s6392_s29 + $0xf0] sm:$0xff] }
  0x35   : > { %1508 = vmatpush.bf16.msrb.mxu3 %v5814_v51  ;;  %v581_v51 = vld [vmem:[%s6392_s29 + $0xf8] sm:$0xff] }
  0x36   : > { %1455 = vmatpush.bf16.msrb.mxu0 %v5789_v52  ;;  %v5819_v52 = vld [vmem:[%s7894_s2 + $0x218] sm:$0xff]  ;;  %v797_v59 = vpack.c.bf16 %v581_v51, %v581_v51 }
  0x37   : > { %1473 = vmatpush.bf16.msrb.mxu1 %v5797_v53  ;;  %v5827_v53 = vld [vmem:[%s7894_s2 + $0x258] sm:$0xff] }
  0x38   : > { %1491 = vmatpush.bf16.msrb.mxu2 %v5805_v54  ;;  %v5835_v54 = vld [vmem:[%s7894_s2 + $0x298] sm:$0xff] }
  0x39   : > { %1509 = vmatpush.bf16.msrb.mxu3 %v5813_v55  ;;  %v5843_v55 = vld [vmem:[%s7894_s2 + $0x2d8] sm:$0xff] }
  0x3a   : > { %1456 = vmatpush.bf16.msrb.mxu0 %v5788_v56  ;;  %v794_v56 = vpack.c.bf16 %v578_v48, %v578_v48 }
  0x3b   : > { %1474 = vmatpush.bf16.msrb.mxu1 %v5796_v57  ;;  %v795_v57 = vpack.c.bf16 %v579_v49, %v579_v49 }
  0x3c   : > { %1492 = vmatpush.bf16.msrb.mxu2 %v5804_v58  ;;  %v796_v58 = vpack.c.bf16 %v580_v50, %v580_v50 }
  0x3d   : > { %1510 = vmatpush.bf16.msrb.mxu3 %v5812_v61  ;;  %1394 = vmatmul.bf16.gmra.mxu0 %v790_v2  ;;  %v5826_v61 = vld [vmem:[%s7894_s2 + $0x250] sm:$0xff]  ;;  %v5833_v2 = vld [vmem:[%s7894_s2 + $0x288] sm:$0xff] }
  0x3e   : > { %1457 = vmatpush.bf16.msrb.mxu0 %v5787_v0  ;;  %1412 = vmatmul.bf16.gmra.mxu1 %v791_v3  ;;  %v5817_v0 = vld [vmem:[%s7894_s2 + $0x208] sm:$0xff] }
  0x3f   : > { %1475 = vmatpush.bf16.msrb.mxu1 %v5795_v1  ;;  %1430 = vmatmul.bf16.gmra.mxu2 %v792_v4  ;;  %v5825_v1 = vld [vmem:[%s7894_s2 + $0x248] sm:$0xff]  ;;  %v5816_v4 = vld [vmem:[%s7894_s2 + $0x200] sm:$0xff] }
  0x40   : > { %1448 = vmatmul.bf16.gmra.mxu3 %v793_v5  ;;  %1493 = vmatpush.bf16.msrb.mxu2 %v5803_v6  ;;  %v5841_v3 = vld [vmem:[%s7894_s2 + $0x2c8] sm:$0xff]  ;;  %v5824_v5 = vld [vmem:[%s7894_s2 + $0x240] sm:$0xff] }
  0x41   : > { %1511 = vmatpush.bf16.msrb.mxu3 %v5811_v7  ;;  %v5832_v6 = vld [vmem:[%s7894_s2 + $0x280] sm:$0xff] }
  0x42   : > { %1458 = vmatpush.bf16.msrb.mxu0 %v5786_v8  ;;  %v5840_v7 = vld [vmem:[%s7894_s2 + $0x2c0] sm:$0xff] }
  0x43   : > { %1476 = vmatpush.bf16.msrb.mxu1 %v5794_v9  ;;  %v558_v8 = vld [vmem:[%s6392_s29 + $0x40] sm:$0xff] }
  0x44   : > { %1494 = vmatpush.bf16.msrb.mxu2 %v5802_v10  ;;  %v570_v9 = vld [vmem:[%s6392_s29 + $0xa0] sm:$0xff]  ;;  %v559_v10 = vld [vmem:[%s6392_s29 + $0x48] sm:$0xff] }
  0x45   : > { %1512 = vmatpush.bf16.msrb.mxu3 %v5810_v11  ;;  %v571_v11 = vld [vmem:[%s6392_s29 + $0xa8] sm:$0xff] }
  0x46   : > { %1459 = vmatpush.bf16.msrb.mxu0 %v5785_v12  ;;  %v560_v12 = vld [vmem:[%s6392_s29 + $0x50] sm:$0xff] }
  0x47   : > { %1477 = vmatpush.bf16.msrb.mxu1 %v5793_v13  ;;  %v572_v13 = vld [vmem:[%s6392_s29 + $0xb0] sm:$0xff] }
  0x48   : > { %1495 = vmatpush.bf16.msrb.mxu2 %v5801_v14  ;;  %v561_v14 = vld [vmem:[%s6392_s29 + $0x58] sm:$0xff]  ;;  %v788_v18 = vpack.c.bf16 %v572_v13, %v560_v12 }
  0x49   : > { %1513 = vmatpush.bf16.msrb.mxu3 %v5809_v15  ;;  %v573_v15 = vld [vmem:[%s6392_s29 + $0xb8] sm:$0xff] }
  0x4a   : > { %1460 = vmatpush.bf16.msrb.mxu0 %v5784_v16  ;;  %v786_v16 = vpack.c.bf16 %v570_v9, %v558_v8 }
  0x4b   : > { %1478 = vmatpush.bf16.msrb.mxu1 %v5792_v17  ;;  %v787_v17 = vpack.c.bf16 %v571_v11, %v559_v10 }
  0x4c   : > { %1496 = vmatpush.bf16.msrb.mxu2 %v5800_v19  ;;  %v789_v19 = vpack.c.bf16 %v573_v15, %v561_v14 }
  0x4d   : > { %1514 = vmatpush.bf16.msrb.mxu3 %v5808_v20  ;;  %1461 = vmatmul.bf16.vlgmr.msrb.gmra.mxu0 %v782_v32  ;;  %v582_v20 = vld [vmem:[%s6392_s29 + $0x100] sm:$0xff] }
  0x4e   : > { %1525 = vmatpush.bf16.msra.mxu0 %v5823_v22  ;;  %1479 = vmatmul.bf16.vlgmr.msrb.gmra.mxu1 %v783_v33  ;;  %v584_v22 = vld [vmem:[%s6392_s29 + $0x110] sm:$0xff]  ;;  %v798_v24 = vpack.c.bf16 %v582_v20, %v582_v20 }
  0x4f   : > { %1543 = vmatpush.bf16.msra.mxu1 %v5831_v23  ;;  %1497 = vmatmul.bf16.vlgmr.msrb.gmra.mxu2 %v784_v34  ;;  %v585_v23 = vld [vmem:[%s6392_s29 + $0x118] sm:$0xff]  ;;  %v800_v26 = vpack.c.bf16 %v584_v22, %v584_v22  ;;  %s7911_s29 = smov 32  }
  0x50   : > { %1561 = vmatpush.bf16.msra.mxu2 %v5839_v30  ;;  %1515 = vmatmul.bf16.vlgmr.msrb.gmra.mxu3 %v785_v35  ;;  %v801_v27 = vpack.c.bf16 %v585_v23, %v585_v23 }
  0x51   : > { %1579 = vmatpush.bf16.msra.mxu3 %v5847_v31 }
  0x52   : > { %1526 = vmatpush.bf16.msra.mxu0 %v5822_v36 }
  0x53   : > { %1544 = vmatpush.bf16.msra.mxu1 %v5830_v37 }
  0x54   : > { %1562 = vmatpush.bf16.msra.mxu2 %v5838_v38 }
  0x55   : > { %1580 = vmatpush.bf16.msra.mxu3 %v5846_v39 }
  0x56   : > { %1527 = vmatpush.bf16.msra.mxu0 %v5821_v40 }
  0x57   : > { %1545 = vmatpush.bf16.msra.mxu1 %v5829_v41 }
  0x58   : > { %1563 = vmatpush.bf16.msra.mxu2 %v5837_v42 }
  0x59   : > { %1581 = vmatpush.bf16.msra.mxu3 %v5845_v43 }
  0x5a   : > { %1528 = vmatpush.bf16.msra.mxu0 %v5820_v44 }
  0x5b   : > { %1546 = vmatpush.bf16.msra.mxu1 %v5828_v45 }
  0x5c   : > { %1564 = vmatpush.bf16.msra.mxu2 %v5836_v46 }
  0x5d   : > { %1582 = vmatpush.bf16.msra.mxu3 %v5844_v47  ;;  %1466 = vmatmul.bf16.gmra.mxu0 %v794_v56 }
  0x5e   : > { %1529 = vmatpush.bf16.msra.mxu0 %v5819_v52  ;;  %1484 = vmatmul.bf16.gmra.mxu1 %v795_v57 }
  0x5f   : > { %1547 = vmatpush.bf16.msra.mxu1 %v5827_v53  ;;  %1502 = vmatmul.bf16.gmra.mxu2 %v796_v58 }
  0x60   : > { %1565 = vmatpush.bf16.msra.mxu2 %v5835_v54  ;;  %1520 = vmatmul.bf16.gmra.mxu3 %v797_v59 }
  0x61   : > { %1583 = vmatpush.bf16.msra.mxu3 %v5843_v55  ;;  %v803_v55 = vld [vmem:[%s7918_s0 + $0x8] sm:$0xff] }
  0x62   : > { %1530 = vmatpush.bf16.msra.mxu0 %v5818_v60 }
  0x63   : > { %1548 = vmatpush.bf16.msra.mxu1 %v5826_v61  ;;  %v804_v61 = vld [vmem:[%s7918_s0 + $0x10] sm:$0xff] }
  0x64   : > { %1566 = vmatpush.bf16.msra.mxu2 %v5834_v62 }
  0x65   : > { %1584 = vmatpush.bf16.msra.mxu3 %v5842_v63 }
  0x66   : > { %1531 = vmatpush.bf16.msra.mxu0 %v5817_v0 }
  0x67   : > { %1549 = vmatpush.bf16.msra.mxu1 %v5825_v1 }
  0x68   : > { %1567 = vmatpush.bf16.msra.mxu2 %v5833_v2 }
  0x69   : > { %1585 = vmatpush.bf16.msra.mxu3 %v5841_v3 }
  0x6a   : > { %1532 = vmatpush.bf16.msra.mxu0 %v5816_v4 }
  0x6b   : > { %1550 = vmatpush.bf16.msra.mxu1 %v5824_v5 }
  0x6c   : > { %1568 = vmatpush.bf16.msra.mxu2 %v5832_v6 }
  0x6d   : > { %1586 = vmatpush.bf16.msra.mxu3 %v5840_v7  ;;  %1533 = vmatmul.bf16.vlgmr.msra.gmra.mxu0 %v786_v16 }
  0x6e   : > { %1551 = vmatmul.bf16.vlgmr.msra.gmra.mxu1 %v787_v17 }
  0x6f   : > { %1569 = vmatmul.bf16.vlgmr.msra.gmra.mxu2 %v788_v18 }
  0x70   : > { %1587 = vmatmul.bf16.vlgmr.msra.gmra.mxu3 %v789_v19 }
  0x7d   : > { %1538 = vmatmul.bf16.gmra.mxu0 %v798_v24 }
  0x7e   : > { %1556 = vmatmul.bf16.gmra.mxu1 %v799_v25 }
  0x7f   : > { %1574 = vmatmul.bf16.gmra.mxu2 %v800_v26 }
  0x80   : > { %1592 = vmatmul.bf16.gmra.mxu3 %v801_v27 }
  0xaa   : > { %v1390_v29 = vpop.f32.mrf.mxu0 }
  0xab   : > { %v1408_v30 = vpop.f32.mrf.mxu1  ;;  %v1391_v31 = vadd.f32 %v1390_v29, %v802_v28 }
  0xad   : > { %v1409_v32 = vadd.f32 %v1408_v30, %v1391_v31 }
  0xb2   : > { %v1426_v33 = vpop.f32.mrf.mxu2  ;;  %v1392_v36 = vpop.f32.mrf.mxu0 }
  0xb3   : > { %v1444_v34 = vpop.f32.mrf.mxu3  ;;  %v1427_v35 = vadd.f32 %v1426_v33, %v1409_v32  ;;  %v1410_v37 = vpop.f32.mrf.mxu1  ;;  %v1393_v60 = vadd.f32 %v1392_v36, %v803_v55  ;;  %v5869_v55 = vld [vmem:[%s7897_s5 + $0xac] sm:$0xf] }
  0xb5   : > { %v1445_v38 = vadd.f32 %v1444_v34, %v1427_v35  ;;  %v1411_v62 = vadd.f32 %v1410_v37, %v1393_v60 }
  0xba   : > { %v1428_v39 = vpop.f32.mrf.mxu2  ;;  %v1395_v41 = vpop.f32.mrf.mxu0 }
  0xbb   : > { %v1446_v40 = vpop.f32.mrf.mxu3  ;;  %v1413_v42 = vpop.f32.mrf.mxu1  ;;  %v1429_v1 = vadd.f32 %v1428_v39, %v1411_v62  ;;  %v1396_v2 = vadd.f32 %v1395_v41, %v804_v61 }
  0xbd   : > { %v1447_v5 = vadd.f32 %v1446_v40, %v1429_v1  ;;  %v1414_v6 = vadd.f32 %v1413_v42, %v1396_v2 }
  0xc2   : > { %v1431_v43 = vpop.f32.mrf.mxu2  ;;  %v1397_v45 = vpop.f32.mrf.mxu0 }
  0xc3   : > { %v1449_v44 = vpop.f32.mrf.mxu3  ;;  %v1415_v46 = vpop.f32.mrf.mxu1  ;;  %v1432_v10 = vadd.f32 %v1431_v43, %v1414_v6 }
  0xc5   : > { %v1450_v14 = vadd.f32 %v1449_v44, %v1432_v10  ;;  %v5122_v10 = vld [vmem:[%s7897_s5 + $0x9c] sm:$0xf0] }
  0xca   : > { %v1433_v47 = vpop.f32.mrf.mxu2  ;;  %v1462_v49 = vpop.f32.mrf.mxu0 }
  0xcb   : > { %v1451_v48 = vpop.f32.mrf.mxu3  ;;  %v1480_v50 = vpop.f32.mrf.mxu1  ;;  %v1463_v24 = vadd.f32 %v1462_v49, %v1445_v38 }
  0xcd   : > { %v1481_v29 = vadd.f32 %v1480_v50, %v1463_v24  ;;  %v5871_v24 = vld [vmem:[%s7897_s5 + $0xb8] sm:$0xf0] }
  0xd2   : > { %v1498_v51 = vpop.f32.mrf.mxu2  ;;  %v1464_v53 = vpop.f32.mrf.mxu0 }
  0xd3   : > { %v1516_v52 = vpop.f32.mrf.mxu3  ;;  %v1482_v54 = vpop.f32.mrf.mxu1  ;;  %v1465_v7 = vadd.f32 %v1464_v53, %v1447_v5  ;;  %v1499_v34 = vadd.f32 %v1498_v51, %v1481_v29  ;;  %v6205_v51 = vmov 128.0   ;;  %v5854_v29 = vld [vmem:[%s7897_s5 + $0x34] sm:$0xf] }
  0xd4   : > { %6045 = vrcp.f32 %v6205_v51 }
  0xd5   : > { %v1483_v13 = vadd.f32 %v1482_v54, %v1465_v7  ;;  %v1517_v37 = vadd.f32 %v1516_v52, %v1499_v34 }
  0xda   : > { %v1500_v56 = vpop.f32.mrf.mxu2  ;;  %v1467_v58 = vpop.f32.mrf.mxu0 }
  0xdb   : > { %v1518_v57 = vpop.f32.mrf.mxu3  ;;  %v1485_v59 = vpop.f32.mrf.mxu1  ;;  %v1501_v15 = vadd.f32 %v1500_v56, %v1483_v13  ;;  %v1468_v16 = vadd.f32 %v1467_v58, %v1450_v14  ;;  %v5134_v56 = vld [vmem:[%s7897_s5 + $0xb4] sm:$0xf0]  ;;  %v5110_v13 = vld [vmem:[%s7897_s5 + $0x84] sm:$0xf0] }
  0xdc   : > { %v6046_v52 = vpop.eup %6045  ;;  %v5137_v58 = vor.u32 %v5869_v55, %v5134_v56 }
  0xdd   : > { %v1519_v19 = vadd.f32 %v1518_v57, %v1501_v15  ;;  %v1486_v22 = vadd.f32 %v1485_v59, %v1468_v16  ;;  %v1609_v53 = vmul.f32 128.0, %v6046_v52  ;;  %vm1613_vm0 = vweird.f32 %v6046_v52  ;;  %v5860_v15 = vld [vmem:[%s7897_s5 + $0x64] sm:$0xf]  ;;  %v5098_v16 = vld [vmem:[%s7897_s5 + $0x6c] sm:$0xf0] }
  0xde   : > { %5976 = vmatpush.bf16.msrb.mxu3 %v5137_v58  ;;  %1869 = vmatpush.bf16.msrb.mxu1 %v5137_v58  ;;  %v5858_v58 = vld [vmem:[%s7897_s5 + $0x50] sm:$0xf0] }
  0xdf   : > { %v1610_v54 = vsub.f32 1.0, %v1609_v53  ;;  %v5104_v53 = vld [vmem:[%s7897_s5 + $0x68] sm:$0xf] }
  0xe1   : > { %v1611_v57 = vmul.f32 %v6046_v52, %v1610_v54  ;;  %v5862_v54 = vld [vmem:[%s7897_s5 + $0x70] sm:$0xf0] }
  0xe2   : > { %v1503_v63 = vpop.f32.mrf.mxu2  ;;  %v1469_v3 = vpop.f32.mrf.mxu0  ;;  %v5105_v56 = vor.u32 %v5862_v54, %v5104_v53 }
  0xe3   : > { %v1521_v0 = vpop.f32.mrf.mxu3  ;;  %v1487_v4 = vpop.f32.mrf.mxu1  ;;  %v1504_v25 = vadd.f32 %v1503_v63, %v1486_v22  ;;  %v1612_v59 = vadd.f32 %v6046_v52, %v1611_v57  ;;  %v5086_v22 = vld [vmem:[%s7897_s5 + $0x54] sm:$0xf0]  ;;  %v5084_v57 = vld [vmem:[%s7897_s5 + $0x48] sm:$0xf] }
  0xe5   : > { %v1522_v30 = vadd.f32 %v1521_v0, %v1504_v25  ;;  %v6667_v60 = vsel %vm1613_vm0, %v6046_v52, %v1612_v59  ;;  %v5050_v52 = vld [vmem:[%s7897_s5 + $0xc] sm:$0xf0] }
  0xe6   : > { %v5092_v59 = vld [vmem:[%s7897_s5 + $0x50] sm:$0xf] }
  0xea   : > { %v1505_v8 = vpop.f32.mrf.mxu2  ;;  %v1534_v11 = vpop.f32.mrf.mxu0 }
  0xeb   : > { %v1523_v9 = vpop.f32.mrf.mxu3  ;;  %v1552_v12 = vpop.f32.mrf.mxu1  ;;  %v1535_v38 = vadd.f32 %v1534_v11, %v1517_v37  ;;  %v5108_v37 = vld [vmem:[%s7897_s5 + $0x78] sm:$0xf] }
  0xec   : > { %v5866_v9 = vld [vmem:[%s7897_s5 + $0x94] sm:$0xf] }
  0xed   : > { %v1553_v46 = vadd.f32 %v1552_v12, %v1535_v38  ;;  %v5125_v11 = vor.u32 %v5866_v9, %v5122_v10  ;;  %v5863_v12 = vld [vmem:[%s7897_s5 + $0x7c] sm:$0xf]  ;;  %v5062_v38 = vld [vmem:[%s7897_s5 + $0x24] sm:$0xf0]  ;;  %v5856_v9 = vld [vmem:[%s7897_s5 + $0x40] sm:$0xf0] }
  0xee   : > { %v5113_v14 = vor.u32 %v5863_v12, %v5110_v13  ;;  %v5060_v12 = vld [vmem:[%s7897_s5 + $0x18] sm:$0xf]  ;;  %v5852_v13 = vld [vmem:[%s7897_s5 + $0x20] sm:$0xf0] }
  0xef   : > { %5977 = vmatpush.bf16.msrb.mxu3 %v5125_v11  ;;  %1870 = vmatpush.bf16.msrb.mxu1 %v5125_v11 }
  0xf2   : > { %v1570_v17 = vpop.f32.mrf.mxu2  ;;  %v1536_v20 = vpop.f32.mrf.mxu0 }
  0xf3   : > { %v1588_v18 = vpop.f32.mrf.mxu3  ;;  %v1554_v21 = vpop.f32.mrf.mxu1  ;;  %v1537_v23 = vadd.f32 %v1536_v20, %v1519_v19  ;;  %v1571_v47 = vadd.f32 %v1570_v17, %v1553_v46  ;;  %5978 = vmatpush.bf16.msrb.mxu3 %v5113_v14  ;;  %1871 = vmatpush.bf16.msrb.mxu1 %v5113_v14  ;;  %v5101_v17 = vor.u32 %v5860_v15, %v5098_v16  ;;  %v5870_v19 = vld [vmem:[%s7897_s5 + $0xb0] sm:$0xf0]  ;;  %v5857_v20 = vld [vmem:[%s7897_s5 + $0x4c] sm:$0xf]  ;;  %v5068_v14 = vld [vmem:[%s7897_s5 + $0x20] sm:$0xf] }
  0xf4   : > { %v5089_v25 = vor.u32 %v5857_v20, %v5086_v22  ;;  %v5061_v15 = vor.u32 %v5852_v13, %v5060_v12  ;;  %v5853_v16 = vld [vmem:[%s7897_s5 + $0x28] sm:$0xf0]  ;;  %v5056_v20 = vld [vmem:[%s7897_s5 + $0x8] sm:$0xf] }
  0xf5   : > { %v1555_v26 = vadd.f32 %v1554_v21, %v1537_v23  ;;  %v6658_v50 = vadd.f32 %v1588_v18, %v1571_v47  ;;  %v5132_v18 = vld [vmem:[%s7897_s5 + $0xa8] sm:$0xf]  ;;  %v5140_v23 = vld [vmem:[%s7897_s5 + $0xb0] sm:$0xf]  ;;  %v5096_v47 = vld [vmem:[%s7897_s5 + $0x60] sm:$0xf] }
  0xf6   : > { %v5133_v21 = vor.u32 %v5870_v19, %v5132_v18  ;;  %v5048_v18 = vld [vmem:[%s7897_s5] sm:$0xf]  ;;  %v5849_v19 = vld [vmem:[%s7897_s5 + $0x8] sm:$0xf0] }
  0xf7   : > { %5979 = vmatpush.bf16.msrb.mxu3 %v5101_v17  ;;  %1872 = vmatpush.bf16.msrb.mxu1 %v5101_v17  ;;  %v5069_v17 = vor.u32 %v5853_v16, %v5068_v14  ;;  %v5049_v22 = vor.u32 %v5849_v19, %v5048_v18 }
  0xf8   : > { %1851 = vmatpush.bf16.msrb.mxu0 %v5133_v21 }
  0xfa   : > { %v1572_v27 = vpop.f32.mrf.mxu2  ;;  %v1539_v32 = vpop.f32.mrf.mxu0 }
  0xfb   : > { %v1590_v28 = vpop.f32.mrf.mxu3  ;;  %v1573_v31 = vadd.f32 %v1572_v27, %v1555_v26  ;;  %v1557_v33 = vpop.f32.mrf.mxu1  ;;  %v1540_v36 = vadd.f32 %v1539_v32, %v1522_v30  ;;  %v5141_v26 = vor.u32 %v5871_v24, %v5140_v23  ;;  %5980 = vmatpush.bf16.msrb.mxu3 %v5089_v25  ;;  %v5120_v27 = vld [vmem:[%s7897_s5 + $0x90] sm:$0xf]  ;;  %v5128_v32 = vld [vmem:[%s7897_s5 + $0x98] sm:$0xf]  ;;  %1873 = vmatpush.bf16.msrb.mxu1 %v5089_v25  ;;  %v5850_v23 = vld [vmem:[%s7897_s5 + $0x10] sm:$0xf0] }
  0xfc   : > { %v5057_v25 = vor.u32 %v5850_v23, %v5056_v20 }
  0xfd   : > { %v6652_v35 = vadd.f32 %v1590_v28, %v1573_v31  ;;  %v1558_v39 = vadd.f32 %v1557_v33, %v1540_v36  ;;  %1887 = vmatpush.bf16.msrb.mxu2 %v5141_v26  ;;  %v5867_v28 = vld [vmem:[%s7897_s5 + $0x98] sm:$0xf0]  ;;  %v5074_v31 = vld [vmem:[%s7897_s5 + $0x3c] sm:$0xf0]  ;;  %v5868_v33 = vld [vmem:[%s7897_s5 + $0xa0] sm:$0xf0] }
  0xfe   : > { %v5121_v30 = vor.u32 %v5867_v28, %v5120_v27  ;;  %v5077_v34 = vor.u32 %v5854_v29, %v5074_v31  ;;  %v5129_v36 = vor.u32 %v5868_v33, %v5128_v32 }
  0xff   : > { %1604 = vadd.xlane.f32.xlu1 %v6652_v35 }
 0x100   : > { %1852 = vmatpush.bf16.msrb.mxu0 %v5121_v30  ;;  %5981 = vmatpush.bf16.msrb.mxu3 %v5077_v34 }
 0x101   : > { %1888 = vmatpush.bf16.msrb.mxu2 %v5129_v36  ;;  %1874 = vmatpush.bf16.msrb.mxu1 %v5077_v34 }
 0x102   : > { %v1575_v40 = vpop.f32.mrf.mxu2  ;;  %v1541_v43 = vpop.f32.mrf.mxu0 }
 0x103   : > { %v1593_v41 = vpop.f32.mrf.mxu3  ;;  %v1576_v42 = vadd.f32 %v1575_v40, %v1558_v39  ;;  %v1559_v44 = vpop.f32.mrf.mxu1  ;;  %v5864_v39 = vld [vmem:[%s7897_s5 + $0x80] sm:$0xf0]  ;;  %v5851_v40 = vld [vmem:[%s7897_s5 + $0x1c] sm:$0xf]  ;;  %v5865_v43 = vld [vmem:[%s7897_s5 + $0x88] sm:$0xf0] }
 0x104   : > { %v5065_v44 = vor.u32 %v5851_v40, %v5062_v38  ;;  %v6031_v40 = vld [vmem:[%s7895_s3] ss:$0 sm:$0xff] }
 0x105   : > { %v6655_v45 = vadd.f32 %v1593_v41, %v1576_v42  ;;  %v5109_v41 = vor.u32 %v5864_v39, %v5108_v37  ;;  %v5116_v42 = vld [vmem:[%s7897_s5 + $0x80] sm:$0xf] }
 0x106   : > { %v5117_v46 = vor.u32 %v5865_v43, %v5116_v42  ;;  %5982 = vmatpush.bf16.msrb.mxu3 %v5065_v44  ;;  %1875 = vmatpush.bf16.msrb.mxu1 %v5065_v44  ;;  %v6032_v43 = vld [vmem:[%s7896_s4] ss:$0 sm:$0xff] }
 0x107   : > { %1606 = vadd.xlane.f32.xlu0 %v6655_v45  ;;  %1853 = vmatpush.bf16.msrb.mxu0 %v5109_v41 }
 0x108   : > { %1889 = vmatpush.bf16.msrb.mxu2 %v5117_v46 }
 0x10a   : > { %v1577_v48 = vpop.f32.mrf.mxu2 }
 0x10b   : > { %v1595_v49 = vpop.f32.mrf.mxu3  ;;  %v5861_v48 = vld [vmem:[%s7897_s5 + $0x68] sm:$0xf0] }
 0x10c   : > { %v5848_v49 = vld [vmem:[%s7897_s5 + $0x4] sm:$0xf]  ;;  %v5097_v51 = vor.u32 %v5861_v48, %v5096_v47  ;;  %1890 = vmatpush.bf16.msrb.mxu2 %v5105_v56 }
 0x10d   : > { %v5053_v55 = vor.u32 %v5848_v49, %v5050_v52 }
 0x10e   : > { %1854 = vmatpush.bf16.msrb.mxu0 %v5097_v51 }
 0x10f   : > { %1602 = vadd.xlane.f32.xlu0 %v6658_v50  ;;  %5983 = vmatpush.bf16.msrb.mxu3 %v5053_v55 }
 0x110   : > { %1876 = vmatpush.bf16.msrb.mxu1 %v5053_v55 }
 0x172   : > { %v1605_v3 = vpop.xlane.xlu1 %1604 }
 0x173   : > { %v1616_v5 = vmul.f32 %v6667_v60, %v1605_v3  ;;  %v5072_v3 = vld [vmem:[%s7897_s5 + $0x30] sm:$0xf] }
 0x175   : > { %v6683_v7 = vsub.f32 %v6652_v35, %v1616_v5  ;;  %v5855_v5 = vld [vmem:[%s7897_s5 + $0x38] sm:$0xf0] }
 0x177   : > { %v1622_v8 = vmul.f32 %v6683_v7, %v6683_v7 }
 0x17a   : > { %v1607_v61 = vpop.xlane.xlu0 %1606 }
 0x17b   : > { %v1617_v62 = vmul.f32 %v6667_v60, %v1607_v61  ;;  %v5085_v61 = vor.u32 %v5858_v58, %v5084_v57 }
 0x17d   : > { %v6671_v63 = vsub.f32 %v6655_v45, %v1617_v62  ;;  %v5859_v62 = vld [vmem:[%s7897_s5 + $0x58] sm:$0xf0]  ;;  %1855 = vmatpush.bf16.msrb.mxu0 %v5085_v61 }
 0x17f   : > { %v1623_v0 = vmul.f32 %v6671_v63, %v6671_v63 }
 0x181   : > { %1628 = vadd.xlane.f32.xlu1 %v1623_v0  ;;  %v5093_v0 = vor.u32 %v5859_v62, %v5092_v59 }
 0x182   : > { %v1603_v1 = vpop.xlane.xlu0 %1602 }
 0x183   : > { %v1615_v2 = vmul.f32 %v6667_v60, %v1603_v1  ;;  %1891 = vmatpush.bf16.msrb.mxu2 %v5093_v0 }
 0x185   : > { %v6677_v4 = vsub.f32 %v6658_v50, %v1615_v2 }
 0x187   : > { %v1621_v6 = vmul.f32 %v6677_v4, %v6677_v4 }
 0x189   : > { %1624 = vadd.xlane.f32.xlu2 %v1621_v6  ;;  %v5080_v6 = vld [vmem:[%s7897_s5 + $0x38] sm:$0xf] }
 0x18a   : > { %v5081_v11 = vor.u32 %v5856_v9, %v5080_v6 }
 0x18c   : > { %1892 = vmatpush.bf16.msrb.mxu2 %v5081_v11 }
 0x190   : > { %1893 = vmatpush.bf16.msrb.mxu2 %v5069_v17 }
 0x191   : > { %1626 = vadd.xlane.f32.xlu2 %v1622_v8  ;;  %v5073_v8 = vor.u32 %v5855_v5, %v5072_v3 }
 0x193   : > { %1856 = vmatpush.bf16.msrb.mxu0 %v5073_v8 }
 0x194   : > { %1894 = vmatpush.bf16.msrb.mxu2 %v5057_v25 }
 0x197   : > { %1857 = vmatpush.bf16.msrb.mxu0 %v5061_v15 }
 0x19b   : > { %1858 = vmatpush.bf16.msrb.mxu0 %v5049_v22 }
 0x1f4   : > { %v1629_v1 = vpop.xlane.xlu1 %1628 }
 0x1f5   : > { %v1632_v2 = vmul.f32 %v1629_v1, %v6667_v60 }
 0x1f7   : > { %v1635_v10 = vadd.f32 1e-06, %v1632_v2 }
 0x1f9   : > { %6047 = vrsqrt.f32 %v1635_v10  ;;  %vm1662_vm2 = vweird.f32 %v1635_v10 }
 0x1fc   : > { %v1625_v21 = vpop.xlane.xlu2 %1624 }
 0x1fd   : > { %v1630_v24 = vmul.f32 %v1625_v21, %v6667_v60 }
 0x1ff   : > { %v6048_v26 = vpop.eup %6047  ;;  %v1633_v27 = vadd.f32 1e-06, %v1630_v24 }
 0x200   : > { %v1657_v28 = vmul.f32 %v6048_v26, %v1635_v10  ;;  %vm1663_vm1 = vweird.f32 %v6048_v26 }
 0x201   : > { %6049 = vrsqrt.f32 %v1633_v27  ;;  %vm1664_vm3 = vmor %vm1662_vm2, %vm1663_vm1  ;;  %vm1642_vm5 = vweird.f32 %v1633_v27 }
 0x202   : > { %v1658_v29 = vmul.f32 %v6048_v26, %v1657_v28 }
 0x204   : > { %v1659_v30 = vmul.f32 0.5, %v1658_v29  ;;  %v1627_v31 = vpop.xlane.xlu2 %1626 }
 0x205   : > { %v1631_v32 = vmul.f32 %v1627_v31, %v6667_v60 }
 0x206   : > { %v1660_v33 = vsub.f32 1.5, %v1659_v30 }
 0x207   : > { %v6050_v34 = vpop.eup %6049  ;;  %v1634_v36 = vadd.f32 1e-06, %v1631_v32 }
 0x208   : > { %v1661_v37 = vmul.f32 %v6048_v26, %v1660_v33  ;;  %v1637_v39 = vmul.f32 %v6050_v34, %v1633_v27  ;;  %vm1643_vm4 = vweird.f32 %v6050_v34 }
 0x209   : > { %6051 = vrsqrt.f32 %v1634_v36  ;;  %vm1644_vm6 = vmor %vm1642_vm5, %vm1643_vm4  ;;  %vm1652_vm8 = vweird.f32 %v1634_v36 }
 0x20a   : > { %v1665_v41 = vsel %vm1664_vm3, %v6048_v26, %v1661_v37  ;;  %v1638_v38 = vmul.f32 %v6050_v34, %v1637_v39 }
 0x20b   : > { %v1668_v42 = vmul.f32 %v1665_v41, %v6671_v63 }
 0x20c   : > { %v1639_v44 = vmul.f32 0.5, %v1638_v38 }
 0x20d   : > { %v1674_v46 = vmul.f32 %v6031_v40, %v1668_v42 }
 0x20e   : > { %v1640_v47 = vsub.f32 1.5, %v1639_v44 }
 0x20f   : > { %v6052_v48 = vpop.eup %6051  ;;  %v1680_v49 = vadd.f32 %v6032_v43, %v1674_v46 }
 0x210   : > { %v1641_v51 = vmul.f32 %v6050_v34, %v1640_v47  ;;  %v1647_v52 = vmul.f32 %v6052_v48, %v1634_v36  ;;  %vm1653_vm7 = vweird.f32 %v6052_v48 }
 0x211   : > { %v1714_v53 = vpack.c.bf16 %v1680_v49, %v1680_v49  ;;  %vm1654_vm9 = vmor %vm1652_vm8, %vm1653_vm7 }
 0x212   : > { %v1648_v54 = vmul.f32 %v6052_v48, %v1647_v52  ;;  %v1645_v55 = vsel %vm1644_vm6, %v6050_v34, %v1641_v51 }
 0x213   : > { %1882 = vmatmul.bf16.vlgmr.msrb.gmra.mxu3 %v1714_v53  ;;  %v1666_v57 = vmul.f32 %v1645_v55, %v6677_v4  ;;  %v1715_v4 = vld [vmem:[%s7898_s6] sm:$0x7] }
 0x214   : > { %v1649_v56 = vmul.f32 0.5, %v1648_v54  ;;  %v1718_v5 = vperm.slane %v1715_v4, 1  ;;  %v1719_v22 = vperm.slane %v1715_v4, 2 }
 0x215   : > { %v1672_v62 = vmul.f32 %v6031_v40, %v1666_v57 }
 0x216   : > { %v1650_v63 = vsub.f32 1.5, %v1649_v56 }
 0x217   : > { %v1678_v1 = vadd.f32 %v6032_v43, %v1672_v62 }
 0x218   : > { %v1651_v58 = vmul.f32 %v6052_v48, %v1650_v63 }
 0x21a   : > { %v1655_v59 = vsel %vm1654_vm9, %v6052_v48, %v1651_v58 }
 0x21b   : > { %v1667_v61 = vmul.f32 %v1655_v59, %v6683_v7  ;;  %v1717_v7 = vperm.slane %v1715_v4, 0 }
 0x21d   : > { %v1673_v0 = vmul.f32 %v6031_v40, %v1667_v61  ;;  %v1597_v40 = vlaneseq }
 0x21f   : > { %v1679_v2 = vadd.f32 %v6032_v43, %v1673_v0  ;;  %v6877_v38 = vand.u32 127, %v1597_v40 }
 0x221   : > { %v1713_v3 = vpack.c.bf16 %v1679_v2, %v1678_v1  ;;  %vm1599_vm11 = vcmp.lt.s32.totalorder %v6877_v38, 17 }
 0x223   : > { %1859 = vmatmul.bf16.vlgmr.msrb.gmra.mxu0 %v1713_v3  ;;  %1877 = vmatmul.bf16.vlgmr.msrb.gmra.mxu1 %v1713_v3 }
 0x224   : > { %1895 = vmatmul.bf16.vlgmr.msrb.gmra.mxu2 %v1713_v3 }
 0x233   : > { %1864 = vmatmul.bf16.gmra.mxu0 %v1714_v53 }
 0x234   : > { %1900 = vmatmul.bf16.gmra.mxu2 %v1714_v53 }
 0x296   : > { %v1883_v6 = vpop.f32.mrf.mxu3 }
 0x297   : > { %v1884_v8 = vadd.f32 %v1883_v6, %v1718_v5 }
 0x299   : > { %5142 = vmatpush.xpose.msk.msra.mxu3 %vm1922_vm10, %v1884_v8  ;;  %2096 = vrot.lane.b32.xlu0 %v1884_v8, %s6206_s26 }
 0x29e   : > { %v1885_v9 = vpop.f32.mrf.mxu3 }
 0x2a0   : > { %v1860_v10 = vpop.f32.mrf.mxu0  ;;  %v1878_v11 = vpop.f32.mrf.mxu1 }
 0x2a1   : > { %v1861_v12 = vadd.f32 %v1860_v10, %v1717_v7  ;;  %v1879_v13 = vadd.f32 %v1878_v11, %v1718_v5 }
 0x2a3   : > { %2092 = vrot.lane.b32.xlu2 %v1879_v13, %s6206_s26  ;;  %2086 = vrot.lane.b32.xlu0 %v1861_v12, %s6206_s26 }
 0x2a7   : > { %v1896_v14 = vpop.f32.mrf.mxu2 }
 0x2a8   : > { %v1862_v15 = vpop.f32.mrf.mxu0  ;;  %v1880_v16 = vpop.f32.mrf.mxu1  ;;  %v6856_v28 = vadd.f32 %v1896_v14, %v1719_v22 }
 0x2a9   : > { %v1863_v17 = vadd.f32 %v1862_v15, %v1717_v7  ;;  %v1881_v18 = vadd.f32 %v1880_v16, %v1718_v5 }
 0x2ab   : > { %2094 = vrot.lane.b32.xlu1 %v1881_v18, %s6206_s26  ;;  %5143 = vmatpush.xpose.msk.msra.mxu3 %vm1922_vm10, %v1881_v18 }
 0x2ac   : > { %2088 = vrot.lane.b32.xlu2 %v1863_v17, %s6206_s26 }
 0x2af   : > { %v1898_v19 = vpop.f32.mrf.mxu2  ;;  %5144 = vmatpush.xpose.msk.msra.mxu3 %vm1922_vm10, %v1879_v13 }
 0x2b0   : > { %v1865_v20 = vpop.f32.mrf.mxu0  ;;  %v1899_v24 = vadd.f32 %v1898_v19, %v1719_v22 }
 0x2b1   : > { %v1866_v21 = vadd.f32 %v1865_v20, %v1717_v7 }
 0x2b2   : > { %5145 = vmatmul.msk.f32.vlgmr.msra.gmra.mxu3 %vm1922_vm10, %v1861_v12 }
 0x2b3   : > { %2273 = vrot.lane.b32.xlu1 %v1884_v8, %s7913_s28  ;;  %2090 = vrot.lane.b32.xlu0 %v1866_v21, %s6206_s26 }
 0x2b4   : > { %2271 = vrot.lane.b32.xlu2 %v1881_v18, %s7913_s28 }
 0x2b7   : > { %v1901_v23 = vpop.f32.mrf.mxu2 }
 0x2b8   : > { %v1902_v25 = vadd.f32 %v1901_v23, %v1719_v22  ;;  %v1867_v26 = vpop.f32.mrf.mxu0 }
 0x2ba   : > { %2029 = vmatpush.msrb.mxu3 %v1902_v25  ;;  %v6852_v27 = vpack.i.bf16 %v1899_v24, %v1902_v25 }
 0x2bb   : > { %5146 = vmatmul.msk.f32.gmra.mxu3 %vm1922_vm10, %v1863_v17  ;;  %2269 = vrot.lane.b32.xlu1 %v1879_v13, %s7913_s28 }
 0x2bc   : > { %2030 = vmatpush.msrb.mxu3 %v1899_v24  ;;  %2265 = vrot.lane.b32.xlu2 %v1863_v17, %s7913_s28 }
 0x2bd   : > { %2263 = vrot.lane.b32.xlu0 %v1861_v12, %s7913_s28 }
 0x2be   : > { %2031 = vmatpush.msrb.mxu3 %v6856_v28 }
 0x2bf   : > { %v1903_v29 = vpop.f32.mrf.mxu2 }
 0x2c3   : > { %5147 = vmatmul.msk.f32.gmra.mxu3 %vm1922_vm10, %v1866_v21  ;;  %2447 = vrot.lane.b32.xlu1 %v1884_v8, %s7911_s29 }
 0x2c4   : > { %2445 = vrot.lane.b32.xlu2 %v1881_v18, %s7911_s29 }
 0x2c5   : > { %2267 = vrot.lane.b32.xlu0 %v1866_v21, %s7913_s28 }
 0x2cb   : > { %2443 = vrot.lane.b32.xlu1 %v1879_v13, %s7911_s29 }
 0x2cc   : > { %2439 = vrot.lane.b32.xlu2 %v1863_v17, %s7911_s29 }
 0x2cd   : > { %2437 = vrot.lane.b32.xlu0 %v1861_v12, %s7911_s29 }
 0x2d3   : > { %2441 = vrot.lane.b32.xlu1 %v1866_v21, %s7911_s29 }
 0x2fd   : > { %v2093_v31 = vpop.permute.xlu2 %2092 }
 0x306   : > { %v2089_v32 = vpop.permute.xlu2 %2088 }
 0x30b   : > { %v2097_v30 = vpop.permute.xlu0 %2096 }
 0x30c   : > { %5161 = vmatpush.xpose.msk.msra.mxu1 %vm1922_vm10, %v2097_v30 }
 0x30e   : > { %v2272_v36 = vpop.permute.xlu2 %2271 }
 0x315   : > { %v2087_v34 = vpop.permute.xlu0 %2086 }
 0x316   : > { %v2266_v41 = vpop.permute.xlu2 %2265 }
 0x31d   : > { %v2095_v33 = vpop.permute.xlu1 %2094 }
 0x31e   : > { %5162 = vmatpush.xpose.msk.msra.mxu1 %vm1922_vm10, %v2095_v33  ;;  %v2446_v48 = vpop.permute.xlu2 %2445 }
 0x322   : > { %5163 = vmatpush.xpose.msk.msra.mxu1 %vm1922_vm10, %v2093_v31 }
 0x325   : > { %v2274_v37 = vpop.permute.xlu1 %2273  ;;  %5164 = vmatmul.msk.f32.vlgmr.msra.gmra.mxu1 %vm1922_vm10, %v2087_v34  ;;  %v2091_v42 = vpop.permute.xlu0 %2090 }
 0x326   : > { %5180 = vmatpush.xpose.msk.msrb.mxu1 %vm1922_vm10, %v2274_v37  ;;  %v2440_v0 = vpop.permute.xlu2 %2439 }
 0x32a   : > { %5181 = vmatpush.xpose.msk.msrb.mxu1 %vm1922_vm10, %v2272_v36 }
 0x32d   : > { %v2270_v39 = vpop.permute.xlu1 %2269  ;;  %5165 = vmatmul.msk.f32.gmra.mxu1 %vm1922_vm10, %v2089_v32 }
 0x32e   : > { %5182 = vmatpush.xpose.msk.msrb.mxu1 %vm1922_vm10, %v2270_v39 }
 0x32f   : > { %v2264_v51 = vpop.permute.xlu0 %2263 }
 0x335   : > { %v2448_v43 = vpop.permute.xlu1 %2447  ;;  %v1958_v44 = vpop.f32.mrf.mxu3  ;;  %5166 = vmatmul.msk.f32.gmra.mxu1 %vm1922_vm10, %v2091_v42 }
 0x336   : > { %v1967_v46 = vmul.f32 0.17677669, %v1958_v44  ;;  %5199 = vmatpush.xpose.msk.msra.mxu1 %vm1922_vm10, %v2448_v43 }
 0x337   : > { %v2268_v59 = vpop.permute.xlu0 %2267 }
 0x338   : > { %v1970_v47 = vsel %vm1599_vm11, %v1967_v46, -1e+30 }
 0x339   : > { %v1974_v49 = vsel %vm1973_vm12, %v1970_v47, -inf }
 0x33a   : > { %1975 = vmax.xlane.f32.xlu0 %v1974_v49  ;;  %5200 = vmatpush.xpose.msk.msra.mxu1 %vm1922_vm10, %v2446_v48 }
 0x33d   : > { %v2444_v52 = vpop.permute.xlu1 %2443  ;;  %5183 = vmatmul.msk.f32.vlgmr.msrb.gmra.mxu1 %vm1922_vm10, %v2264_v51 }
 0x33e   : > { %v1961_v53 = vpop.f32.mrf.mxu3  ;;  %5201 = vmatpush.xpose.msk.msra.mxu1 %vm1922_vm10, %v2444_v52 }
 0x33f   : > { %v1968_v54 = vmul.f32 0.17677669, %v1961_v53  ;;  %v2438_v62 = vpop.permute.xlu0 %2437 }
 0x341   : > { %v1971_v55 = vsel %vm1599_vm11, %v1968_v54, -1e+30 }
 0x342   : > { %v1977_v56 = vsel %vm1973_vm12, %v1971_v55, -inf }
 0x343   : > { %1978 = vmax.xlane.f32.xlu1 %v1977_v56 }
 0x345   : > { %5184 = vmatmul.msk.f32.gmra.mxu1 %vm1922_vm10, %v2266_v41  ;;  %v2442_v1 = vpop.permute.xlu1 %2441 }
 0x346   : > { %v1964_v63 = vpop.f32.mrf.mxu3 }
 0x347   : > { %v1969_v57 = vmul.f32 0.17677669, %v1964_v63 }
 0x349   : > { %v6894_v58 = vsel %vm1599_vm11, %v1969_v57, -1e+30 }
 0x34a   : > { %v1980_v61 = vsel %vm1973_vm12, %v6894_v58, -inf }
 0x34b   : > { %1981 = vmax.xlane.f32.xlu1 %v1980_v61 }
 0x34d   : > { %5185 = vmatmul.msk.f32.gmra.mxu1 %vm1922_vm10, %v2268_v59 }
 0x355   : > { %5202 = vmatmul.msk.f32.vlgmr.msra.gmra.mxu1 %vm1922_vm10, %v2438_v62 }
 0x35d   : > { %5203 = vmatmul.msk.f32.gmra.mxu1 %vm1922_vm10, %v2440_v0 }
 0x365   : > { %5204 = vmatmul.msk.f32.gmra.mxu1 %vm1922_vm10, %v2442_v1 }
 0x3a2   : > { %v2127_v2 = vpop.f32.mrf.mxu1 }
 0x3a3   : > { %v2136_v3 = vmul.f32 0.17677669, %v2127_v2 }
 0x3a5   : > { %v6904_v4 = vsel %vm1599_vm11, %v2136_v3, -1e+30 }
 0x3a6   : > { %v2142_v5 = vsel %vm1973_vm12, %v6904_v4, -inf }
 0x3a7   : > { %2143 = vmax.xlane.f32.xlu0 %v2142_v5 }
 0x3aa   : > { %v2130_v6 = vpop.f32.mrf.mxu1 }
 0x3ab   : > { %v2137_v8 = vmul.f32 0.17677669, %v2130_v6 }
 0x3ad   : > { %v6910_v7 = vsel %vm1599_vm11, %v2137_v8, -1e+30  ;;  %v1976_v18 = vpop.xlane.xlu0 %1975 }
 0x3ae   : > { %v2145_v9 = vsel %vm1973_vm12, %v6910_v7, -inf  ;;  %v1983_v21 = vsub.f32 %v1970_v47, %v1976_v18 }
 0x3af   : > { %2146 = vmax.xlane.f32.xlu2 %v2145_v9 }
 0x3b0   : > { %v1986_v24 = vmul.f32 1.442695, %v1983_v21 }
 0x3b2   : > { %v2133_v10 = vpop.f32.mrf.mxu1  ;;  %6053 = vpow2.f32 %v1986_v24 }
 0x3b3   : > { %v2138_v11 = vmul.f32 0.17677669, %v2133_v10 }
 0x3b5   : > { %v6916_v12 = vsel %vm1599_vm11, %v2138_v11, -1e+30 }
 0x3b6   : > { %v2148_v13 = vsel %vm1973_vm12, %v6916_v12, -inf  ;;  %v1979_v25 = vpop.xlane.xlu1 %1978 }
 0x3b7   : > { %2149 = vmax.xlane.f32.xlu1 %v2148_v13  ;;  %v1984_v30 = vsub.f32 %v1971_v55, %v1979_v25 }
 0x3b8   : > { %v6940_v36 = vpop.eup %6053 }
 0x3b9   : > { %v1988_v33 = vmul.f32 1.442695, %v1984_v30  ;;  %v1992_v41 = vsel %vm1973_vm12, %v6940_v36, 0.0 }
 0x3ba   : > { %v2304_v14 = vpop.f32.mrf.mxu1 }
 0x3bb   : > { %v2313_v15 = vmul.f32 0.17677669, %v2304_v14  ;;  %6055 = vpow2.f32 %v1988_v33 }
 0x3bd   : > { %v6922_v16 = vsel %vm1599_vm11, %v2313_v15, -1e+30 }
 0x3be   : > { %v2319_v17 = vsel %vm1973_vm12, %v6922_v16, -inf  ;;  %v1982_v63 = vpop.xlane.xlu1 %1981 }
 0x3bf   : > { %2320 = vmax.xlane.f32.xlu2 %v2319_v17  ;;  %v1985_v8 = vsub.f32 %v6894_v58, %v1982_v63 }
 0x3c1   : > { %v6952_v43 = vpop.eup %6055 }
 0x3c2   : > { %v2307_v19 = vpop.f32.mrf.mxu1  ;;  %v1995_v44 = vsel %vm1973_vm12, %v6952_v43, 0.0 }
 0x3c3   : > { %v2314_v20 = vmul.f32 0.17677669, %v2307_v19 }
 0x3c5   : > { %v6928_v22 = vsel %vm1599_vm11, %v2314_v20, -1e+30 }
 0x3c6   : > { %v2322_v23 = vsel %vm1973_vm12, %v6928_v22, -inf }
 0x3c7   : > { %2323 = vmax.xlane.f32.xlu0 %v2322_v23 }
 0x3ca   : > { %v2310_v26 = vpop.f32.mrf.mxu1 }
 0x3cb   : > { %v2315_v29 = vmul.f32 0.17677669, %v2310_v26 }
 0x3cd   : > { %v6934_v31 = vsel %vm1599_vm11, %v2315_v29, -1e+30 }
 0x3ce   : > { %v2325_v32 = vsel %vm1973_vm12, %v6934_v31, -inf }
 0x3cf   : > { %2326 = vmax.xlane.f32.xlu2 %v2325_v32 }
 0x3d0   : > { %2178 = vrot.lane.b32.xlu1 %v6856_v28, %s6206_s26 }
 0x3d2   : > { %v2478_v34 = vpop.f32.mrf.mxu1 }
 0x3d3   : > { %v2487_v37 = vmul.f32 0.17677669, %v2478_v34 }
 0x3d5   : > { %v6944_v39 = vsel %vm1599_vm11, %v2487_v37, -1e+30 }
 0x3d6   : > { %v2493_v40 = vsel %vm1973_vm12, %v6944_v39, -inf }
 0x3d7   : > { %2494 = vmax.xlane.f32.xlu0 %v2493_v40  ;;  %1993 = vadd.xlane.f32.xlu2 %v1992_v41 }
 0x3d8   : > { %6007 = vrot.lane.b32.xlu1 %v6852_v27, %s7913_s28 }
 0x3da   : > { %v2481_v42 = vpop.f32.mrf.mxu1 }
 0x3db   : > { %v2488_v51 = vmul.f32 0.17677669, %v2481_v42 }
 0x3dd   : > { %v6966_v52 = vsel %vm1599_vm11, %v2488_v51, -1e+30 }
 0x3de   : > { %v2496_v53 = vsel %vm1973_vm12, %v6966_v52, -inf }
 0x3df   : > { %1996 = vadd.xlane.f32.xlu2 %v1995_v44 }
 0x3e2   : > { %v2484_v46 = vpop.f32.mrf.mxu1 }
 0x3e3   : > { %v2489_v47 = vmul.f32 0.17677669, %v2484_v46 }
 0x3e5   : > { %v6958_v48 = vsel %vm1599_vm11, %v2489_v47, -1e+30 }
 0x3e6   : > { %v2499_v49 = vsel %vm1973_vm12, %v6958_v48, -inf }
 0x3e7   : > { %2500 = vmax.xlane.f32.xlu2 %v2499_v49 }
 0x3eb   : > { %6002 = vrot.lane.b32.xlu0 %v6852_v27, %s6206_s26 }
 0x402   : > { %2497 = vmax.xlane.f32.xlu1 %v2496_v53 }
 0x41a   : > { %v2144_v54 = vpop.xlane.xlu0 %2143 }
 0x41b   : > { %v2151_v55 = vsub.f32 %v6904_v4, %v2144_v54  ;;  %2352 = vrot.lane.b32.xlu1 %v6856_v28, %s7913_s28 }
 0x41d   : > { %v2154_v56 = vmul.f32 1.442695, %v2151_v55 }
 0x41f   : > { %6057 = vpow2.f32 %v2154_v56 }
 0x422   : > { %v2147_v57 = vpop.xlane.xlu2 %2146 }
 0x423   : > { %v2152_v59 = vsub.f32 %v6910_v7, %v2147_v57 }
 0x425   : > { %v6974_v61 = vpop.eup %6057  ;;  %v2156_v62 = vmul.f32 1.442695, %v2152_v59 }
 0x426   : > { %v2160_v0 = vsel %vm1973_vm12, %v6974_v61, 0.0 }
 0x427   : > { %6059 = vpow2.f32 %v2156_v62  ;;  %2161 = vadd.xlane.f32.xlu2 %v2160_v0 }
 0x42a   : > { %v2150_v1 = vpop.xlane.xlu1 %2149 }
 0x42b   : > { %v2153_v2 = vsub.f32 %v6916_v12, %v2150_v1  ;;  %v1990_v12 = vmul.f32 1.442695, %v1985_v8 }
 0x42d   : > { %v6979_v3 = vpop.eup %6059  ;;  %v2158_v4 = vmul.f32 1.442695, %v2153_v2 }
 0x42e   : > { %v2163_v5 = vsel %vm1973_vm12, %v6979_v3, 0.0 }
 0x42f   : > { %6061 = vpow2.f32 %v2158_v4  ;;  %2164 = vadd.xlane.f32.xlu2 %v2163_v5 }
 0x432   : > { %v2321_v6 = vpop.xlane.xlu2 %2320 }
 0x433   : > { %v2328_v7 = vsub.f32 %v6922_v16, %v2321_v6 }
 0x435   : > { %v6985_v9 = vpop.eup %6061  ;;  %v2331_v10 = vmul.f32 1.442695, %v2328_v7 }
 0x436   : > { %v2166_v11 = vsel %vm1973_vm12, %v6985_v9, 0.0 }
 0x437   : > { %6063 = vpow2.f32 %v2331_v10  ;;  %2167 = vadd.xlane.f32.xlu2 %v2166_v11 }
 0x438   : > { %6065 = vpow2.f32 %v1990_v12 }
 0x43a   : > { %v2324_v13 = vpop.xlane.xlu0 %2323 }
 0x43b   : > { %v2329_v14 = vsub.f32 %v6928_v22, %v2324_v13 }
 0x43d   : > { %v6990_v15 = vpop.eup %6063  ;;  %v2333_v17 = vmul.f32 1.442695, %v2329_v14 }
 0x43e   : > { %v2337_v58 = vsel %vm1973_vm12, %v6990_v15, 0.0  ;;  %v6994_v16 = vpop.eup %6065 }
 0x43f   : > { %6067 = vpow2.f32 %v2333_v17  ;;  %2338 = vadd.xlane.f32.xlu0 %v2337_v58  ;;  %v1998_v20 = vsel %vm1973_vm12, %v6994_v16, 0.0 }
 0x442   : > { %v2327_v18 = vpop.xlane.xlu2 %2326 }
 0x443   : > { %v2330_v19 = vsub.f32 %v6934_v31, %v2327_v18 }
 0x445   : > { %v6999_v21 = vpop.eup %6067  ;;  %v2335_v23 = vmul.f32 1.442695, %v2330_v19  ;;  %1999 = vadd.xlane.f32.xlu1 %v1998_v20 }
 0x446   : > { %v2340_v22 = vsel %vm1973_vm12, %v6999_v21, 0.0 }
 0x447   : > { %6069 = vpow2.f32 %v2335_v23  ;;  %2341 = vadd.xlane.f32.xlu2 %v2340_v22 }
 0x44a   : > { %v1994_v24 = vpop.xlane.xlu2 %1993  ;;  %v2495_v25 = vpop.xlane.xlu0 %2494 }
 0x44b   : > { %6071 = vrcp.f32 %v1994_v24  ;;  %v2502_v26 = vsub.f32 %v6944_v39, %v2495_v25  ;;  %v2179_v39 = vpop.permute.xlu1 %2178 }
 0x44d   : > { %v7004_v29 = vpop.eup %6069  ;;  %v2505_v30 = vmul.f32 1.442695, %v2502_v26 }
 0x44e   : > { %v2343_v31 = vsel %vm1973_vm12, %v7004_v29, 0.0 }
 0x44f   : > { %2344 = vadd.xlane.f32.xlu2 %v2343_v31  ;;  %6073 = vpow2.f32 %v2505_v30 }
 0x451   : > { %v6072_v32 = vpop.eup %6071 }
 0x452   : > { %v2004_v33 = vmul.f32 %v6072_v32, %v6940_v36  ;;  %v1997_v34 = vpop.xlane.xlu2 %1996 }
 0x453   : > { %6075 = vrcp.f32 %v1997_v34  ;;  %6012 = vrot.lane.b32.xlu0 %v6852_v27, %s7911_s29  ;;  %v6008_v46 = vpop.permute.xlu1 %6007 }
 0x454   : > { %5148 = vmatmul.msk.f32.vlgmr.msrb.gmra.mxu3 %vm1973_vm12, %v2004_v33  ;;  %v6009_v27 = vunpack.i.l.bf16 %v6008_v46  ;;  %v6010_v49 = vunpack.i.h.bf16 %v6008_v46  ;;  %v5877_v46 = vld [vmem:[%s7899_s7 + $0x28] sm:$0xff] }
 0x455   : > { %v7012_v37 = vpop.eup %6073 }
 0x456   : > { %v2511_v40 = vsel %vm1973_vm12, %v7012_v37, 0.0 }
 0x457   : > { %2512 = vadd.xlane.f32.xlu2 %v2511_v40 }
 0x459   : > { %v6076_v41 = vpop.eup %6075 }
 0x45a   : > { %v2005_v42 = vmul.f32 %v6076_v41, %v6952_v43  ;;  %v2501_v51 = vpop.xlane.xlu2 %2500 }
 0x45b   : > { %v2504_v53 = vsub.f32 %v6958_v48, %v2501_v51 }
 0x45c   : > { %5149 = vmatmul.msk.f32.gmra.mxu3 %vm1973_vm12, %v2005_v42 }
 0x45d   : > { %v6003_v36 = vpop.permute.xlu0 %6002  ;;  %v2509_v54 = vmul.f32 1.442695, %v2504_v53 }
 0x45e   : > { %v6004_v44 = vunpack.i.l.bf16 %v6003_v36  ;;  %v6005_v47 = vunpack.i.h.bf16 %v6003_v36 }
 0x45f   : > { %6077 = vpow2.f32 %v2509_v54 }
 0x460   : > { %2209 = vmatpush.msra.mxu2 %v6004_v44 }
 0x462   : > { %2210 = vmatpush.msra.mxu2 %v6005_v47  ;;  %v5876_v47 = vld [vmem:[%s7899_s7 + $0x20] sm:$0xff] }
 0x464   : > { %2211 = vmatpush.msra.mxu2 %v2179_v39  ;;  %v5875_v39 = vld [vmem:[%s7899_s7 + $0x18] sm:$0xff] }
 0x465   : > { %v7020_v63 = vpop.eup %6077  ;;  %2248 = vmatpush.bf16.msra.mxu3 %v5875_v39 }
 0x466   : > { %2383 = vmatpush.msrb.mxu2 %v6009_v27  ;;  %v2517_v57 = vsel %vm1973_vm12, %v7020_v63, 0.0 }
 0x468   : > { %2384 = vmatpush.msrb.mxu2 %v6010_v49 }
 0x475   : > { %v2498_v55 = vpop.xlane.xlu1 %2497 }
 0x476   : > { %v2503_v43 = vsub.f32 %v6966_v52, %v2498_v55 }
 0x478   : > { %v2507_v56 = vmul.f32 1.442695, %v2503_v43 }
 0x47a   : > { %6079 = vpow2.f32 %v2507_v56  ;;  %v5879_v56 = vld [vmem:[%s7899_s7 + $0x38] sm:$0xff] }
 0x47d   : > { %2518 = vadd.xlane.f32.xlu0 %v2517_v57 }
 0x480   : > { %v7024_v59 = vpop.eup %6079 }
 0x481   : > { %v2514_v62 = vsel %vm1973_vm12, %v7024_v59, 0.0 }
 0x482   : > { %2515 = vadd.xlane.f32.xlu2 %v2514_v62 }
 0x48d   : > { %v2353_v48 = vpop.permute.xlu1 %2352 }
 0x48e   : > { %2385 = vmatpush.msrb.mxu2 %v2353_v48 }
 0x49a   : > { %v2162_v0 = vpop.xlane.xlu2 %2161  ;;  %2526 = vrot.lane.b32.xlu2 %v6856_v28, %s7911_s29  ;;  %v5873_v28 = vld [vmem:[%s7899_s7 + $0x8] sm:$0xff] }
 0x49b   : > { %6081 = vrcp.f32 %v2162_v0  ;;  %2068 = vmatpush.bf16.msra.mxu0 %v5873_v28 }
 0x4a1   : > { %v6082_v52 = vpop.eup %6081 }
 0x4a2   : > { %v2172_v1 = vmul.f32 %v6082_v52, %v6974_v61  ;;  %v2165_v2 = vpop.xlane.xlu2 %2164 }
 0x4a3   : > { %6083 = vrcp.f32 %v2165_v2 }
 0x4a4   : > { %5167 = vmatmul.msk.f32.vlgmr.msra.gmra.mxu2 %vm1973_vm12, %v2172_v1 }
 0x4a9   : > { %v6084_v4 = vpop.eup %6083 }
 0x4aa   : > { %v2168_v5 = vpop.xlane.xlu2 %2167  ;;  %v2173_v6 = vmul.f32 %v6084_v4, %v6979_v3 }
 0x4ab   : > { %6085 = vrcp.f32 %v2168_v5 }
 0x4ac   : > { %5168 = vmatmul.msk.f32.gmra.mxu2 %vm1973_vm12, %v2173_v6 }
 0x4b1   : > { %v6086_v8 = vpop.eup %6085 }
 0x4b2   : > { %v2339_v7 = vpop.xlane.xlu0 %2338  ;;  %v2174_v10 = vmul.f32 %v6086_v8, %v6985_v9  ;;  %v5872_v9 = vld [vmem:[%s7899_s7] sm:$0xff] }
 0x4b3   : > { %6087 = vrcp.f32 %v2339_v7  ;;  %2069 = vmatpush.bf16.msra.mxu0 %v5872_v9 }
 0x4b4   : > { %5169 = vmatmul.msk.f32.gmra.mxu2 %vm1973_vm12, %v2174_v10 }
 0x4b7   : > { %2422 = vmatpush.bf16.msrb.mxu0 %v5877_v46  ;;  %v5276_v46 = vld [vmem:[%s7903_s11 + $0x70] sm:$0xf] }
 0x4b8   : > { %v2000_v61 = vpop.xlane.xlu1 %1999 }
 0x4b9   : > { %v6088_v11 = vpop.eup %6087  ;;  %6089 = vrcp.f32 %v2000_v61 }
 0x4ba   : > { %v2349_v3 = vmul.f32 %v6088_v11, %v6990_v15  ;;  %v2342_v12 = vpop.xlane.xlu2 %2341 }
 0x4bb   : > { %6091 = vrcp.f32 %v2342_v12  ;;  %2423 = vmatpush.bf16.msrb.mxu0 %v5876_v47  ;;  %v5895_v47 = vld [vmem:[%s7903_s11 + $0x74] sm:$0xf0] }
 0x4bc   : > { %5186 = vmatmul.msk.f32.vlgmr.msrb.gmra.mxu2 %vm1973_vm12, %v2349_v3 }
 0x4bf   : > { %v6090_v13 = vpop.eup %6089 }
 0x4c0   : > { %v2006_v14 = vmul.f32 %v6090_v13, %v6994_v16  ;;  %v6033_v13 = vld [vmem:[%s7900_s8] ss:$0 sm:$0xff] }
 0x4c1   : > { %v6092_v17 = vpop.eup %6091 }
 0x4c2   : > { %5150 = vmatmul.msk.f32.gmra.mxu3 %vm1973_vm12, %v2006_v14  ;;  %v2345_v58 = vpop.xlane.xlu2 %2344  ;;  %v2350_v18 = vmul.f32 %v6092_v17, %v6999_v21 }
 0x4c3   : > { %6093 = vrcp.f32 %v2345_v58 }
 0x4c4   : > { %5187 = vmatmul.msk.f32.gmra.mxu2 %vm1973_vm12, %v2350_v18 }
 0x4c5   : > { %v6013_v15 = vpop.permute.xlu0 %6012 }
 0x4c6   : > { %v6014_v19 = vunpack.i.l.bf16 %v6013_v15  ;;  %v6015_v20 = vunpack.i.h.bf16 %v6013_v15 }
 0x4c8   : > { %2557 = vmatpush.msra.mxu2 %v6014_v19 }
 0x4c9   : > { %v6094_v23 = vpop.eup %6093 }
 0x4ca   : > { %2558 = vmatpush.msra.mxu2 %v6015_v20  ;;  %v2351_v22 = vmul.f32 %v6094_v23, %v7004_v29  ;;  %v2513_v26 = vpop.xlane.xlu2 %2512 }
 0x4cb   : > { %6095 = vrcp.f32 %v2513_v26 }
 0x4cc   : > { %5188 = vmatmul.msk.f32.gmra.mxu2 %vm1973_vm12, %v2351_v22 }
 0x4d1   : > { %v6096_v30 = vpop.eup %6095 }
 0x4d2   : > { %v2523_v31 = vmul.f32 %v6096_v30, %v7012_v37  ;;  %v5874_v37 = vld [vmem:[%s7899_s7 + $0x10] sm:$0xff] }
 0x4d3   : > { %2249 = vmatpush.bf16.msra.mxu3 %v5874_v37 }
 0x4d7   : > { %v2033_v16 = vpop.f32.mrf.mxu3  ;;  %2596 = vmatpush.bf16.msrb.mxu3 %v5879_v56 }
 0x4df   : > { %v2036_v24 = vpop.f32.mrf.mxu3 }
 0x4e0   : > { %v2042_v25 = vpack.c.bf16 %v2036_v24, %v2033_v16 }
 0x4e2   : > { %5159 = vmatmul.msk.bf16.vlgmr.msra.gmra.mxu0 %vm1922_vm10, %v2042_v25 }
 0x4f0   : > { %v2519_v33 = vpop.xlane.xlu0 %2518 }
 0x4f5   : > { %v2516_v21 = vpop.xlane.xlu2 %2515 }
 0x4f6   : > { %6097 = vrcp.f32 %v2516_v21 }
 0x4f7   : > { %6099 = vrcp.f32 %v2519_v33 }
 0x4fc   : > { %v6098_v29 = vpop.eup %6097 }
 0x4fd   : > { %v2527_v32 = vpop.permute.xlu2 %2526  ;;  %v2524_v34 = vmul.f32 %v6098_v29, %v7024_v59  ;;  %v6100_v40 = vpop.eup %6099  ;;  %v5878_v59 = vld [vmem:[%s7899_s7 + $0x30] sm:$0xff] }
 0x4fe   : > { %2559 = vmatpush.msra.mxu2 %v2527_v32  ;;  %v2525_v41 = vmul.f32 %v6100_v40, %v7020_v63  ;;  %2597 = vmatpush.bf16.msrb.mxu3 %v5878_v59  ;;  %v5260_v59 = vld [vmem:[%s7903_s11 + $0x50] sm:$0xf] }
 0x4ff   : > { %5205 = vmatmul.msk.f32.vlgmr.msra.gmra.mxu2 %vm1973_vm12, %v2523_v31 }
 0x507   : > { %5206 = vmatmul.msk.f32.gmra.mxu2 %vm1973_vm12, %v2524_v34 }
 0x50f   : > { %5207 = vmatmul.msk.f32.gmra.mxu2 %vm1973_vm12, %v2525_v41 }
 0x527   : > { %v2213_v42 = vpop.f32.mrf.mxu2 }
 0x52f   : > { %v2216_v36 = vpop.f32.mrf.mxu2 }
 0x530   : > { %v2222_v44 = vpack.c.bf16 %v2216_v36, %v2213_v42 }
 0x532   : > { %5178 = vmatmul.msk.bf16.vlgmr.msra.gmra.mxu3 %vm1922_vm10, %v2222_v44 }
 0x537   : > { %v2219_v27 = vpop.f32.mrf.mxu2 }
 0x538   : > { %v2223_v49 = vpack.c.bf16 %v2219_v27, %v2219_v27  ;;  %v5894_v27 = vld [vmem:[%s7903_s11 + $0x74] sm:$0xf] }
 0x53f   : > { %v2387_v54 = vpop.f32.mrf.mxu2 }
 0x542   : > { %5179 = vmatmul.msk.bf16.gmra.mxu3 %vm1922_vm10, %v2223_v49  ;;  %v5277_v49 = vor.u32 %v5895_v47, %v5276_v46 }
 0x544   : > { %2792 = vmatpush.bf16.msra.mxu0 %v5277_v49 }
 0x545   : > { %v2039_v51 = vpop.f32.mrf.mxu3 }
 0x546   : > { %v2043_v53 = vpack.c.bf16 %v2039_v51, %v2039_v51  ;;  %v5278_v51 = vld [vmem:[%s7903_s11 + $0x78] sm:$0xf0] }
 0x547   : > { %v2390_v55 = vpop.f32.mrf.mxu2 }
 0x548   : > { %5160 = vmatmul.msk.bf16.gmra.mxu0 %vm1922_vm10, %v2043_v53  ;;  %v2396_v43 = vpack.c.bf16 %v2390_v55, %v2387_v54  ;;  %v5281_v53 = vor.u32 %v5894_v27, %v5278_v51  ;;  %v5268_v54 = vld [vmem:[%s7903_s11 + $0x60] sm:$0xf]  ;;  %v5893_v55 = vld [vmem:[%s7903_s11 + $0x64] sm:$0xf0] }
 0x549   : > { %v5269_v56 = vor.u32 %v5893_v55, %v5268_v54 }
 0x54a   : > { %2810 = vmatpush.bf16.msrb.mxu1 %v5281_v53 }
 0x54b   : > { %2793 = vmatpush.bf16.msra.mxu0 %v5269_v56 }
 0x54f   : > { %v2393_v63 = vpop.f32.mrf.mxu2 }
 0x550   : > { %v2397_v57 = vpack.c.bf16 %v2393_v63, %v2393_v63  ;;  %v5270_v63 = vld [vmem:[%s7903_s11 + $0x68] sm:$0xf0] }
 0x558   : > { %5197 = vmatmul.msk.bf16.vlgmr.msrb.gmra.mxu0 %vm1922_vm10, %v2396_v43  ;;  %v5892_v43 = vld [vmem:[%s7903_s11 + $0x64] sm:$0xf] }
 0x55f   : > { %v2071_v2 = vpop.f32.mrf.mxu0 }
 0x560   : > { %v2083_v9 = vadd.f32 %v6033_v13, %v2071_v2  ;;  %v5252_v2 = vld [vmem:[%s7903_s11 + $0x40] sm:$0xf] }
 0x567   : > { %v2073_v5 = vpop.f32.mrf.mxu0 }
 0x568   : > { %5198 = vmatmul.msk.bf16.gmra.mxu0 %vm1922_vm10, %v2397_v57  ;;  %v2084_v15 = vadd.f32 %v6033_v13, %v2073_v5  ;;  %v5273_v57 = vor.u32 %v5892_v43, %v5270_v63  ;;  %v5888_v5 = vld [vmem:[%s7903_s11 + $0x44] sm:$0xf] }
 0x56a   : > { %2811 = vmatpush.bf16.msrb.mxu1 %v5273_v57 }
 0x582   : > { %v2561_v62 = vpop.f32.mrf.mxu2 }
 0x58a   : > { %v2564_v48 = vpop.f32.mrf.mxu2 }
 0x58b   : > { %v2570_v0 = vpack.c.bf16 %v2564_v48, %v2561_v62  ;;  %v5891_v62 = vld [vmem:[%s7903_s11 + $0x54] sm:$0xf0]  ;;  %v5890_v48 = vld [vmem:[%s7903_s11 + $0x54] sm:$0xf] }
 0x58d   : > { %5216 = vmatmul.msk.bf16.vlgmr.msrb.gmra.mxu3 %vm1922_vm10, %v2570_v0  ;;  %v5261_v0 = vor.u32 %v5891_v62, %v5260_v59 }
 0x58f   : > { %2794 = vmatpush.bf16.msra.mxu0 %v5261_v0 }
 0x592   : > { %v2567_v52 = vpop.f32.mrf.mxu2 }
 0x593   : > { %v2571_v1 = vpack.c.bf16 %v2567_v52, %v2567_v52  ;;  %v5262_v52 = vld [vmem:[%s7903_s11 + $0x58] sm:$0xf0] }
 0x59d   : > { %5217 = vmatmul.msk.bf16.gmra.mxu3 %vm1922_vm10, %v2571_v1  ;;  %v5265_v1 = vor.u32 %v5890_v48, %v5262_v52  ;;  %v6034_v48 = vld [vmem:[%s7901_s9] ss:$0 sm:$0xff] }
 0x59f   : > { %2812 = vmatpush.bf16.msrb.mxu1 %v5265_v1 }
 0x5b5   : > { %v2251_v4 = vpop.f32.mrf.mxu3 }
 0x5b6   : > { %v2260_v14 = vadd.f32 %v2251_v4, %v2083_v9  ;;  %v5889_v4 = vld [vmem:[%s7903_s11 + $0x44] sm:$0xf0] }
 0x5b7   : > { %v5885_v9 = vld [vmem:[%s7903_s11 + $0x24] sm:$0xf0] }
 0x5bd   : > { %v2253_v6 = vpop.f32.mrf.mxu3 }
 0x5be   : > { %v2261_v20 = vadd.f32 %v2253_v6, %v2084_v15  ;;  %v5253_v6 = vor.u32 %v5889_v4, %v5252_v2  ;;  %v5228_v15 = vld [vmem:[%s7903_s11 + $0x10] sm:$0xf] }
 0x5c0   : > { %2795 = vmatpush.bf16.msra.mxu0 %v5253_v6 }
 0x5c5   : > { %v2076_v8 = vpop.f32.mrf.mxu0  ;;  %v2256_v7 = vpop.f32.mrf.mxu3 }
 0x5c6   : > { %v2085_v16 = vadd.f32 %v6033_v13, %v2076_v8  ;;  %v5254_v8 = vld [vmem:[%s7903_s11 + $0x48] sm:$0xf0]  ;;  %v5236_v13 = vld [vmem:[%s7903_s11 + $0x20] sm:$0xf] }
 0x5c8   : > { %v2262_v26 = vadd.f32 %v2256_v7, %v2085_v16  ;;  %v5257_v7 = vor.u32 %v5888_v5, %v5254_v8  ;;  %v6035_v5 = vld [vmem:[%s7902_s10] ss:$0 sm:$0xff] }
 0x5ca   : > { %2813 = vmatpush.bf16.msrb.mxu1 %v5257_v7 }
 0x5cd   : > { %v2078_v10 = vpop.f32.mrf.mxu0  ;;  %v2258_v28 = vpop.f32.mrf.mxu3 }
 0x5ce   : > { %v5244_v10 = vld [vmem:[%s7903_s11 + $0x30] sm:$0xf]  ;;  %v5887_v28 = vld [vmem:[%s7903_s11 + $0x34] sm:$0xf0] }
 0x5d5   : > { %v2425_v61 = vpop.f32.mrf.mxu0 }
 0x5d6   : > { %v2434_v17 = vadd.f32 %v2425_v61, %v2260_v14  ;;  %v5886_v61 = vld [vmem:[%s7903_s11 + $0x34] sm:$0xf]  ;;  %v5884_v14 = vld [vmem:[%s7903_s11 + $0x24] sm:$0xf] }
 0x5dd   : > { %v2427_v11 = vpop.f32.mrf.mxu0 }
 0x5de   : > { %v2435_v23 = vadd.f32 %v2427_v11, %v2261_v20  ;;  %v5245_v11 = vor.u32 %v5887_v28, %v5244_v10  ;;  %v5883_v20 = vld [vmem:[%s7903_s11 + $0x14] sm:$0xf0] }
 0x5df   : > { %v5229_v16 = vor.u32 %v5883_v20, %v5228_v15  ;;  %v5901_v15 = vld [vmem:[%s7905_s13 + $0x28] sm:$0xff] }
 0x5e0   : > { %2796 = vmatpush.bf16.msra.mxu0 %v5245_v11  ;;  %v5909_v20 = vld [vmem:[%s7905_s13 + $0x68] sm:$0xff] }
 0x5e5   : > { %v2430_v3 = vpop.f32.mrf.mxu0 }
 0x5e6   : > { %v2436_v21 = vadd.f32 %v2430_v3, %v2262_v26  ;;  %v5246_v3 = vld [vmem:[%s7903_s11 + $0x38] sm:$0xf0] }
 0x5ed   : > { %v2432_v12 = vpop.f32.mrf.mxu0 }
 0x5ee   : > { %v5249_v12 = vor.u32 %v5886_v61, %v5246_v3 }
 0x5f0   : > { %2814 = vmatpush.bf16.msrb.mxu1 %v5249_v12 }
 0x610   : > { %v2599_v58 = vpop.f32.mrf.mxu3 }
 0x611   : > { %v2608_v18 = vadd.f32 %v2599_v58, %v2434_v17  ;;  %v5237_v17 = vor.u32 %v5885_v9, %v5236_v13  ;;  %v5238_v58 = vld [vmem:[%s7903_s11 + $0x28] sm:$0xf0] }
 0x613   : > { %v7086_v19 = vadd.f32 %v2608_v18, %v6658_v50  ;;  %v5241_v18 = vor.u32 %v5884_v14, %v5238_v58  ;;  %2797 = vmatpush.bf16.msra.mxu0 %v5237_v17  ;;  %v5911_v58 = vld [vmem:[%s7905_s13 + $0x78] sm:$0xff] }
 0x614   : > { %3032 = vmatpush.bf16.msra.mxu3 %v5911_v58 }
 0x615   : > { %2616 = vadd.xlane.f32.xlu1 %v7086_v19  ;;  %2815 = vmatpush.bf16.msrb.mxu1 %v5241_v18  ;;  %v5902_v18 = vld [vmem:[%s7905_s13 + $0x30] sm:$0xff] }
 0x617   : > { %2798 = vmatpush.bf16.msra.mxu0 %v5229_v16  ;;  %v5899_v16 = vld [vmem:[%s7905_s13 + $0x18] sm:$0xff] }
 0x618   : > { %v2601_v22 = vpop.f32.mrf.mxu3 }
 0x619   : > { %v2609_v24 = vadd.f32 %v2601_v22, %v2435_v23  ;;  %v5882_v23 = vld [vmem:[%s7903_s11 + $0x14] sm:$0xf] }
 0x61b   : > { %v7090_v25 = vadd.f32 %v2609_v24, %v6652_v35  ;;  %v5230_v24 = vld [vmem:[%s7903_s11 + $0x18] sm:$0xf0] }
 0x61d   : > { %2618 = vadd.xlane.f32.xlu1 %v7090_v25 }
 0x620   : > { %v2604_v30 = vpop.f32.mrf.mxu3 }
 0x621   : > { %v2610_v31 = vadd.f32 %v2604_v30, %v2436_v21  ;;  %v5233_v21 = vor.u32 %v5882_v23, %v5230_v24  ;;  %v5900_v23 = vld [vmem:[%s7905_s13 + $0x20] sm:$0xff]  ;;  %v5907_v24 = vld [vmem:[%s7905_s13 + $0x58] sm:$0xff] }
 0x623   : > { %v7094_v32 = vadd.f32 %v2610_v31, %v6655_v45  ;;  %2816 = vmatpush.bf16.msrb.mxu1 %v5233_v21  ;;  %v5220_v31 = vld [vmem:[%s7903_s11] sm:$0xf]  ;;  %v5906_v21 = vld [vmem:[%s7905_s13 + $0x50] sm:$0xff] }
 0x625   : > { %2620 = vadd.xlane.f32.xlu2 %v7094_v32 }
 0x628   : > { %v2606_v50 = vpop.f32.mrf.mxu3 }
 0x629   : > { %v5881_v50 = vld [vmem:[%s7903_s11 + $0x4] sm:$0xf0] }
 0x688   : > { %v2617_v33 = vpop.xlane.xlu1 %2616 }
 0x689   : > { %v2622_v29 = vmul.f32 %v2617_v33, %v6667_v60  ;;  %v5221_v33 = vor.u32 %v5881_v50, %v5220_v31  ;;  %v5905_v31 = vld [vmem:[%s7905_s13 + $0x48] sm:$0xff]  ;;  %v2706_v50 = vld [vmem:[%s7904_s12] sm:$0x3] }
 0x68b   : > { %v7099_v34 = vsub.f32 %v7086_v19, %v2622_v29  ;;  %v5880_v29 = vld [vmem:[%s7903_s11 + $0x4] sm:$0xf]  ;;  %2799 = vmatpush.bf16.msra.mxu0 %v5221_v33  ;;  %v2708_v33 = vperm.slane %v2706_v50, 0 }
 0x68d   : > { %v2628_v35 = vmul.f32 %v7099_v34, %v7099_v34 }
 0x68f   : > { %2631 = vadd.xlane.f32.xlu1 %v2628_v35  ;;  %v5222_v35 = vld [vmem:[%s7903_s11 + $0x8] sm:$0xf0] }
 0x690   : > { %v2619_v39 = vpop.xlane.xlu1 %2618 }
 0x691   : > { %v2623_v40 = vmul.f32 %v2619_v39, %v6667_v60  ;;  %v5225_v39 = vor.u32 %v5880_v29, %v5222_v35  ;;  %v2709_v29 = vperm.slane %v2706_v50, 1  ;;  %v5896_v35 = vld [vmem:[%s7905_s13] sm:$0xff] }
 0x693   : > { %v7105_v41 = vsub.f32 %v7090_v25, %v2623_v40  ;;  %2817 = vmatpush.bf16.msrb.mxu1 %v5225_v39  ;;  %v5904_v39 = vld [vmem:[%s7905_s13 + $0x40] sm:$0xff] }
 0x695   : > { %v2629_v45 = vmul.f32 %v7105_v41, %v7105_v41 }
 0x697   : > { %2633 = vadd.xlane.f32.xlu1 %v2629_v45 }
 0x698   : > { %v2621_v37 = vpop.xlane.xlu2 %2620 }
 0x699   : > { %v2624_v42 = vmul.f32 %v2621_v37, %v6667_v60 }
 0x69b   : > { %v7111_v36 = vsub.f32 %v7094_v32, %v2624_v42 }
 0x69d   : > { %v2630_v44 = vmul.f32 %v7111_v36, %v7111_v36 }
 0x69f   : > { %2635 = vadd.xlane.f32.xlu1 %v2630_v44 }
 0x702   : > { %v2632_v22 = vpop.xlane.xlu1 %2631 }
 0x703   : > { %v2637_v26 = vmul.f32 %v2632_v22, %v6667_v60  ;;  %v5908_v22 = vld [vmem:[%s7905_s13 + $0x60] sm:$0xff] }
 0x705   : > { %v2640_v30 = vadd.f32 1e-06, %v2637_v26  ;;  %v5898_v26 = vld [vmem:[%s7905_s13 + $0x10] sm:$0xff] }
 0x707   : > { %6101 = vrsqrt.f32 %v2640_v30  ;;  %vm2649_vm14 = vweird.f32 %v2640_v30 }
 0x70a   : > { %v2634_v40 = vpop.xlane.xlu1 %2633 }
 0x70b   : > { %v2638_v45 = vmul.f32 %v2634_v40, %v6667_v60 }
 0x70d   : > { %v6102_v37 = vpop.eup %6101  ;;  %v2641_v42 = vadd.f32 1e-06, %v2638_v45 }
 0x70e   : > { %v2644_v44 = vmul.f32 %v6102_v37, %v2640_v30  ;;  %vm2650_vm13 = vweird.f32 %v6102_v37  ;;  %v5897_v30 = vld [vmem:[%s7905_s13 + $0x8] sm:$0xff] }
 0x70f   : > { %6103 = vrsqrt.f32 %v2641_v42  ;;  %vm2651_vm15 = vmor %vm2649_vm14, %vm2650_vm13  ;;  %vm2659_vm1 = vweird.f32 %v2641_v42 }
 0x710   : > { %v2645_v46 = vmul.f32 %v6102_v37, %v2644_v44 }
 0x712   : > { %v2646_v47 = vmul.f32 0.5, %v2645_v46  ;;  %v2636_v27 = vpop.xlane.xlu1 %2635 }
 0x713   : > { %v2639_v49 = vmul.f32 %v2636_v27, %v6667_v60 }
 0x714   : > { %v2647_v51 = vsub.f32 1.5, %v2646_v47 }
 0x715   : > { %v6104_v53 = vpop.eup %6103  ;;  %v2642_v54 = vadd.f32 1e-06, %v2639_v49 }
 0x716   : > { %v2648_v55 = vmul.f32 %v6102_v37, %v2647_v51  ;;  %v2654_v43 = vmul.f32 %v6104_v53, %v2641_v42  ;;  %vm2660_vm0 = vweird.f32 %v6104_v53 }
 0x717   : > { %6105 = vrsqrt.f32 %v2642_v54  ;;  %vm2661_vm2 = vmor %vm2659_vm1, %vm2660_vm0  ;;  %vm2669_vm4 = vweird.f32 %v2642_v54 }
 0x718   : > { %v2655_v56 = vmul.f32 %v6104_v53, %v2654_v43  ;;  %v2652_v63 = vsel %vm2651_vm15, %v6102_v37, %v2648_v55 }
 0x719   : > { %v2673_v0 = vmul.f32 %v2652_v63, %v7099_v34 }
 0x71a   : > { %v2656_v57 = vmul.f32 0.5, %v2655_v56 }
 0x71b   : > { %v2679_v6 = vmul.f32 %v6034_v48, %v2673_v0 }
 0x71c   : > { %v2657_v59 = vsub.f32 1.5, %v2656_v57 }
 0x71d   : > { %v6106_v62 = vpop.eup %6105  ;;  %v2685_v61 = vadd.f32 %v6035_v5, %v2679_v6 }
 0x71e   : > { %v2658_v52 = vmul.f32 %v6104_v53, %v2657_v59  ;;  %v2664_v1 = vmul.f32 %v6106_v62, %v2642_v54  ;;  %vm2670_vm3 = vweird.f32 %v6106_v62 }
 0x71f   : > { %vm2671_vm5 = vmor %vm2669_vm4, %vm2670_vm3 }
 0x720   : > { %v2662_v2 = vsel %vm2661_vm2, %v6104_v53, %v2658_v52  ;;  %v2665_v4 = vmul.f32 %v6106_v62, %v2664_v1 }
 0x721   : > { %v2674_v8 = vmul.f32 %v2662_v2, %v7105_v41  ;;  %v5903_v41 = vld [vmem:[%s7905_s13 + $0x38] sm:$0xff] }
 0x722   : > { %v2666_v7 = vmul.f32 0.5, %v2665_v4  ;;  %3014 = vmatpush.bf16.msrb.mxu2 %v5903_v41 }
 0x723   : > { %v2680_v10 = vmul.f32 %v6034_v48, %v2674_v8 }
 0x724   : > { %v2667_v28 = vsub.f32 1.5, %v2666_v7 }
 0x725   : > { %v2686_v11 = vadd.f32 %v6035_v5, %v2680_v10 }
 0x726   : > { %v2668_v34 = vmul.f32 %v6106_v62, %v2667_v28  ;;  %3015 = vmatpush.bf16.msrb.mxu2 %v5902_v18 }
 0x727   : > { %v2704_v3 = vpack.c.bf16 %v2686_v11, %v2685_v61 }
 0x728   : > { %v2672_v12 = vsel %vm2671_vm5, %v6106_v62, %v2668_v34 }
 0x729   : > { %2800 = vmatmul.bf16.vlgmr.msra.gmra.mxu0 %v2704_v3  ;;  %2818 = vmatmul.bf16.vlgmr.msrb.gmra.mxu1 %v2704_v3  ;;  %v2675_v13 = vmul.f32 %v2672_v12, %v7111_v36  ;;  %v5910_v36 = vld [vmem:[%s7905_s13 + $0x70] sm:$0xff] }
 0x72a   : > { %3033 = vmatpush.bf16.msra.mxu3 %v5910_v36  ;;  %3016 = vmatpush.bf16.msrb.mxu2 %v5901_v15 }
 0x72b   : > { %v2681_v9 = vmul.f32 %v6034_v48, %v2675_v13 }
 0x72d   : > { %v2687_v14 = vadd.f32 %v6035_v5, %v2681_v9 }
 0x72e   : > { %3034 = vmatpush.bf16.msra.mxu3 %v5909_v20  ;;  %3017 = vmatpush.bf16.msrb.mxu2 %v5900_v23 }
 0x72f   : > { %v2705_v17 = vpack.c.bf16 %v2687_v14, %v2687_v14 }
 0x732   : > { %3035 = vmatpush.bf16.msra.mxu3 %v5908_v22  ;;  %3018 = vmatpush.bf16.msrb.mxu2 %v5899_v16 }
 0x736   : > { %3036 = vmatpush.bf16.msra.mxu3 %v5907_v24  ;;  %3019 = vmatpush.bf16.msrb.mxu2 %v5898_v26 }
 0x739   : > { %2805 = vmatmul.bf16.gmra.mxu0 %v2705_v17  ;;  %2823 = vmatmul.bf16.gmra.mxu1 %v2705_v17 }
 0x73a   : > { %3037 = vmatpush.bf16.msra.mxu3 %v5906_v21  ;;  %3020 = vmatpush.bf16.msrb.mxu2 %v5897_v30 }
 0x73e   : > { %3038 = vmatpush.bf16.msra.mxu3 %v5905_v31  ;;  %3021 = vmatpush.bf16.msrb.mxu2 %v5896_v35 }
 0x742   : > { %3039 = vmatpush.bf16.msra.mxu3 %v5904_v39 }
 0x7a6   : > { %v2801_v40 = vpop.f32.mrf.mxu0  ;;  %v2819_v45 = vpop.f32.mrf.mxu1 }
 0x7a7   : > { %v2802_v37 = vadd.f32 %v2801_v40, %v2708_v33  ;;  %v2820_v42 = vadd.f32 %v2819_v45, %v2709_v29 }
 0x7a9   : > { %v2840_v44 = vmul.f32 0.044715, %v2802_v37  ;;  %v2841_v46 = vmul.f32 0.044715, %v2820_v42  ;;  %v2834_v55 = vmul.f32 0.7978846, %v2802_v37 }
 0x7aa   : > { %v2835_v63 = vmul.f32 0.7978846, %v2820_v42  ;;  %v2828_v24 = vmul.f32 0.5, %v2802_v37  ;;  %v2829_v31 = vmul.f32 0.5, %v2820_v42 }
 0x7ab   : > { %v2846_v47 = vmul.f32 %v2840_v44, %v2802_v37  ;;  %v2847_v27 = vmul.f32 %v2841_v46, %v2820_v42 }
 0x7ad   : > { %v2852_v49 = vadd.f32 1.0, %v2846_v47  ;;  %v2853_v51 = vadd.f32 1.0, %v2847_v27 }
 0x7ae   : > { %v2803_v53 = vpop.f32.mrf.mxu0  ;;  %v2821_v54 = vpop.f32.mrf.mxu1 }
 0x7af   : > { %v2804_v43 = vadd.f32 %v2803_v53, %v2708_v33  ;;  %v2822_v56 = vadd.f32 %v2821_v54, %v2709_v29  ;;  %v2858_v57 = vmul.f32 %v2852_v49, %v2834_v55  ;;  %v2859_v62 = vmul.f32 %v2853_v51, %v2835_v63 }
 0x7b1   : > { %v2842_v59 = vmul.f32 0.044715, %v2804_v43  ;;  %v2843_v48 = vmul.f32 0.044715, %v2822_v56  ;;  %6107 = vtanh.f32 %v2858_v57  ;;  %v2836_v1 = vmul.f32 0.7978846, %v2804_v43 }
 0x7b2   : > { %6109 = vtanh.f32 %v2859_v62  ;;  %v2837_v4 = vmul.f32 0.7978846, %v2822_v56  ;;  %v2830_v26 = vmul.f32 0.5, %v2804_v43  ;;  %v2831_v50 = vmul.f32 0.5, %v2822_v56  ;;  %v6036_v57 = vld [vmem:[%s7906_s14] ss:$0 sm:$0xff] }
 0x7b3   : > { %v2848_v0 = vmul.f32 %v2842_v59, %v2804_v43  ;;  %v2849_v52 = vmul.f32 %v2843_v48, %v2822_v56 }
 0x7b5   : > { %v2854_v2 = vadd.f32 1.0, %v2848_v0  ;;  %v2855_v5 = vadd.f32 1.0, %v2849_v52 }
 0x7b6   : > { %v2806_v6 = vpop.f32.mrf.mxu0  ;;  %v2824_v8 = vpop.f32.mrf.mxu1 }
 0x7b7   : > { %v2860_v7 = vmul.f32 %v2854_v2, %v2836_v1  ;;  %v2807_v10 = vadd.f32 %v2806_v6, %v2708_v33  ;;  %v2825_v28 = vadd.f32 %v2824_v8, %v2709_v29  ;;  %v2861_v61 = vmul.f32 %v2855_v5, %v2837_v4  ;;  %v6108_v3 = vpop.eup %6107 }
 0x7b8   : > { %v6110_v13 = vpop.eup %6109  ;;  %v2870_v41 = vadd.f32 1.0, %v6108_v3 }
 0x7b9   : > { %6111 = vtanh.f32 %v2860_v7  ;;  %v2844_v11 = vmul.f32 0.044715, %v2807_v10  ;;  %v2845_v34 = vmul.f32 0.044715, %v2825_v28  ;;  %v2838_v14 = vmul.f32 0.7978846, %v2807_v10 }
 0x7ba   : > { %6113 = vtanh.f32 %v2861_v61  ;;  %v2839_v58 = vmul.f32 0.7978846, %v2825_v28  ;;  %v2871_v23 = vadd.f32 1.0, %v6110_v13  ;;  %v2876_v29 = vmul.f32 %v2870_v41, %v2828_v24  ;;  %v5467_v41 = vld [vmem:[%s7897_s5 + $0x168] sm:$0xf] }
 0x7bb   : > { %v2850_v12 = vmul.f32 %v2844_v11, %v2807_v10  ;;  %v2851_v9 = vmul.f32 %v2845_v34, %v2825_v28  ;;  %v2832_v49 = vmul.f32 0.5, %v2807_v10  ;;  %v2833_v51 = vmul.f32 0.5, %v2825_v28  ;;  %v5455_v24 = vld [vmem:[%s7897_s5 + $0x150] sm:$0xf] }
 0x7bc   : > { %v2877_v39 = vmul.f32 %v2871_v23, %v2829_v31  ;;  %v5935_v23 = vld [vmem:[%s7897_s5 + $0x178] sm:$0xf0]  ;;  %v5457_v31 = vld [vmem:[%s7897_s5 + $0x15c] sm:$0xf0] }
 0x7bd   : > { %v2856_v17 = vadd.f32 1.0, %v2850_v12  ;;  %v2857_v18 = vadd.f32 1.0, %v2851_v9 }
 0x7be   : > { %v2808_v36 = vpop.f32.mrf.mxu0  ;;  %v2826_v15 = vpop.f32.mrf.mxu1 }
 0x7bf   : > { %v6112_v20 = vpop.eup %6111  ;;  %v2862_v22 = vmul.f32 %v2856_v17, %v2838_v14  ;;  %v2863_v30 = vmul.f32 %v2857_v18, %v2839_v58  ;;  %v5934_v58 = vld [vmem:[%s7897_s5 + $0x170] sm:$0xf0]  ;;  %v5933_v18 = vld [vmem:[%s7897_s5 + $0x16c] sm:$0xf]  ;;  %v5469_v15 = vld [vmem:[%s7897_s5 + $0x174] sm:$0xf0] }
 0x7c0   : > { %v6114_v16 = vpop.eup %6113  ;;  %v2872_v21 = vadd.f32 1.0, %v6112_v20  ;;  %v5468_v36 = vor.u32 %v5934_v58, %v5467_v41  ;;  %v5475_v20 = vld [vmem:[%s7897_s5 + $0x170] sm:$0xf]  ;;  %v5915_v41 = vld [vmem:[%s7897_s5 + $0xdc] sm:$0xf] }
 0x7c1   : > { %v2873_v33 = vadd.f32 1.0, %v6114_v16  ;;  %6115 = vtanh.f32 %v2862_v22  ;;  %v5472_v22 = vor.u32 %v5933_v18, %v5469_v15  ;;  %v5476_v16 = vor.u32 %v5935_v23, %v5475_v20  ;;  %v5397_v18 = vld [vmem:[%s7897_s5 + $0xe4] sm:$0xf0]  ;;  %v5917_v15 = vld [vmem:[%s7897_s5 + $0xe8] sm:$0xf0] }
 0x7c2   : > { %v2878_v35 = vmul.f32 %v2872_v21, %v2830_v26  ;;  %6117 = vtanh.f32 %v2863_v30  ;;  %3308 = vmatpush.bf16.msrb.mxu0 %v5468_v36  ;;  %v5931_v26 = vld [vmem:[%s7897_s5 + $0x158] sm:$0xf0]  ;;  %v5930_v21 = vld [vmem:[%s7897_s5 + $0x154] sm:$0xf]  ;;  %v5403_v36 = vld [vmem:[%s7897_s5 + $0xe0] sm:$0xf]  ;;  %v5400_v23 = vor.u32 %v5915_v41, %v5397_v18 }
 0x7c3   : > { %v2879_v40 = vmul.f32 %v2873_v33, %v2831_v50  ;;  %3326 = vmatpush.bf16.msra.mxu1 %v5472_v22  ;;  %3344 = vmatpush.bf16.msra.mxu2 %v5476_v16  ;;  %v5456_v30 = vor.u32 %v5931_v26, %v5455_v24  ;;  %v5463_v50 = vld [vmem:[%s7897_s5 + $0x158] sm:$0xf]  ;;  %v5932_v33 = vld [vmem:[%s7897_s5 + $0x160] sm:$0xf0]  ;;  %v5404_v22 = vor.u32 %v5917_v15, %v5403_v36  ;;  %v5383_v24 = vld [vmem:[%s7897_s5 + $0xc0] sm:$0xf] }
 0x7c4   : > { %v2914_v45 = vpack.c.bf16 %v2878_v35, %v2876_v29  ;;  %v5460_v29 = vor.u32 %v5930_v21, %v5457_v31  ;;  %v5464_v35 = vor.u32 %v5932_v33, %v5463_v50  ;;  %v5913_v26 = vld [vmem:[%s7897_s5 + $0xc8] sm:$0xf0]  ;;  %v5912_v21 = vld [vmem:[%s7897_s5 + $0xc4] sm:$0xf]  ;;  %v5385_v50 = vld [vmem:[%s7897_s5 + $0xcc] sm:$0xf0] }
 0x7c5   : > { %v2915_v44 = vpack.c.bf16 %v2879_v40, %v2877_v39  ;;  %v5443_v39 = vld [vmem:[%s7897_s5 + $0x138] sm:$0xf]  ;;  %v5928_v40 = vld [vmem:[%s7897_s5 + $0x140] sm:$0xf0]  ;;  %v5384_v31 = vor.u32 %v5913_v26, %v5383_v24  ;;  %v5391_v33 = vld [vmem:[%s7897_s5 + $0xc8] sm:$0xf] }
 0x7c6   : > { %3022 = vmatmul.bf16.vlgmr.msrb.gmra.mxu2 %v2914_v45  ;;  %3309 = vmatpush.bf16.msrb.mxu0 %v5456_v30  ;;  %v5927_v45 = vld [vmem:[%s7897_s5 + $0x13c] sm:$0xf] }
 0x7c7   : > { %3040 = vmatmul.bf16.vlgmr.msra.gmra.mxu3 %v2915_v44  ;;  %v6116_v46 = vpop.eup %6115  ;;  %3327 = vmatpush.bf16.msra.mxu1 %v5460_v29  ;;  %v5444_v44 = vor.u32 %v5928_v40, %v5443_v39  ;;  %v5388_v29 = vor.u32 %v5912_v21, %v5385_v50 }
 0x7c8   : > { %v6118_v47 = vpop.eup %6117  ;;  %v2874_v27 = vadd.f32 1.0, %v6116_v46  ;;  %3345 = vmatpush.bf16.msra.mxu2 %v5464_v35  ;;  %v5445_v46 = vld [vmem:[%s7897_s5 + $0x144] sm:$0xf0]  ;;  %v5914_v35 = vld [vmem:[%s7897_s5 + $0xd0] sm:$0xf0] }
 0x7c9   : > { %v2875_v37 = vadd.f32 1.0, %v6118_v47  ;;  %v5451_v47 = vld [vmem:[%s7897_s5 + $0x140] sm:$0xf]  ;;  %v5392_v39 = vor.u32 %v5914_v35, %v5391_v33 }
 0x7ca   : > { %v2880_v53 = vmul.f32 %v2874_v27, %v2832_v49  ;;  %v5929_v27 = vld [vmem:[%s7897_s5 + $0x148] sm:$0xf0]  ;;  %3310 = vmatpush.bf16.msrb.mxu0 %v5444_v44 }
 0x7cb   : > { %v2881_v42 = vmul.f32 %v2875_v37, %v2833_v51  ;;  %v5448_v37 = vor.u32 %v5927_v45, %v5445_v46  ;;  %v5452_v49 = vor.u32 %v5929_v27, %v5451_v47  ;;  %v5431_v51 = vld [vmem:[%s7897_s5 + $0x120] sm:$0xf] }
 0x7cc   : > { %v2916_v54 = vpack.c.bf16 %v2880_v53, %v2880_v53  ;;  %v5925_v53 = vld [vmem:[%s7897_s5 + $0x128] sm:$0xf0] }
 0x7cd   : > { %v2917_v55 = vpack.c.bf16 %v2881_v42, %v2881_v42  ;;  %3328 = vmatpush.bf16.msra.mxu1 %v5448_v37  ;;  %3346 = vmatpush.bf16.msra.mxu2 %v5452_v49  ;;  %v5924_v42 = vld [vmem:[%s7897_s5 + $0x124] sm:$0xf] }
 0x7d6   : > { %3027 = vmatmul.bf16.gmra.mxu2 %v2916_v54  ;;  %v5432_v54 = vor.u32 %v5925_v53, %v5431_v51 }
 0x7d7   : > { %3045 = vmatmul.bf16.gmra.mxu3 %v2917_v55  ;;  %v5433_v55 = vld [vmem:[%s7897_s5 + $0x12c] sm:$0xf0] }
 0x7d8   : > { %3311 = vmatpush.bf16.msrb.mxu0 %v5432_v54 }
 0x849   : > { %v3023_v43 = vpop.f32.mrf.mxu2 }
 0x84a   : > { %v3041_v56 = vpop.f32.mrf.mxu3 }
 0x84b   : > { %v3042_v63 = vadd.f32 %v3041_v56, %v3023_v43  ;;  %v5439_v43 = vld [vmem:[%s7897_s5 + $0x128] sm:$0xf]  ;;  %v5926_v56 = vld [vmem:[%s7897_s5 + $0x130] sm:$0xf0] }
 0x84d   : > { %v3050_v59 = vadd.f32 %v3042_v63, %v7086_v19  ;;  %v5436_v63 = vor.u32 %v5924_v42, %v5433_v55 }
 0x84f   : > { %v7278_v62 = vadd.f32 %v6036_v57, %v3050_v59  ;;  %3329 = vmatpush.bf16.msra.mxu1 %v5436_v63  ;;  %v5419_v59 = vld [vmem:[%s7897_s5 + $0x108] sm:$0xf] }
 0x851   : > { %3064 = vadd.xlane.f32.xlu0 %v7278_v62  ;;  %v3025_v48 = vpop.f32.mrf.mxu2 }
 0x852   : > { %v3043_v0 = vpop.f32.mrf.mxu3 }
 0x853   : > { %v3044_v52 = vadd.f32 %v3043_v0, %v3025_v48  ;;  %v5922_v48 = vld [vmem:[%s7897_s5 + $0x110] sm:$0xf0]  ;;  %v5921_v0 = vld [vmem:[%s7897_s5 + $0x10c] sm:$0xf] }
 0x855   : > { %v3051_v1 = vadd.f32 %v3044_v52, %v7090_v25  ;;  %v5420_v52 = vor.u32 %v5922_v48, %v5419_v59 }
 0x857   : > { %v7282_v2 = vadd.f32 %v6036_v57, %v3051_v1  ;;  %v5421_v1 = vld [vmem:[%s7897_s5 + $0x114] sm:$0xf0]  ;;  %3312 = vmatpush.bf16.msrb.mxu0 %v5420_v52 }
 0x859   : > { %3066 = vadd.xlane.f32.xlu1 %v7282_v2  ;;  %v3028_v4 = vpop.f32.mrf.mxu2 }
 0x85a   : > { %v3046_v5 = vpop.f32.mrf.mxu3 }
 0x85b   : > { %v3047_v6 = vadd.f32 %v3046_v5, %v3028_v4  ;;  %v5427_v4 = vld [vmem:[%s7897_s5 + $0x110] sm:$0xf]  ;;  %v5923_v5 = vld [vmem:[%s7897_s5 + $0x118] sm:$0xf0] }
 0x85d   : > { %v3052_v8 = vadd.f32 %v3047_v6, %v7094_v32  ;;  %v5424_v6 = vor.u32 %v5921_v0, %v5421_v1  ;;  %v6037_v0 = vld [vmem:[%s7895_s3 + $0x1] ss:$0 sm:$0xff] }
 0x85f   : > { %v7286_v7 = vadd.f32 %v6036_v57, %v3052_v8  ;;  %v5440_v57 = vor.u32 %v5926_v56, %v5439_v43  ;;  %v5428_v8 = vor.u32 %v5923_v5, %v5427_v4  ;;  %3330 = vmatpush.bf16.msra.mxu1 %v5424_v6 }
 0x861   : > { %3068 = vadd.xlane.f32.xlu0 %v7286_v7  ;;  %v3030_v19 = vpop.f32.mrf.mxu2  ;;  %3347 = vmatpush.bf16.msra.mxu2 %v5440_v57 }
 0x862   : > { %v3048_v10 = vpop.f32.mrf.mxu3  ;;  %v5407_v19 = vld [vmem:[%s7897_s5 + $0xf0] sm:$0xf] }
 0x863   : > { %v5919_v10 = vld [vmem:[%s7897_s5 + $0xf8] sm:$0xf0] }
 0x865   : > { %3348 = vmatpush.bf16.msra.mxu2 %v5428_v8  ;;  %v6038_v8 = vld [vmem:[%s7896_s4 + $0x1] ss:$0 sm:$0xff] }
 0x8c4   : > { %v3065_v28 = vpop.xlane.xlu0 %3064 }
 0x8c5   : > { %v3070_v61 = vmul.f32 %v3065_v28, %v6667_v60  ;;  %v5918_v28 = vld [vmem:[%s7897_s5 + $0xf4] sm:$0xf] }
 0x8c7   : > { %v7291_v25 = vsub.f32 %v7278_v62, %v3070_v61  ;;  %v5408_v61 = vor.u32 %v5919_v10, %v5407_v19 }
 0x8c9   : > { %v3076_v11 = vmul.f32 %v7291_v25, %v7291_v25  ;;  %3313 = vmatpush.bf16.msrb.mxu0 %v5408_v61 }
 0x8cb   : > { %3079 = vadd.xlane.f32.xlu1 %v3076_v11  ;;  %v5409_v11 = vld [vmem:[%s7897_s5 + $0xfc] sm:$0xf0] }
 0x8cc   : > { %v3067_v34 = vpop.xlane.xlu1 %3066 }
 0x8cd   : > { %v3071_v3 = vmul.f32 %v3067_v34, %v6667_v60  ;;  %v5415_v34 = vld [vmem:[%s7897_s5 + $0xf8] sm:$0xf] }
 0x8cf   : > { %v7297_v32 = vsub.f32 %v7282_v2, %v3071_v3  ;;  %v5920_v3 = vld [vmem:[%s7897_s5 + $0x100] sm:$0xf0] }
 0x8d1   : > { %v3077_v12 = vmul.f32 %v7297_v32, %v7297_v32 }
 0x8d3   : > { %3081 = vadd.xlane.f32.xlu0 %v3077_v12  ;;  %v5412_v12 = vor.u32 %v5918_v28, %v5409_v11 }
 0x8d4   : > { %v3069_v13 = vpop.xlane.xlu0 %3068 }
 0x8d5   : > { %v3072_v9 = vmul.f32 %v3069_v13, %v6667_v60  ;;  %v5416_v13 = vor.u32 %v5920_v3, %v5415_v34  ;;  %3331 = vmatpush.bf16.msra.mxu1 %v5412_v12 }
 0x8d7   : > { %v7303_v14 = vsub.f32 %v7286_v7, %v3072_v9  ;;  %3349 = vmatpush.bf16.msra.mxu2 %v5416_v13  ;;  %v5395_v9 = vld [vmem:[%s7897_s5 + $0xd8] sm:$0xf] }
 0x8d9   : > { %v3078_v17 = vmul.f32 %v7303_v14, %v7303_v14  ;;  %3332 = vmatpush.bf16.msra.mxu1 %v5400_v23 }
 0x8db   : > { %3083 = vadd.xlane.f32.xlu2 %v3078_v17  ;;  %v5916_v17 = vld [vmem:[%s7897_s5 + $0xe0] sm:$0xf0]  ;;  %3350 = vmatpush.bf16.msra.mxu2 %v5404_v22 }
 0x8dc   : > { %v5396_v58 = vor.u32 %v5916_v17, %v5395_v9 }
 0x8dd   : > { %3333 = vmatpush.bf16.msra.mxu1 %v5388_v29 }
 0x8de   : > { %3314 = vmatpush.bf16.msrb.mxu0 %v5396_v58 }
 0x8df   : > { %3351 = vmatpush.bf16.msra.mxu2 %v5392_v39 }
 0x8e2   : > { %3315 = vmatpush.bf16.msrb.mxu0 %v5384_v31 }
 0x93e   : > { %v3080_v20 = vpop.xlane.xlu1 %3079 }
 0x93f   : > { %v3085_v16 = vmul.f32 %v3080_v20, %v6667_v60 }
 0x941   : > { %v3088_v30 = vadd.f32 1e-06, %v3085_v16 }
 0x943   : > { %6119 = vrsqrt.f32 %v3088_v30  ;;  %vm3097_vm7 = vweird.f32 %v3088_v30 }
 0x946   : > { %v3082_v40 = vpop.xlane.xlu0 %3081 }
 0x947   : > { %v3086_v45 = vmul.f32 %v3082_v40, %v6667_v60 }
 0x949   : > { %v6120_v44 = vpop.eup %6119  ;;  %v3089_v46 = vadd.f32 1e-06, %v3086_v45 }
 0x94a   : > { %v3092_v47 = vmul.f32 %v6120_v44, %v3088_v30  ;;  %vm3098_vm6 = vweird.f32 %v6120_v44 }
 0x94b   : > { %6121 = vrsqrt.f32 %v3089_v46  ;;  %vm3099_vm8 = vmor %vm3097_vm7, %vm3098_vm6  ;;  %vm3107_vm13 = vweird.f32 %v3089_v46 }
 0x94c   : > { %v3093_v27 = vmul.f32 %v6120_v44, %v3092_v47 }
 0x94e   : > { %v3094_v37 = vmul.f32 0.5, %v3093_v27  ;;  %v3084_v49 = vpop.xlane.xlu2 %3083 }
 0x94f   : > { %v3087_v51 = vmul.f32 %v3084_v49, %v6667_v60 }
 0x950   : > { %v3095_v53 = vsub.f32 1.5, %v3094_v37 }
 0x951   : > { %v6122_v42 = vpop.eup %6121  ;;  %v3090_v54 = vadd.f32 1e-06, %v3087_v51 }
 0x952   : > { %v3096_v55 = vmul.f32 %v6120_v44, %v3095_v53  ;;  %v3102_v43 = vmul.f32 %v6122_v42, %v3089_v46  ;;  %vm3108_vm9 = vweird.f32 %v6122_v42 }
 0x953   : > { %6123 = vrsqrt.f32 %v3090_v54  ;;  %vm3109_vm14 = vmor %vm3107_vm13, %vm3108_vm9  ;;  %vm3117_vm0 = vweird.f32 %v3090_v54 }
 0x954   : > { %v3103_v56 = vmul.f32 %v6122_v42, %v3102_v43  ;;  %v3100_v63 = vsel %vm3099_vm8, %v6120_v44, %v3096_v55 }
 0x955   : > { %v3121_v52 = vmul.f32 %v3100_v63, %v7291_v25 }
 0x956   : > { %v3104_v57 = vmul.f32 0.5, %v3103_v56 }
 0x957   : > { %v3127_v19 = vmul.f32 %v6037_v0, %v3121_v52 }
 0x958   : > { %v3105_v59 = vsub.f32 1.5, %v3104_v57 }
 0x959   : > { %v6124_v48 = vpop.eup %6123  ;;  %v3133_v34 = vadd.f32 %v6038_v8, %v3127_v19 }
 0x95a   : > { %v3106_v1 = vmul.f32 %v6122_v42, %v3105_v59  ;;  %v3112_v4 = vmul.f32 %v6124_v48, %v3090_v54  ;;  %vm3118_vm15 = vweird.f32 %v6124_v48 }
 0x95b   : > { %vm3119_vm1 = vmor %vm3117_vm0, %vm3118_vm15 }
 0x95c   : > { %v3110_v5 = vsel %vm3109_vm14, %v6122_v42, %v3106_v1  ;;  %v3113_v6 = vmul.f32 %v6124_v48, %v3112_v4 }
 0x95d   : > { %v3122_v10 = vmul.f32 %v3110_v5, %v7297_v32  ;;  %v5380_v32 = vld [vmem:[%s7898_s6 + $0x3] sm:$0x7] }
 0x95e   : > { %v3114_v28 = vmul.f32 0.5, %v3113_v6  ;;  %v3175_v18 = vperm.slane %v5380_v32, 1  ;;  %v3174_v24 = vperm.slane %v5380_v32, 0  ;;  %v3176_v29 = vperm.slane %v5380_v32, 2 }
 0x95f   : > { %v3128_v61 = vmul.f32 %v6037_v0, %v3122_v10 }
 0x960   : > { %v3115_v11 = vsub.f32 1.5, %v3114_v28 }
 0x961   : > { %v3134_v3 = vadd.f32 %v6038_v8, %v3128_v61 }
 0x962   : > { %v3116_v25 = vmul.f32 %v6124_v48, %v3115_v11 }
 0x963   : > { %v3169_v12 = vpack.c.bf16 %v3134_v3, %v3133_v34 }
 0x964   : > { %v3120_v13 = vsel %vm3119_vm1, %v6124_v48, %v3116_v25 }
 0x965   : > { %3316 = vmatmul.bf16.vlgmr.msrb.gmra.mxu0 %v3169_v12  ;;  %3334 = vmatmul.bf16.vlgmr.msra.gmra.mxu1 %v3169_v12  ;;  %v3123_v9 = vmul.f32 %v3120_v13, %v7303_v14 }
 0x966   : > { %3352 = vmatmul.bf16.vlgmr.msra.gmra.mxu2 %v3169_v12 }
 0x967   : > { %v3129_v17 = vmul.f32 %v6037_v0, %v3123_v9 }
 0x969   : > { %v3135_v41 = vadd.f32 %v6038_v8, %v3129_v17 }
 0x96b   : > { %v3170_v58 = vpack.c.bf16 %v3135_v41, %v3135_v41 }
 0x975   : > { %3321 = vmatmul.bf16.gmra.mxu0 %v3170_v58  ;;  %3339 = vmatmul.bf16.gmra.mxu1 %v3170_v58 }
 0x976   : > { %3357 = vmatmul.bf16.gmra.mxu2 %v3170_v58 }
 0x9e2   : > { %v3317_v36 = vpop.f32.mrf.mxu0  ;;  %v3335_v15 = vpop.f32.mrf.mxu1 }
 0x9e3   : > { %v7466_v20 = vadd.f32 %v3335_v15, %v3175_v18  ;;  %v7478_v33 = vadd.f32 %v3317_v36, %v3174_v24 }
 0x9e5   : > { %3549 = vrot.lane.b32.xlu2 %v7466_v20, %s6206_s26 }
 0x9e9   : > { %v3353_v23 = vpop.f32.mrf.mxu2 }
 0x9ea   : > { %v3319_v14 = vpop.f32.mrf.mxu0  ;;  %v3337_v22 = vpop.f32.mrf.mxu1  ;;  %v7498_v27 = vadd.f32 %v3353_v23, %v3176_v29 }
 0x9eb   : > { %v7470_v16 = vadd.f32 %v3337_v22, %v3175_v18  ;;  %v7490_v46 = vadd.f32 %v3319_v14, %v3174_v24 }
 0x9ed   : > { %3551 = vrot.lane.b32.xlu0 %v7470_v16, %s6206_s26 }
 0x9f1   : > { %v3355_v26 = vpop.f32.mrf.mxu2 }
 0x9f2   : > { %v3322_v21 = vpop.f32.mrf.mxu0  ;;  %v3340_v30 = vpop.f32.mrf.mxu1  ;;  %v3356_v39 = vadd.f32 %v3355_v26, %v3176_v29 }
 0x9f3   : > { %v7474_v31 = vadd.f32 %v3322_v21, %v3174_v24  ;;  %v7476_v50 = vadd.f32 %v3340_v30, %v3175_v18 }
 0x9f5   : > { %3553 = vrot.lane.b32.xlu1 %v7476_v50, %s6206_s26  ;;  %5494 = vmatpush.xpose.msk.msrb.mxu3 %vm1922_vm10, %v7476_v50 }
 0x9f6   : > { %3547 = vrot.lane.b32.xlu2 %v7474_v31, %s6206_s26  ;;  %3543 = vrot.lane.b32.xlu0 %v7478_v33, %s6206_s26 }
 0x9f9   : > { %v3358_v35 = vpop.f32.mrf.mxu2  ;;  %5495 = vmatpush.xpose.msk.msrb.mxu3 %vm1922_vm10, %v7470_v16 }
 0x9fa   : > { %v3359_v40 = vadd.f32 %v3358_v35, %v3176_v29  ;;  %v3324_v45 = vpop.f32.mrf.mxu0  ;;  %v3342_v44 = vpop.f32.mrf.mxu1 }
 0x9fc   : > { %3486 = vmatpush.msra.mxu0 %v3359_v40  ;;  %v7492_v47 = vpack.i.bf16 %v3356_v39, %v3359_v40 }
 0x9fd   : > { %5496 = vmatpush.xpose.msk.msrb.mxu3 %vm1922_vm10, %v7466_v20  ;;  %3545 = vrot.lane.b32.xlu1 %v7490_v46, %s6206_s26 }
 0x9fe   : > { %3487 = vmatpush.msra.mxu0 %v3356_v39 }
 0xa00   : > { %3488 = vmatpush.msra.mxu0 %v7498_v27  ;;  %5497 = vmatmul.msk.f32.vlgmr.msrb.gmra.mxu3 %vm1922_vm10, %v7478_v33 }
 0xa01   : > { %v3360_v37 = vpop.f32.mrf.mxu2 }
 0xa08   : > { %5498 = vmatmul.msk.f32.gmra.mxu3 %vm1922_vm10, %v7490_v46 }
 0xa10   : > { %5499 = vmatmul.msk.f32.gmra.mxu3 %vm1922_vm10, %v7474_v31 }
 0xa3f   : > { %v3550_v53 = vpop.permute.xlu2 %3549 }
 0xa50   : > { %v3548_v55 = vpop.permute.xlu2 %3547 }
 0xa5f   : > { %v3552_v51 = vpop.permute.xlu0 %3551 }
 0xa67   : > { %v3554_v49 = vpop.permute.xlu1 %3553 }
 0xa68   : > { %5513 = vmatpush.xpose.msk.msrb.mxu1 %vm1922_vm10, %v3554_v49  ;;  %v3544_v42 = vpop.permute.xlu0 %3543 }
 0xa6c   : > { %5514 = vmatpush.xpose.msk.msrb.mxu1 %vm1922_vm10, %v3552_v51 }
 0xa6f   : > { %v3546_v54 = vpop.permute.xlu1 %3545 }
 0xa70   : > { %5515 = vmatpush.xpose.msk.msrb.mxu1 %vm1922_vm10, %v3550_v53 }
 0xa73   : > { %5516 = vmatmul.msk.f32.vlgmr.msrb.gmra.mxu1 %vm1922_vm10, %v3544_v42 }
 0xa7b   : > { %5517 = vmatmul.msk.f32.gmra.mxu1 %vm1922_vm10, %v3546_v54 }
 0xa83   : > { %5518 = vmatmul.msk.f32.gmra.mxu1 %vm1922_vm10, %v3548_v55  ;;  %v3416_v8 = vpop.f32.mrf.mxu3 }
 0xa84   : > { %v3425_v14 = vmul.f32 0.17677669, %v3416_v8 }
 0xa86   : > { %v3428_v26 = vsel %vm1599_vm11, %v3425_v14, -1e+30 }
 0xa87   : > { %v3431_v29 = vsel %vm1973_vm12, %v3428_v26, -inf }
 0xa8b   : > { %v3419_v19 = vpop.f32.mrf.mxu3 }
 0xa8c   : > { %v3426_v10 = vmul.f32 0.17677669, %v3419_v19 }
 0xa8e   : > { %v3429_v28 = vsel %vm1599_vm11, %v3426_v10, -1e+30 }
 0xa8f   : > { %v3434_v61 = vsel %vm1973_vm12, %v3429_v28, -inf }
 0xa93   : > { %v3422_v21 = vpop.f32.mrf.mxu3 }
 0xa94   : > { %v3427_v35 = vmul.f32 0.17677669, %v3422_v21 }
 0xa96   : > { %v3430_v39 = vsel %vm1599_vm11, %v3427_v35, -1e+30  ;;  %v5936_v35 = vld [vmem:[%s7899_s7 + $0x40] sm:$0xff] }
 0xa97   : > { %v3437_v40 = vsel %vm1973_vm12, %v3430_v39, -inf }
 0xaf0   : > { %v3584_v43 = vpop.f32.mrf.mxu1 }
 0xaf1   : > { %v3593_v56 = vmul.f32 0.17677669, %v3584_v43 }
 0xaf3   : > { %v3596_v63 = vsel %vm1599_vm11, %v3593_v56, -1e+30 }
 0xaf4   : > { %v3599_v57 = vsel %vm1973_vm12, %v3596_v63, -inf }
 0xaf5   : > { %3600 = vmax.xlane.f32.xlu0 %v3599_v57 }
 0xaf8   : > { %v3587_v59 = vpop.f32.mrf.mxu1 }
 0xaf9   : > { %v3594_v48 = vmul.f32 0.17677669, %v3587_v59 }
 0xafb   : > { %v3597_v0 = vsel %vm1599_vm11, %v3594_v48, -1e+30 }
 0xafc   : > { %v3602_v52 = vsel %vm1973_vm12, %v3597_v0, -inf }
 0xafd   : > { %3603 = vmax.xlane.f32.xlu1 %v3602_v52 }
 0xb00   : > { %v3590_v1 = vpop.f32.mrf.mxu1 }
 0xb01   : > { %v3595_v4 = vmul.f32 0.17677669, %v3590_v1 }
 0xb03   : > { %v3598_v5 = vsel %vm1599_vm11, %v3595_v4, -1e+30 }
 0xb04   : > { %v3605_v6 = vsel %vm1973_vm12, %v3598_v5, -inf }
 0xb05   : > { %3606 = vmax.xlane.f32.xlu2 %v3605_v6 }
 0xb16   : > { %6017 = vrot.lane.b32.xlu1 %v7492_v47, %s6206_s26 }
 0xb40   : > { %3435 = vmax.xlane.f32.xlu1 %v3434_v61 }
 0xb59   : > { %3728 = vrot.lane.b32.xlu1 %v7470_v16, %s7919_s22 }
 0xb61   : > { %3722 = vrot.lane.b32.xlu1 %v7490_v46, %s7919_s22 }
 0xb68   : > { %v3601_v11 = vpop.xlane.xlu0 %3600 }
 0xb69   : > { %v3608_v34 = vsub.f32 %v3596_v63, %v3601_v11  ;;  %3724 = vrot.lane.b32.xlu1 %v7474_v31, %s7919_s22 }
 0xb6b   : > { %v3611_v3 = vmul.f32 1.442695, %v3608_v34 }
 0xb6d   : > { %6125 = vpow2.f32 %v3611_v3 }
 0xb70   : > { %v3604_v25 = vpop.xlane.xlu1 %3603 }
 0xb71   : > { %v3609_v12 = vsub.f32 %v3597_v0, %v3604_v25 }
 0xb73   : > { %v6126_v13 = vpop.eup %6125  ;;  %v3613_v9 = vmul.f32 1.442695, %v3609_v12 }
 0xb74   : > { %v3617_v17 = vsel %vm1973_vm12, %v6126_v13, 0.0 }
 0xb75   : > { %6127 = vpow2.f32 %v3613_v9  ;;  %3618 = vadd.xlane.f32.xlu0 %v3617_v17 }
 0xb78   : > { %v3607_v41 = vpop.xlane.xlu2 %3606 }
 0xb79   : > { %v3610_v58 = vsub.f32 %v3598_v5, %v3607_v41 }
 0xb7b   : > { %v6128_v32 = vpop.eup %6127  ;;  %v3615_v18 = vmul.f32 1.442695, %v3610_v58 }
 0xb7c   : > { %v3620_v36 = vsel %vm1973_vm12, %v6128_v32, 0.0 }
 0xb7d   : > { %6129 = vpow2.f32 %v3615_v18  ;;  %3621 = vadd.xlane.f32.xlu2 %v3620_v36 }
 0xb83   : > { %v6130_v15 = vpop.eup %6129 }
 0xb84   : > { %v3623_v23 = vsel %vm1973_vm12, %v6130_v15, 0.0 }
 0xb85   : > { %3624 = vadd.xlane.f32.xlu2 %v3623_v23 }
 0xb88   : > { %v6018_v22 = vpop.permute.xlu1 %6017 }
 0xb89   : > { %v6019_v24 = vunpack.i.l.bf16 %v6018_v22  ;;  %3635 = vrot.lane.b32.xlu0 %v7498_v27, %s6206_s26  ;;  %v6020_v30 = vunpack.i.h.bf16 %v6018_v22  ;;  %s7920_s26 = smov 32  }
 0xb8b   : > { %3666 = vmatpush.msrb.mxu2 %v6019_v24 }
 0xb8d   : > { %3667 = vmatpush.msrb.mxu2 %v6020_v30  ;;  %3432 = vmax.xlane.f32.xlu2 %v3431_v29  ;;  %v5937_v29 = vld [vmem:[%s7899_s7 + $0x48] sm:$0xff] }
 0xb8e   : > { %3525 = vmatpush.bf16.msra.mxu3 %v5937_v29 }
 0xb92   : > { %3526 = vmatpush.bf16.msra.mxu3 %v5936_v35 }
 0xb95   : > { %3438 = vmax.xlane.f32.xlu2 %v3437_v40 }
 0xbb3   : > { %v3436_v45 = vpop.xlane.xlu1 %3435 }
 0xbb4   : > { %v3441_v44 = vsub.f32 %v3429_v28, %v3436_v45 }
 0xbb6   : > { %v3445_v37 = vmul.f32 1.442695, %v3441_v44 }
 0xbb8   : > { %6131 = vpow2.f32 %v3445_v37 }
 0xbbe   : > { %v6132_v49 = vpop.eup %6131 }
 0xbbf   : > { %v3452_v51 = vsel %vm1973_vm12, %v6132_v49, 0.0 }
 0xbc0   : > { %3453 = vadd.xlane.f32.xlu2 %v3452_v51 }
 0xbe8   : > { %v3619_v53 = vpop.xlane.xlu0 %3618 }
 0xbe9   : > { %6133 = vrcp.f32 %v3619_v53 }
 0xbef   : > { %v6134_v54 = vpop.eup %6133 }
 0xbf0   : > { %v3622_v42 = vpop.xlane.xlu2 %3621  ;;  %v3629_v43 = vmul.f32 %v6134_v54, %v6126_v13  ;;  %v3729_v13 = vpop.permute.xlu1 %3728 }
 0xbf1   : > { %6135 = vrcp.f32 %v3622_v42 }
 0xbf7   : > { %v6136_v63 = vpop.eup %6135 }
 0xbf8   : > { %v3625_v55 = vpop.xlane.xlu2 %3624  ;;  %v3630_v0 = vmul.f32 %v6136_v63, %v6128_v32 }
 0xbf9   : > { %6137 = vrcp.f32 %v3625_v55 }
 0xbfb   : > { %v3636_v56 = vpop.permute.xlu0 %3635 }
 0xbfc   : > { %3668 = vmatpush.msrb.mxu2 %v3636_v56 }
 0xbfd   : > { %5519 = vmatmul.msk.f32.vlgmr.msrb.gmra.mxu2 %vm1973_vm12, %v3629_v43 }
 0xbff   : > { %v6138_v52 = vpop.eup %6137 }
 0xc00   : > { %v3433_v57 = vpop.xlane.xlu2 %3432  ;;  %v3631_v8 = vmul.f32 %v6138_v52, %v6130_v15  ;;  %v3723_v15 = vpop.permute.xlu1 %3722 }
 0xc01   : > { %v3440_v59 = vsub.f32 %v3428_v26, %v3433_v57 }
 0xc03   : > { %v3443_v48 = vmul.f32 1.442695, %v3440_v59 }
 0xc05   : > { %6139 = vpow2.f32 %v3443_v48  ;;  %5520 = vmatmul.msk.f32.gmra.mxu2 %vm1973_vm12, %v3630_v0 }
 0xc08   : > { %v3439_v1 = vpop.xlane.xlu2 %3438  ;;  %v3725_v22 = vpop.permute.xlu1 %3724 }
 0xc09   : > { %v3442_v4 = vsub.f32 %v3430_v39, %v3439_v1 }
 0xc0b   : > { %v6140_v5 = vpop.eup %6139  ;;  %v3447_v6 = vmul.f32 1.442695, %v3442_v4 }
 0xc0c   : > { %v3449_v19 = vsel %vm1973_vm12, %v6140_v5, 0.0 }
 0xc0d   : > { %6141 = vpow2.f32 %v3447_v6  ;;  %5521 = vmatmul.msk.f32.gmra.mxu2 %vm1973_vm12, %v3631_v8  ;;  %3450 = vadd.xlane.f32.xlu0 %v3449_v19 }
 0xc13   : > { %v6142_v10 = vpop.eup %6141 }
 0xc14   : > { %v3455_v28 = vsel %vm1973_vm12, %v6142_v10, 0.0 }
 0xc15   : > { %3456 = vadd.xlane.f32.xlu2 %v3455_v28 }
 0xc21   : > { %3726 = vrot.lane.b32.xlu0 %v7466_v20, %s7919_s22 }
 0xc29   : > { %3902 = vrot.lane.b32.xlu0 %v7470_v16, %s7920_s26  ;;  %v5939_v16 = vld [vmem:[%s7899_s7 + $0x58] sm:$0xff] }
 0xc2a   : > { %3705 = vmatpush.bf16.msrb.mxu0 %v5939_v16 }
 0xc2d   : > { %3730 = vrot.lane.b32.xlu2 %v7476_v50, %s7919_s22 }
 0xc31   : > { %3894 = vrot.lane.b32.xlu0 %v7478_v33, %s7920_s26 }
 0xc35   : > { %3904 = vrot.lane.b32.xlu2 %v7476_v50, %s7920_s26  ;;  %v5938_v50 = vld [vmem:[%s7899_s7 + $0x50] sm:$0xff] }
 0xc36   : > { %3706 = vmatpush.bf16.msrb.mxu0 %v5938_v50 }
 0xc39   : > { %3898 = vrot.lane.b32.xlu0 %v7474_v31, %s7920_s26  ;;  %v3454_v31 = vpop.xlane.xlu2 %3453 }
 0xc3d   : > { %3720 = vrot.lane.b32.xlu2 %v7478_v33, %s7919_s22 }
 0xc45   : > { %3900 = vrot.lane.b32.xlu2 %v7466_v20, %s7920_s26 }
 0xc4d   : > { %3896 = vrot.lane.b32.xlu2 %v7490_v46, %s7920_s26 }
 0xc80   : > { %v3451_v61 = vpop.xlane.xlu0 %3450  ;;  %v3670_v25 = vpop.f32.mrf.mxu2 }
 0xc81   : > { %6143 = vrcp.f32 %v3451_v61 }
 0xc82   : > { %6145 = vrcp.f32 %v3454_v31 }
 0xc87   : > { %v6144_v33 = vpop.eup %6143 }
 0xc88   : > { %v3461_v11 = vmul.f32 %v6144_v33, %v6140_v5  ;;  %v3457_v20 = vpop.xlane.xlu2 %3456  ;;  %v6146_v46 = vpop.eup %6145 }
 0xc89   : > { %6147 = vrcp.f32 %v3457_v20  ;;  %v3462_v3 = vmul.f32 %v6146_v46, %v6132_v49  ;;  %v3673_v32 = vpop.f32.mrf.mxu2 }
 0xc8a   : > { %5500 = vmatmul.msk.f32.vlgmr.msra.gmra.mxu0 %vm1973_vm12, %v3461_v11  ;;  %v3679_v18 = vpack.c.bf16 %v3673_v32, %v3670_v25 }
 0xc8f   : > { %v6148_v9 = vpop.eup %6147 }
 0xc90   : > { %v3731_v34 = vpop.permute.xlu2 %3730  ;;  %v3463_v41 = vmul.f32 %v6148_v9, %v6142_v10 }
 0xc91   : > { %5532 = vmatpush.xpose.msk.msra.mxu1 %vm1922_vm10, %v3731_v34  ;;  %v3676_v14 = vpop.f32.mrf.mxu2 }
 0xc92   : > { %5501 = vmatmul.msk.f32.gmra.mxu0 %vm1973_vm12, %v3462_v3  ;;  %v3680_v24 = vpack.c.bf16 %v3676_v14, %v3676_v14 }
 0xc93   : > { %v3727_v12 = vpop.permute.xlu0 %3726 }
 0xc95   : > { %5533 = vmatpush.xpose.msk.msra.mxu1 %vm1922_vm10, %v3729_v13 }
 0xc98   : > { %v3905_v17 = vpop.permute.xlu2 %3904 }
 0xc99   : > { %5534 = vmatpush.xpose.msk.msra.mxu1 %vm1922_vm10, %v3727_v12  ;;  %5551 = vmatpush.xpose.msk.msra.mxu0 %vm1922_vm10, %v3905_v17 }
 0xc9a   : > { %5502 = vmatmul.msk.f32.gmra.mxu0 %vm1973_vm12, %v3463_v41 }
 0xc9b   : > { %v3903_v58 = vpop.permute.xlu0 %3902 }
 0xc9d   : > { %5552 = vmatpush.xpose.msk.msra.mxu0 %vm1922_vm10, %v3903_v58 }
 0xca0   : > { %v3721_v36 = vpop.permute.xlu2 %3720 }
 0xca1   : > { %5535 = vmatmul.msk.f32.vlgmr.msra.gmra.mxu1 %vm1922_vm10, %v3721_v36 }
 0xca2   : > { %5530 = vmatmul.msk.bf16.vlgmr.msrb.gmra.mxu0 %vm1922_vm10, %v3679_v18 }
 0xca3   : > { %v3895_v26 = vpop.permute.xlu0 %3894 }
 0xca8   : > { %v3901_v23 = vpop.permute.xlu2 %3900 }
 0xca9   : > { %5536 = vmatmul.msk.f32.gmra.mxu1 %vm1922_vm10, %v3723_v15  ;;  %5553 = vmatpush.xpose.msk.msra.mxu0 %vm1922_vm10, %v3901_v23 }
 0xcab   : > { %v3899_v30 = vpop.permute.xlu0 %3898 }
 0xcb0   : > { %v3897_v21 = vpop.permute.xlu2 %3896 }
 0xcb1   : > { %5537 = vmatmul.msk.f32.gmra.mxu1 %vm1922_vm10, %v3725_v22 }
 0xcb2   : > { %5531 = vmatmul.msk.bf16.gmra.mxu0 %vm1922_vm10, %v3680_v24 }
 0xcc2   : > { %5554 = vmatmul.msk.f32.vlgmr.msra.gmra.mxu0 %vm1922_vm10, %v3895_v26 }
 0xcca   : > { %5555 = vmatmul.msk.f32.gmra.mxu0 %vm1922_vm10, %v3897_v21 }
 0xcd2   : > { %5556 = vmatmul.msk.f32.gmra.mxu0 %vm1922_vm10, %v3899_v30 }
 0xd07   : > { %v3490_v39 = vpop.f32.mrf.mxu0 }
 0xd0f   : > { %v3493_v40 = vpop.f32.mrf.mxu0 }
 0xd10   : > { %v3499_v45 = vpack.c.bf16 %v3493_v40, %v3490_v39 }
 0xd12   : > { %5511 = vmatmul.msk.bf16.vlgmr.msra.gmra.mxu3 %vm1922_vm10, %v3499_v45 }
 0xd17   : > { %v3496_v44 = vpop.f32.mrf.mxu0 }
 0xd18   : > { %v3500_v53 = vpack.c.bf16 %v3496_v44, %v3496_v44 }
 0xd1e   : > { %v3761_v37 = vpop.f32.mrf.mxu1 }
 0xd1f   : > { %v3770_v49 = vmul.f32 0.17677669, %v3761_v37  ;;  %v7598_v51 = vpop.f32.mrf.mxu0 }
 0xd21   : > { %v3773_v42 = vsel %vm1599_vm11, %v3770_v49, -1e+30 }
 0xd22   : > { %5512 = vmatmul.msk.bf16.gmra.mxu3 %vm1922_vm10, %v3500_v53  ;;  %v3776_v54 = vsel %vm1973_vm12, %v3773_v42, -inf }
 0xd23   : > { %3777 = vmax.xlane.f32.xlu2 %v3776_v54 }
 0xd26   : > { %v3764_v55 = vpop.f32.mrf.mxu1 }
 0xd27   : > { %v3771_v43 = vmul.f32 0.17677669, %v3764_v55  ;;  %v7604_v56 = vpop.f32.mrf.mxu0 }
 0xd29   : > { %v3774_v63 = vsel %vm1599_vm11, %v3771_v43, -1e+30 }
 0xd2a   : > { %v3779_v57 = vsel %vm1973_vm12, %v3774_v63, -inf }
 0xd2b   : > { %3780 = vmax.xlane.f32.xlu1 %v3779_v57 }
 0xd2e   : > { %v3767_v59 = vpop.f32.mrf.mxu1 }
 0xd2f   : > { %v3772_v48 = vmul.f32 0.17677669, %v3767_v59  ;;  %v7609_v0 = vpop.f32.mrf.mxu0 }
 0xd31   : > { %v7613_v52 = vsel %vm1599_vm11, %v3772_v48, -1e+30 }
 0xd32   : > { %v3782_v1 = vsel %vm1973_vm12, %v7613_v52, -inf }
 0xd33   : > { %3783 = vmax.xlane.f32.xlu1 %v3782_v1 }
 0xd37   : > { %v3715_v4 = vpop.f32.mrf.mxu0 }
 0xd3f   : > { %v3935_v6 = vpop.f32.mrf.mxu0 }
 0xd40   : > { %v3944_v13 = vmul.f32 0.17677669, %v3935_v6 }
 0xd42   : > { %v3947_v17 = vsel %vm1599_vm11, %v3944_v13, -1e+30 }
 0xd43   : > { %v3950_v41 = vsel %vm1973_vm12, %v3947_v17, -inf }
 0xd47   : > { %v3938_v31 = vpop.f32.mrf.mxu0 }
 0xd48   : > { %v3945_v20 = vmul.f32 0.17677669, %v3938_v31 }
 0xd4a   : > { %v3948_v34 = vsel %vm1599_vm11, %v3945_v20, -1e+30 }
 0xd4b   : > { %v3953_v12 = vsel %vm1973_vm12, %v3948_v34, -inf }
 0xd4c   : > { %6022 = vrot.lane.b32.xlu1 %v7492_v47, %s7919_s22 }
 0xd4f   : > { %v3941_v15 = vpop.f32.mrf.mxu0 }
 0xd50   : > { %v3946_v23 = vmul.f32 0.17677669, %v3941_v15 }
 0xd52   : > { %v3949_v14 = vsel %vm1599_vm11, %v3946_v23, -1e+30 }
 0xd53   : > { %v3956_v22 = vsel %vm1973_vm12, %v3949_v14, -inf }
 0xd95   : > { %v7619_v5 = vpop.f32.mrf.mxu3 }
 0xd96   : > { %v3778_v8 = vpop.xlane.xlu2 %3777 }
 0xd97   : > { %v3785_v19 = vsub.f32 %v3773_v42, %v3778_v8 }
 0xd99   : > { %v3788_v10 = vmul.f32 1.442695, %v3785_v19 }
 0xd9b   : > { %6149 = vpow2.f32 %v3788_v10 }
 0xd9d   : > { %v7621_v28 = vpop.f32.mrf.mxu3 }
 0xd9e   : > { %v3781_v16 = vpop.xlane.xlu1 %3780 }
 0xd9f   : > { %v3786_v50 = vsub.f32 %v3774_v63, %v3781_v16 }
 0xda1   : > { %v6150_v61 = vpop.eup %6149  ;;  %v3790_v33 = vmul.f32 1.442695, %v3786_v50 }
 0xda2   : > { %v3794_v11 = vsel %vm1973_vm12, %v6150_v61, 0.0 }
 0xda3   : > { %6151 = vpow2.f32 %v3790_v33  ;;  %3795 = vadd.xlane.f32.xlu2 %v3794_v11 }
 0xda5   : > { %v7624_v46 = vpop.f32.mrf.mxu3 }
 0xda6   : > { %v3784_v58 = vpop.xlane.xlu1 %3783 }
 0xda7   : > { %v3787_v55 = vsub.f32 %v7613_v52, %v3784_v58  ;;  %v5940_v52 = vld [vmem:[%s7899_s7 + $0x60] sm:$0xff] }
 0xda9   : > { %v6152_v3 = vpop.eup %6151  ;;  %v3792_v57 = vmul.f32 1.442695, %v3787_v55 }
 0xdaa   : > { %v3797_v25 = vsel %vm1973_vm12, %v6152_v3, 0.0 }
 0xdab   : > { %3798 = vadd.xlane.f32.xlu0 %v3797_v25  ;;  %3954 = vmax.xlane.f32.xlu2 %v3953_v12 }
 0xdad   : > { %v3535_v9 = vpop.f32.mrf.mxu3 }
 0xdb3   : > { %3951 = vmax.xlane.f32.xlu0 %v3950_v41 }
 0xdbe   : > { %v6023_v32 = vpop.permute.xlu1 %6022 }
 0xdbf   : > { %v6024_v18 = vunpack.i.l.bf16 %v6023_v32  ;;  %v6025_v36 = vunpack.i.h.bf16 %v6023_v32  ;;  %v5943_v32 = vld [vmem:[%s7899_s7 + $0x78] sm:$0xff] }
 0xdc1   : > { %3840 = vmatpush.msrb.mxu1 %v6024_v18  ;;  %5984 = vmatpush.msra.mxu2 %v6024_v18  ;;  %v5942_v18 = vld [vmem:[%s7899_s7 + $0x70] sm:$0xff] }
 0xdc3   : > { %3841 = vmatpush.msrb.mxu1 %v6025_v36  ;;  %5985 = vmatpush.msra.mxu2 %v6025_v36 }
 0xdc7   : > { %3809 = vrot.lane.b32.xlu0 %v7498_v27, %s7919_s22 }
 0xdf1   : > { %3957 = vmax.xlane.f32.xlu0 %v3956_v22 }
 0xe05   : > { %3983 = vrot.lane.b32.xlu0 %v7498_v27, %s7920_s26 }
 0xe16   : > { %v3796_v24 = vpop.xlane.xlu2 %3795 }
 0xe1e   : > { %v3799_v26 = vpop.xlane.xlu0 %3798  ;;  %v3955_v21 = vpop.xlane.xlu2 %3954 }
 0xe1f   : > { %v3960_v30 = vsub.f32 %v3948_v34, %v3955_v21  ;;  %v6039_v21 = vld [vmem:[%s7900_s8 + $0x1] ss:$0 sm:$0xff] }
 0xe21   : > { %v3964_v29 = vmul.f32 1.442695, %v3960_v30  ;;  %v3540_v30 = vadd.f32 %v6039_v21, %v7619_v5 }
 0xe23   : > { %6153 = vpow2.f32 %v3964_v29 }
 0xe26   : > { %v3952_v35 = vpop.xlane.xlu0 %3951 }
 0xe27   : > { %v3959_v39 = vsub.f32 %v3947_v17, %v3952_v35  ;;  %v3717_v35 = vadd.f32 %v7598_v51, %v3540_v30  ;;  %v5617_v30 = vld [vmem:[%s7903_s11 + $0xb8] sm:$0xf0] }
 0xe29   : > { %v6154_v40 = vpop.eup %6153  ;;  %v3962_v45 = vmul.f32 1.442695, %v3959_v39 }
 0xe2a   : > { %v3971_v44 = vsel %vm1973_vm12, %v6154_v40, 0.0 }
 0xe2b   : > { %6155 = vpow2.f32 %v3962_v45  ;;  %3972 = vadd.xlane.f32.xlu1 %v3971_v44  ;;  %v3541_v45 = vadd.f32 %v6039_v21, %v7621_v28  ;;  %v3542_v28 = vadd.f32 %v6039_v21, %v7624_v46 }
 0xe2c   : > { %6157 = vrcp.f32 %v3796_v24 }
 0xe2d   : > { %6159 = vrcp.f32 %v3799_v26 }
 0xe31   : > { %v6156_v38 = vpop.eup %6155 }
 0xe32   : > { %v3968_v37 = vsel %vm1973_vm12, %v6156_v38, 0.0  ;;  %v6158_v27 = vpop.eup %6157 }
 0xe33   : > { %3969 = vadd.xlane.f32.xlu2 %v3968_v37  ;;  %v6160_v49 = vpop.eup %6159  ;;  %v3806_v53 = vmul.f32 %v6158_v27, %v6150_v61  ;;  %v3718_v27 = vadd.f32 %v7604_v56, %v3541_v45 }
 0xe34   : > { %v3807_v42 = vmul.f32 %v6160_v49, %v6152_v3 }
 0xe39   : > { %v3810_v54 = vpop.permute.xlu0 %3809 }
 0xe3a   : > { %3842 = vmatpush.msrb.mxu1 %v3810_v54  ;;  %5986 = vmatpush.msra.mxu2 %v3810_v54 }
 0xe3b   : > { %5538 = vmatmul.msk.f32.vlgmr.msrb.gmra.mxu1 %vm1973_vm12, %v3806_v53  ;;  %5539 = vmatmul.msk.f32.vlgmr.msra.gmra.mxu2 %vm1973_vm12, %v3807_v42 }
 0xe3c   : > { %4053 = vmatpush.bf16.msrb.mxu2 %v5943_v32  ;;  %v5623_v32 = vld [vmem:[%s7903_s11 + $0xc0] sm:$0xf] }
 0xe40   : > { %4054 = vmatpush.bf16.msrb.mxu2 %v5942_v18  ;;  %v5953_v18 = vld [vmem:[%s7903_s11 + $0xc4] sm:$0xf0] }
 0xe4b   : > { %6027 = vrot.lane.b32.xlu2 %v7492_v47, %s7920_s26  ;;  %v5941_v47 = vld [vmem:[%s7899_s7 + $0x68] sm:$0xff] }
 0xe4c   : > { %3879 = vmatpush.bf16.msrb.mxu3 %v5941_v47 }
 0xe50   : > { %3880 = vmatpush.bf16.msrb.mxu3 %v5940_v52 }
 0xe64   : > { %v3958_v43 = vpop.xlane.xlu0 %3957 }
 0xe65   : > { %v3961_v63 = vsub.f32 %v3949_v14, %v3958_v43 }
 0xe67   : > { %v3966_v59 = vmul.f32 1.442695, %v3961_v63 }
 0xe69   : > { %6161 = vpow2.f32 %v3966_v59 }
 0xe6a   : > { %6163 = vpow2.f32 %v3792_v57 }
 0xe6f   : > { %v6162_v48 = vpop.eup %6161 }
 0xe70   : > { %v6164_v1 = vpop.eup %6163  ;;  %v3974_v4 = vsel %vm1973_vm12, %v6162_v48, 0.0 }
 0xe71   : > { %3975 = vadd.xlane.f32.xlu0 %v3974_v4  ;;  %v3800_v6 = vsel %vm1973_vm12, %v6164_v1, 0.0 }
 0xe74   : > { %3801 = vadd.xlane.f32.xlu2 %v3800_v6 }
 0xe77   : > { %v3984_v61 = vpop.permute.xlu0 %3983 }
 0xe9e   : > { %v3973_v16 = vpop.xlane.xlu1 %3972 }
 0xea6   : > { %v3970_v8 = vpop.xlane.xlu2 %3969 }
 0xea7   : > { %6165 = vrcp.f32 %v3970_v8 }
 0xea8   : > { %6167 = vrcp.f32 %v3973_v16  ;;  %v5958_v16 = vld [vmem:[%s7903_s11 + $0xf4] sm:$0xf] }
 0xead   : > { %v6166_v50 = vpop.eup %6165 }
 0xeae   : > { %v6028_v19 = vpop.permute.xlu2 %6027  ;;  %v3980_v33 = vmul.f32 %v6166_v50, %v6156_v38  ;;  %v6168_v11 = vpop.eup %6167 }
 0xeaf   : > { %v6029_v10 = vunpack.i.l.bf16 %v6028_v19  ;;  %v6030_v31 = vunpack.i.h.bf16 %v6028_v19  ;;  %v3981_v20 = vmul.f32 %v6168_v11, %v6154_v40  ;;  %v5647_v19 = vld [vmem:[%s7903_s11 + $0xf0] sm:$0xf]  ;;  %v5957_v11 = vld [vmem:[%s7903_s11 + $0xe4] sm:$0xf0] }
 0xeb1   : > { %4014 = vmatpush.msra.mxu1 %v6029_v10  ;;  %v5959_v10 = vld [vmem:[%s7903_s11 + $0xf4] sm:$0xf0] }
 0xeb2   : > { %v5648_v50 = vor.u32 %v5959_v10, %v5647_v19 }
 0xeb3   : > { %4015 = vmatpush.msra.mxu1 %v6030_v31  ;;  %v5649_v31 = vld [vmem:[%s7903_s11 + $0xf8] sm:$0xf0] }
 0xeb4   : > { %4253 = vmatpush.bf16.msra.mxu3 %v5648_v50 }
 0xeb5   : > { %4016 = vmatpush.msra.mxu1 %v3984_v61  ;;  %v5652_v61 = vor.u32 %v5958_v16, %v5649_v31 }
 0xeb6   : > { %5557 = vmatmul.msk.f32.vlgmr.msra.gmra.mxu1 %vm1973_vm12, %v3980_v33  ;;  %v5639_v33 = vld [vmem:[%s7903_s11 + $0xe0] sm:$0xf] }
 0xeb7   : > { %4271 = vmatpush.bf16.msrb.mxu0 %v5652_v61 }
 0xeb8   : > { %v3844_v34 = vpop.f32.mrf.mxu1 }
 0xebe   : > { %v3847_v3 = vpop.f32.mrf.mxu2  ;;  %5558 = vmatmul.msk.f32.gmra.mxu1 %vm1973_vm12, %v3981_v20  ;;  %v5956_v20 = vld [vmem:[%s7903_s11 + $0xe4] sm:$0xf] }
 0xebf   : > { %v3853_v25 = vpack.c.bf16 %v3847_v3, %v3844_v34  ;;  %v5640_v34 = vor.u32 %v5957_v11, %v5639_v33  ;;  %v5641_v3 = vld [vmem:[%s7903_s11 + $0xe8] sm:$0xf0] }
 0xec1   : > { %5549 = vmatmul.msk.bf16.vlgmr.msrb.gmra.mxu3 %vm1922_vm10, %v3853_v25  ;;  %v5644_v25 = vor.u32 %v5956_v20, %v5641_v3 }
 0xec2   : > { %4254 = vmatpush.bf16.msra.mxu3 %v5640_v34  ;;  %v6040_v34 = vld [vmem:[%s7901_s9 + $0x1] ss:$0 sm:$0xff] }
 0xec3   : > { %4272 = vmatpush.bf16.msrb.mxu0 %v5644_v25 }
 0xee4   : > { %v3976_v12 = vpop.xlane.xlu0 %3975 }
 0xee5   : > { %6169 = vrcp.f32 %v3976_v12  ;;  %v5631_v12 = vld [vmem:[%s7903_s11 + $0xd0] sm:$0xf] }
 0xee7   : > { %v3802_v13 = vpop.xlane.xlu2 %3801 }
 0xee8   : > { %6171 = vrcp.f32 %v3802_v13  ;;  %v5955_v13 = vld [vmem:[%s7903_s11 + $0xd4] sm:$0xf0] }
 0xeeb   : > { %v6170_v9 = vpop.eup %6169 }
 0xeec   : > { %v3982_v17 = vmul.f32 %v6170_v9, %v6162_v48  ;;  %v5954_v9 = vld [vmem:[%s7903_s11 + $0xd4] sm:$0xf] }
 0xeee   : > { %v6172_v41 = vpop.eup %6171  ;;  %5559 = vmatmul.msk.f32.gmra.mxu1 %vm1973_vm12, %v3982_v17  ;;  %v5632_v17 = vor.u32 %v5955_v13, %v5631_v12  ;;  %v6041_v13 = vld [vmem:[%s7902_s10 + $0x1] ss:$0 sm:$0xff] }
 0xeef   : > { %v3808_v58 = vmul.f32 %v6172_v41, %v6164_v1  ;;  %v5633_v41 = vld [vmem:[%s7903_s11 + $0xd8] sm:$0xf0] }
 0xef0   : > { %4255 = vmatpush.bf16.msra.mxu3 %v5632_v17 }
 0xef1   : > { %5540 = vmatmul.msk.f32.gmra.mxu2 %vm1973_vm12, %v3808_v58  ;;  %v5636_v58 = vor.u32 %v5954_v9, %v5633_v41 }
 0xef3   : > { %4273 = vmatpush.bf16.msrb.mxu0 %v5636_v58 }
 0xf33   : > { %v4018_v36 = vpop.f32.mrf.mxu1 }
 0xf3b   : > { %v4021_v15 = vpop.f32.mrf.mxu1 }
 0xf3c   : > { %v4027_v23 = vpack.c.bf16 %v4021_v15, %v4018_v36  ;;  %v5952_v36 = vld [vmem:[%s7903_s11 + $0xc4] sm:$0xf]  ;;  %v5624_v15 = vor.u32 %v5953_v18, %v5623_v32 }
 0xf3e   : > { %5568 = vmatmul.msk.bf16.vlgmr.msrb.gmra.mxu2 %vm1922_vm10, %v4027_v23  ;;  %v5625_v23 = vld [vmem:[%s7903_s11 + $0xc8] sm:$0xf0]  ;;  %4256 = vmatpush.bf16.msra.mxu3 %v5624_v15 }
 0xf44   : > { %v3882_v29 = vpop.f32.mrf.mxu3 }
 0xf45   : > { %v3891_v39 = vadd.f32 %v3882_v29, %v3717_v35  ;;  %v5607_v35 = vld [vmem:[%s7903_s11 + $0xa0] sm:$0xf] }
 0xf4c   : > { %v3884_v37 = vpop.f32.mrf.mxu3 }
 0xf4d   : > { %v3892_v49 = vadd.f32 %v3884_v37, %v3718_v27  ;;  %v5599_v27 = vld [vmem:[%s7903_s11 + $0x90] sm:$0xf] }
 0xf6b   : > { %v4024_v14 = vpop.f32.mrf.mxu1 }
 0xf6c   : > { %v4028_v22 = vpack.c.bf16 %v4024_v14, %v4024_v14  ;;  %v5628_v14 = vor.u32 %v5952_v36, %v5625_v23 }
 0xf6e   : > { %5569 = vmatmul.msk.bf16.gmra.mxu2 %vm1922_vm10, %v4028_v22  ;;  %4274 = vmatpush.bf16.msrb.mxu0 %v5628_v14  ;;  %v5615_v22 = vld [vmem:[%s7903_s11 + $0xb0] sm:$0xf] }
 0xf74   : > { %v3850_v24 = vpop.f32.mrf.mxu2 }
 0xf75   : > { %v3854_v26 = vpack.c.bf16 %v3850_v24, %v3850_v24  ;;  %v5951_v24 = vld [vmem:[%s7903_s11 + $0xb4] sm:$0xf0] }
 0xf76   : > { %v5616_v21 = vor.u32 %v5951_v24, %v5615_v22 }
 0xf77   : > { %5550 = vmatmul.msk.bf16.gmra.mxu3 %vm1922_vm10, %v3854_v26  ;;  %v5950_v26 = vld [vmem:[%s7903_s11 + $0xb4] sm:$0xf] }
 0xf78   : > { %v5620_v29 = vor.u32 %v5950_v26, %v5617_v30  ;;  %4257 = vmatpush.bf16.msra.mxu3 %v5616_v21 }
 0xf7a   : > { %4275 = vmatpush.bf16.msrb.mxu0 %v5620_v29 }
 0xfc1   : > { %v4056_v40 = vpop.f32.mrf.mxu2 }
 0xfc2   : > { %v4065_v44 = vadd.f32 %v4056_v40, %v3891_v39  ;;  %v5949_v39 = vld [vmem:[%s7903_s11 + $0xa4] sm:$0xf0]  ;;  %v5948_v40 = vld [vmem:[%s7903_s11 + $0xa4] sm:$0xf] }
 0xfc3   : > { %v5608_v45 = vor.u32 %v5949_v39, %v5607_v35 }
 0xfc4   : > { %v7676_v38 = vadd.f32 %v4065_v44, %v7278_v62  ;;  %v3719_v62 = vadd.f32 %v7609_v0, %v3542_v28  ;;  %v5609_v44 = vld [vmem:[%s7903_s11 + $0xa8] sm:$0xf0] }
 0xfc5   : > { %v5612_v37 = vor.u32 %v5948_v40, %v5609_v44  ;;  %4258 = vmatpush.bf16.msra.mxu3 %v5608_v45  ;;  %v5975_v40 = vld [vmem:[%s7905_s13 + $0xf8] sm:$0xff]  ;;  %v5974_v45 = vld [vmem:[%s7905_s13 + $0xf0] sm:$0xff] }
 0xfc6   : > { %4075 = vadd.xlane.f32.xlu1 %v7676_v38  ;;  %4494 = vmatpush.bf16.msra.mxu2 %v5975_v40  ;;  %v5967_v44 = vld [vmem:[%s7905_s13 + $0xb8] sm:$0xff] }
 0xfc7   : > { %4276 = vmatpush.bf16.msrb.mxu0 %v5612_v37  ;;  %4476 = vmatpush.bf16.msrb.mxu1 %v5967_v44  ;;  %v5966_v37 = vld [vmem:[%s7905_s13 + $0xb0] sm:$0xff] }
 0xfc9   : > { %v4058_v53 = vpop.f32.mrf.mxu2 }
 0xfca   : > { %v4066_v42 = vadd.f32 %v4058_v53, %v3892_v49  ;;  %v5947_v49 = vld [vmem:[%s7903_s11 + $0x94] sm:$0xf0]  ;;  %v5946_v53 = vld [vmem:[%s7903_s11 + $0x94] sm:$0xf]  ;;  %4495 = vmatpush.bf16.msra.mxu2 %v5974_v45 }
 0xfcb   : > { %4477 = vmatpush.bf16.msrb.mxu1 %v5966_v37 }
 0xfcc   : > { %v7681_v5 = vadd.f32 %v4066_v42, %v7282_v2  ;;  %v5600_v42 = vor.u32 %v5947_v49, %v5599_v27  ;;  %v5972_v27 = vld [vmem:[%s7905_s13 + $0xe0] sm:$0xff]  ;;  %v5965_v49 = vld [vmem:[%s7905_s13 + $0xa8] sm:$0xff] }
 0xfce   : > { %4077 = vadd.xlane.f32.xlu1 %v7681_v5  ;;  %4259 = vmatpush.bf16.msra.mxu3 %v5600_v42  ;;  %v5964_v42 = vld [vmem:[%s7905_s13 + $0xa0] sm:$0xff] }
 0xfcf   : > { %4478 = vmatpush.bf16.msrb.mxu1 %v5965_v49 }
 0xfd3   : > { %4479 = vmatpush.bf16.msrb.mxu1 %v5964_v42 }
 0xff1   : > { %v4061_v51 = vpop.f32.mrf.mxu2 }
 0xff9   : > { %v4063_v54 = vpop.f32.mrf.mxu2 }
 0xffa   : > { %v3887_v55 = vpop.f32.mrf.mxu3 }
 0xffb   : > { %v3893_v43 = vadd.f32 %v3887_v55, %v3719_v62  ;;  %v5591_v55 = vld [vmem:[%s7903_s11 + $0x80] sm:$0xf] }
 0xffd   : > { %v4067_v63 = vadd.f32 %v4061_v51, %v3893_v43  ;;  %v5601_v51 = vld [vmem:[%s7903_s11 + $0x98] sm:$0xf0]  ;;  %v5945_v43 = vld [vmem:[%s7903_s11 + $0x84] sm:$0xf0] }
 0xffe   : > { %v5604_v54 = vor.u32 %v5946_v53, %v5601_v51  ;;  %v5971_v53 = vld [vmem:[%s7905_s13 + $0xd8] sm:$0xff]  ;;  %v5970_v51 = vld [vmem:[%s7905_s13 + $0xd0] sm:$0xff] }
 0xfff   : > { %v7687_v56 = vadd.f32 %v4067_v63, %v7286_v7  ;;  %v5944_v63 = vld [vmem:[%s7903_s11 + $0x84] sm:$0xf] }
0x1000   : > { %4277 = vmatpush.bf16.msrb.mxu0 %v5604_v54  ;;  %v5969_v54 = vld [vmem:[%s7905_s13 + $0xc8] sm:$0xff] }
0x1001   : > { %4079 = vadd.xlane.f32.xlu2 %v7687_v56 }
0x1002   : > { %v3889_v57 = vpop.f32.mrf.mxu3 }
0x1039   : > { %v4076_v59 = vpop.xlane.xlu1 %4075 }
0x103a   : > { %v4081_v2 = vmul.f32 %v4076_v59, %v6667_v60  ;;  %v5592_v59 = vor.u32 %v5945_v43, %v5591_v55  ;;  %v5962_v55 = vld [vmem:[%s7905_s13 + $0x90] sm:$0xff]  ;;  %v5968_v43 = vld [vmem:[%s7905_s13 + $0xc0] sm:$0xff] }
0x103c   : > { %v7692_v48 = vsub.f32 %v7676_v38, %v4081_v2  ;;  %v5593_v2 = vld [vmem:[%s7903_s11 + $0x88] sm:$0xf0]  ;;  %4260 = vmatpush.bf16.msra.mxu3 %v5592_v59 }
0x103e   : > { %v4087_v46 = vmul.f32 %v7692_v48, %v7692_v48 }
0x1040   : > { %4090 = vadd.xlane.f32.xlu0 %v4087_v46  ;;  %v5596_v46 = vor.u32 %v5944_v63, %v5593_v2 }
0x1041   : > { %v4078_v0 = vpop.xlane.xlu1 %4077 }
0x1042   : > { %v4082_v1 = vmul.f32 %v4078_v0, %v6667_v60  ;;  %4278 = vmatpush.bf16.msrb.mxu0 %v5596_v46  ;;  %v5960_v46 = vld [vmem:[%s7905_s13 + $0x80] sm:$0xff] }
0x1044   : > { %v7698_v4 = vsub.f32 %v7681_v5, %v4082_v1 }
0x1046   : > { %v4088_v7 = vmul.f32 %v7698_v4, %v7698_v4 }
0x1048   : > { %4092 = vadd.xlane.f32.xlu1 %v4088_v7 }
0x1074   : > { %v4080_v6 = vpop.xlane.xlu2 %4079 }
0x1075   : > { %v4083_v47 = vmul.f32 %v4080_v6, %v6667_v60 }
0x1077   : > { %v7704_v52 = vsub.f32 %v7687_v56, %v4083_v47 }
0x1079   : > { %v4089_v8 = vmul.f32 %v7704_v52, %v7704_v52 }
0x107b   : > { %4094 = vadd.xlane.f32.xlu2 %v4089_v8 }
0x10b3   : > { %v4091_v28 = vpop.xlane.xlu0 %4090 }
0x10b4   : > { %v4096_v62 = vmul.f32 %v4091_v28, %v6667_v60  ;;  %v5963_v28 = vld [vmem:[%s7905_s13 + $0x98] sm:$0xff] }
0x10b5   : > { %4480 = vmatpush.bf16.msrb.mxu1 %v5963_v28 }
0x10b6   : > { %v4099_v57 = vadd.f32 1e-06, %v4096_v62  ;;  %v5588_v62 = vld [vmem:[%s7904_s12 + $0x2] sm:$0x3] }
0x10b7   : > { %v4170_v63 = vperm.slane %v5588_v62, 1 }
0x10b8   : > { %6173 = vrsqrt.f32 %v4099_v57  ;;  %vm4108_vm11 = vweird.f32 %v4099_v57 }
0x10b9   : > { %4481 = vmatpush.bf16.msrb.mxu1 %v5962_v55 }
0x10bb   : > { %v4093_v0 = vpop.xlane.xlu1 %4092 }
0x10bc   : > { %v4097_v1 = vmul.f32 %v4093_v0, %v6667_v60 }
0x10be   : > { %v6174_v7 = vpop.eup %6173  ;;  %v4100_v6 = vadd.f32 1e-06, %v4097_v1  ;;  %v4169_v1 = vperm.slane %v5588_v62, 0 }
0x10bf   : > { %v4103_v47 = vmul.f32 %v6174_v7, %v4099_v57  ;;  %vm4109_vm10 = vweird.f32 %v6174_v7  ;;  %v5961_v57 = vld [vmem:[%s7905_s13 + $0x88] sm:$0xff] }
0x10c0   : > { %6175 = vrsqrt.f32 %v4100_v6  ;;  %vm4110_vm12 = vmor %vm4108_vm11, %vm4109_vm10  ;;  %vm4118_vm3 = vweird.f32 %v4100_v6  ;;  %4482 = vmatpush.bf16.msrb.mxu1 %v5961_v57 }
0x10c1   : > { %v4104_v8 = vmul.f32 %v6174_v7, %v4103_v47 }
0x10c3   : > { %v4105_v19 = vmul.f32 0.5, %v4104_v8 }
0x10c4   : > { %4483 = vmatpush.bf16.msrb.mxu1 %v5960_v46 }
0x10c5   : > { %v4106_v10 = vsub.f32 1.5, %v4105_v19 }
0x10c6   : > { %v6176_v16 = vpop.eup %6175 }
0x10c7   : > { %v4107_v50 = vmul.f32 %v6174_v7, %v4106_v10  ;;  %v4113_v31 = vmul.f32 %v6176_v16, %v4100_v6  ;;  %vm4119_vm2 = vweird.f32 %v6176_v16 }
0x10c8   : > { %vm4120_vm4 = vmor %vm4118_vm3, %vm4119_vm2 }
0x10c9   : > { %v4114_v61 = vmul.f32 %v6176_v16, %v4113_v31  ;;  %v4111_v33 = vsel %vm4110_vm12, %v6174_v7, %v4107_v50 }
0x10ca   : > { %v4132_v3 = vmul.f32 %v4111_v33, %v7692_v48 }
0x10cb   : > { %v4115_v11 = vmul.f32 0.5, %v4114_v61 }
0x10cc   : > { %v4138_v9 = vmul.f32 %v6040_v34, %v4132_v3 }
0x10cd   : > { %v4116_v20 = vsub.f32 1.5, %v4115_v11 }
0x10ce   : > { %v4144_v58 = vadd.f32 %v6041_v13, %v4138_v9 }
0x10cf   : > { %v4117_v25 = vmul.f32 %v6176_v16, %v4116_v20 }
0x10d1   : > { %v4121_v12 = vsel %vm4120_vm4, %v6176_v16, %v4117_v25 }
0x10d2   : > { %v4133_v17 = vmul.f32 %v4121_v12, %v7698_v4 }
0x10d4   : > { %v4139_v41 = vmul.f32 %v6040_v34, %v4133_v17 }
0x10d6   : > { %v4145_v32 = vadd.f32 %v6041_v13, %v4139_v41 }
0x10d8   : > { %v4164_v18 = vpack.c.bf16 %v4145_v32, %v4144_v58 }
0x10da   : > { %4261 = vmatmul.bf16.vlgmr.msra.gmra.mxu3 %v4164_v18  ;;  %4279 = vmatmul.bf16.vlgmr.msrb.gmra.mxu0 %v4164_v18 }
0x10ee   : > { %v4095_v36 = vpop.xlane.xlu2 %4094 }
0x10ef   : > { %v4098_v48 = vmul.f32 %v4095_v36, %v6667_v60 }
0x10f1   : > { %v4101_v15 = vadd.f32 1e-06, %v4098_v48 }
0x10f3   : > { %6177 = vrsqrt.f32 %v4101_v15  ;;  %vm4128_vm6 = vweird.f32 %v4101_v15 }
0x10f9   : > { %v6178_v23 = vpop.eup %6177 }
0x10fa   : > { %v4123_v14 = vmul.f32 %v6178_v23, %v4101_v15  ;;  %vm4129_vm5 = vweird.f32 %v6178_v23 }
0x10fb   : > { %vm4130_vm7 = vmor %vm4128_vm6, %vm4129_vm5 }
0x10fc   : > { %v4124_v22 = vmul.f32 %v6178_v23, %v4123_v14 }
0x10fe   : > { %v4125_v24 = vmul.f32 0.5, %v4124_v22 }
0x1100   : > { %v4126_v26 = vsub.f32 1.5, %v4125_v24 }
0x1102   : > { %v4127_v21 = vmul.f32 %v6178_v23, %v4126_v26 }
0x1104   : > { %v4131_v4 = vsel %vm4130_vm7, %v6178_v23, %v4127_v21 }
0x1105   : > { %v4134_v30 = vmul.f32 %v4131_v4, %v7704_v52  ;;  %v5973_v52 = vld [vmem:[%s7905_s13 + $0xe8] sm:$0xff] }
0x1106   : > { %4496 = vmatpush.bf16.msra.mxu2 %v5973_v52 }
0x1107   : > { %v4140_v29 = vmul.f32 %v6040_v34, %v4134_v30 }
0x1109   : > { %v4146_v35 = vadd.f32 %v6041_v13, %v4140_v29 }
0x110a   : > { %4497 = vmatpush.bf16.msra.mxu2 %v5972_v27 }
0x110b   : > { %v4165_v39 = vpack.c.bf16 %v4146_v35, %v4146_v35 }
0x110d   : > { %4266 = vmatmul.bf16.gmra.mxu3 %v4165_v39  ;;  %4284 = vmatmul.bf16.gmra.mxu0 %v4165_v39 }
0x110e   : > { %4498 = vmatpush.bf16.msra.mxu2 %v5971_v53 }
0x1112   : > { %4499 = vmatpush.bf16.msra.mxu2 %v5970_v51 }
0x1116   : > { %4500 = vmatpush.bf16.msra.mxu2 %v5969_v54 }
0x111a   : > { %4501 = vmatpush.bf16.msra.mxu2 %v5968_v43 }
0x1157   : > { %v4280_v59 = vpop.f32.mrf.mxu0 }
0x1158   : > { %v4281_v2 = vadd.f32 %v4280_v59, %v4170_v63 }
0x115a   : > { %v4302_v0 = vmul.f32 0.044715, %v4281_v2  ;;  %v4296_v16 = vmul.f32 0.7978846, %v4281_v2  ;;  %v4290_v22 = vmul.f32 0.5, %v4281_v2 }
0x115c   : > { %v4308_v7 = vmul.f32 %v4302_v0, %v4281_v2 }
0x115d   : > { %v4262_v6 = vpop.f32.mrf.mxu3 }
0x115e   : > { %v4263_v47 = vadd.f32 %v4262_v6, %v4169_v1  ;;  %v4314_v8 = vadd.f32 1.0, %v4308_v7 }
0x115f   : > { %v4282_v19 = vpop.f32.mrf.mxu0 }
0x1160   : > { %v4301_v10 = vmul.f32 0.044715, %v4263_v47  ;;  %v4283_v50 = vadd.f32 %v4282_v19, %v4170_v63  ;;  %v4320_v61 = vmul.f32 %v4314_v8, %v4296_v16  ;;  %v4295_v3 = vmul.f32 0.7978846, %v4263_v47 }
0x1161   : > { %v4289_v39 = vmul.f32 0.5, %v4263_v47 }
0x1162   : > { %v4307_v31 = vmul.f32 %v4301_v10, %v4263_v47  ;;  %v4304_v33 = vmul.f32 0.044715, %v4283_v50  ;;  %6179 = vtanh.f32 %v4320_v61  ;;  %v4298_v12 = vmul.f32 0.7978846, %v4283_v50 }
0x1163   : > { %v4292_v24 = vmul.f32 0.5, %v4283_v50 }
0x1164   : > { %v4313_v11 = vadd.f32 1.0, %v4307_v31  ;;  %v4310_v20 = vmul.f32 %v4304_v33, %v4283_v50 }
0x1165   : > { %v4264_v34 = vpop.f32.mrf.mxu3 }
0x1166   : > { %v4265_v25 = vadd.f32 %v4264_v34, %v4169_v1  ;;  %v4316_v13 = vadd.f32 1.0, %v4310_v20  ;;  %v4319_v9 = vmul.f32 %v4313_v11, %v4295_v3  ;;  %v6042_v20 = vld [vmem:[%s7906_s14 + $0x1] ss:$0 sm:$0xff] }
0x1168   : > { %v4303_v17 = vmul.f32 0.044715, %v4265_v25  ;;  %v4322_v41 = vmul.f32 %v4316_v13, %v4298_v12  ;;  %v4297_v32 = vmul.f32 0.7978846, %v4265_v25  ;;  %v6180_v36 = vpop.eup %6179  ;;  %v4291_v40 = vmul.f32 0.5, %v4265_v25 }
0x1169   : > { %v4332_v15 = vadd.f32 1.0, %v6180_v36 }
0x116a   : > { %v4309_v58 = vmul.f32 %v4303_v17, %v4265_v25  ;;  %6181 = vtanh.f32 %v4322_v41 }
0x116b   : > { %6183 = vtanh.f32 %v4319_v9  ;;  %v4338_v21 = vmul.f32 %v4332_v15, %v4290_v22 }
0x116c   : > { %v4315_v18 = vadd.f32 1.0, %v4309_v58 }
0x116e   : > { %v4321_v48 = vmul.f32 %v4315_v18, %v4297_v32 }
0x1170   : > { %6185 = vtanh.f32 %v4321_v48  ;;  %v6182_v23 = vpop.eup %6181 }
0x1171   : > { %v6184_v14 = vpop.eup %6183  ;;  %v4334_v26 = vadd.f32 1.0, %v6182_v23 }
0x1172   : > { %v4331_v30 = vadd.f32 1.0, %v6184_v14 }
0x1173   : > { %v4340_v4 = vmul.f32 %v4334_v26, %v4292_v24 }
0x1174   : > { %v4337_v44 = vmul.f32 %v4331_v30, %v4289_v39 }
0x1175   : > { %v4377_v35 = vpack.c.bf16 %v4340_v4, %v4338_v21 }
0x1176   : > { %v6186_v29 = vpop.eup %6185 }
0x1177   : > { %v4333_v45 = vadd.f32 1.0, %v6186_v29  ;;  %4502 = vmatmul.bf16.vlgmr.msra.gmra.mxu2 %v4377_v35 }
0x1179   : > { %v4339_v52 = vmul.f32 %v4333_v45, %v4291_v40 }
0x117b   : > { %v4376_v37 = vpack.c.bf16 %v4339_v52, %v4337_v44 }
0x117d   : > { %4484 = vmatmul.bf16.vlgmr.msrb.gmra.mxu1 %v4376_v37 }
0x118a   : > { %v4285_v27 = vpop.f32.mrf.mxu0 }
0x118b   : > { %v4286_v49 = vadd.f32 %v4285_v27, %v4170_v63 }
0x118d   : > { %v4306_v53 = vmul.f32 0.044715, %v4286_v49  ;;  %v4300_v28 = vmul.f32 0.7978846, %v4286_v49  ;;  %v4294_v47 = vmul.f32 0.5, %v4286_v49 }
0x118f   : > { %v4312_v42 = vmul.f32 %v4306_v53, %v4286_v49 }
0x1190   : > { %v4267_v51 = vpop.f32.mrf.mxu3 }
0x1191   : > { %v4318_v54 = vadd.f32 1.0, %v4312_v42  ;;  %v4268_v62 = vadd.f32 %v4267_v51, %v4169_v1 }
0x1192   : > { %v4287_v55 = vpop.f32.mrf.mxu0 }
0x1193   : > { %v4305_v43 = vmul.f32 0.044715, %v4268_v62  ;;  %v4324_v57 = vmul.f32 %v4318_v54, %v4300_v28  ;;  %v4299_v2 = vmul.f32 0.7978846, %v4268_v62  ;;  %v4293_v16 = vmul.f32 0.5, %v4268_v62 }
0x1195   : > { %v4311_v59 = vmul.f32 %v4305_v43, %v4268_v62  ;;  %6187 = vtanh.f32 %v4324_v57  ;;  %v6043_v62 = vld [vmem:[%s7907_s15] ss:$0 sm:$0xff] }
0x1196   : > { %v6044_v57 = vld [vmem:[%s7908_s16] ss:$0 sm:$0xff] }
0x1197   : > { %v4317_v46 = vadd.f32 1.0, %v4311_v59 }
0x1198   : > { %v4269_v0 = vpop.f32.mrf.mxu3 }
0x1199   : > { %v4323_v7 = vmul.f32 %v4317_v46, %v4299_v2 }
0x119b   : > { %v6188_v6 = vpop.eup %6187  ;;  %6189 = vtanh.f32 %v4323_v7 }
0x119c   : > { %v4336_v8 = vadd.f32 1.0, %v6188_v6 }
0x119e   : > { %v4342_v63 = vmul.f32 %v4336_v8, %v4294_v47 }
0x11a0   : > { %v4379_v19 = vpack.c.bf16 %v4342_v63, %v4342_v63 }
0x11a1   : > { %v6190_v10 = vpop.eup %6189 }
0x11a2   : > { %4507 = vmatmul.bf16.gmra.mxu2 %v4379_v19  ;;  %v4335_v50 = vadd.f32 1.0, %v6190_v10 }
0x11a4   : > { %v4341_v1 = vmul.f32 %v4335_v50, %v4293_v16 }
0x11a6   : > { %v4378_v31 = vpack.c.bf16 %v4341_v1, %v4341_v1 }
0x11a8   : > { %4489 = vmatmul.bf16.gmra.mxu1 %v4378_v31 }
0x11fa   : > { %v4485_v61 = vpop.f32.mrf.mxu1  ;;  %v4503_v33 = vpop.f32.mrf.mxu2 }
0x11fb   : > { %v4504_v11 = vadd.f32 %v4503_v33, %v4485_v61 }
0x11fd   : > { %v4512_v34 = vadd.f32 %v4504_v11, %v7676_v38 }
0x11ff   : > { %v4520_v3 = vadd.f32 %v6042_v20, %v4512_v34 }
0x1201   : > { %4525 = vadd.xlane.f32.xlu0 %v4520_v3 }
0x1202   : > { %v4487_v25 = vpop.f32.mrf.mxu1  ;;  %v4505_v12 = vpop.f32.mrf.mxu2 }
0x1203   : > { %v4506_v13 = vadd.f32 %v4505_v12, %v4487_v25 }
0x1205   : > { %v4513_v9 = vadd.f32 %v4506_v13, %v7681_v5 }
0x1207   : > { %v4521_v17 = vadd.f32 %v6042_v20, %v4513_v9 }
0x1209   : > { %4527 = vadd.xlane.f32.xlu1 %v4521_v17 }
0x1225   : > { %v4490_v41 = vpop.f32.mrf.mxu1  ;;  %v4508_v58 = vpop.f32.mrf.mxu2 }
0x1226   : > { %v4509_v32 = vadd.f32 %v4508_v58, %v4490_v41 }
0x1228   : > { %v4514_v18 = vadd.f32 %v4509_v32, %v7687_v56 }
0x122a   : > { %v4522_v36 = vadd.f32 %v6042_v20, %v4514_v18 }
0x122c   : > { %4529 = vadd.xlane.f32.xlu2 %v4522_v36 }
0x122d   : > { %v4492_v48 = vpop.f32.mrf.mxu1  ;;  %v4510_v15 = vpop.f32.mrf.mxu2 }
0x1274   : > { %v4526_v23 = vpop.xlane.xlu0 %4525 }
0x1275   : > { %v4531_v38 = vmul.f32 %v4526_v23, %v6667_v60 }
0x1277   : > { %v4534_v14 = vsub.f32 %v4520_v3, %v4531_v38 }
0x1279   : > { %v4537_v22 = vmul.f32 %v4534_v14, %v4534_v14 }
0x127b   : > { %4540 = vadd.xlane.f32.xlu0 %v4537_v22 }
0x127c   : > { %v4528_v24 = vpop.xlane.xlu1 %4527 }
0x127d   : > { %v4532_v5 = vmul.f32 %v4528_v24, %v6667_v60 }
0x127f   : > { %v4535_v26 = vsub.f32 %v4521_v17, %v4532_v5 }
0x1281   : > { %v4538_v21 = vmul.f32 %v4535_v26, %v4535_v26 }
0x1283   : > { %4542 = vadd.xlane.f32.xlu1 %v4538_v21 }
0x129f   : > { %v4530_v4 = vpop.xlane.xlu2 %4529 }
0x12a0   : > { %v4533_v30 = vmul.f32 %v4530_v4, %v6667_v60 }
0x12a2   : > { %v4536_v56 = vsub.f32 %v4522_v36, %v4533_v30 }
0x12a4   : > { %v4539_v29 = vmul.f32 %v4536_v56, %v4536_v56 }
0x12a6   : > { %4544 = vadd.xlane.f32.xlu2 %v4539_v29 }
0x12ee   : > { %v4541_v35 = vpop.xlane.xlu0 %4540 }
0x12ef   : > { %v4546_v39 = vmul.f32 %v4541_v35, %v6667_v60 }
0x12f1   : > { %v4549_v40 = vadd.f32 1e-06, %v4546_v39 }
0x12f3   : > { %6191 = vrsqrt.f32 %v4549_v40  ;;  %vm4558_vm9 = vweird.f32 %v4549_v40 }
0x12f6   : > { %v4543_v45 = vpop.xlane.xlu1 %4542 }
0x12f7   : > { %v4547_v44 = vmul.f32 %v4543_v45, %v6667_v60 }
0x12f9   : > { %v6192_v52 = vpop.eup %6191  ;;  %v4550_v37 = vadd.f32 1e-06, %v4547_v44 }
0x12fa   : > { %v4553_v27 = vmul.f32 %v6192_v52, %v4549_v40  ;;  %vm4559_vm8 = vweird.f32 %v6192_v52 }
0x12fb   : > { %6193 = vrsqrt.f32 %v4550_v37  ;;  %vm4560_vm13 = vmor %vm4558_vm9, %vm4559_vm8  ;;  %vm4568_vm15 = vweird.f32 %v4550_v37 }
0x12fc   : > { %v4554_v49 = vmul.f32 %v6192_v52, %v4553_v27 }
0x12fe   : > { %v4555_v53 = vmul.f32 0.5, %v4554_v49 }
0x1300   : > { %v4556_v42 = vsub.f32 1.5, %v4555_v53 }
0x1301   : > { %v6194_v51 = vpop.eup %6193 }
0x1302   : > { %v4557_v28 = vmul.f32 %v6192_v52, %v4556_v42  ;;  %v4563_v54 = vmul.f32 %v6194_v51, %v4550_v37  ;;  %vm4569_vm14 = vweird.f32 %v6194_v51 }
0x1303   : > { %vm4570_vm0 = vmor %vm4568_vm15, %vm4569_vm14 }
0x1304   : > { %v4561_v55 = vsel %vm4560_vm13, %v6192_v52, %v4557_v28  ;;  %v4564_v43 = vmul.f32 %v6194_v51, %v4563_v54 }
0x1305   : > { %v4582_v59 = vmul.f32 %v4561_v55, %v4534_v14 }
0x1306   : > { %v4565_v2 = vmul.f32 0.5, %v4564_v43 }
0x1307   : > { %v4588_v46 = vmul.f32 %v6043_v62, %v4582_v59 }
0x1308   : > { %v4566_v0 = vsub.f32 1.5, %v4565_v2 }
0x1309   : > { %v4594_v7 = vadd.f32 %v6044_v57, %v4588_v46 }
0x130a   : > { %v4567_v6 = vmul.f32 %v6194_v51, %v4566_v0 }
0x130b   : > { %4597 = vst [vmem:[%s548_s21] sm:$0xff] %v4594_v7 }
0x130c   : > { %v4571_v47 = vsel %vm4570_vm0, %v6194_v51, %v4567_v6 }
0x130d   : > { %v4583_v8 = vmul.f32 %v4571_v47, %v4535_v26 }
0x130f   : > { %v4589_v63 = vmul.f32 %v6043_v62, %v4583_v8 }
0x1311   : > { %v4595_v19 = vadd.f32 %v6044_v57, %v4589_v63 }
0x1313   : > { %4598 = vst [vmem:[%s548_s21 + $0x8] sm:$0xff] %v4595_v19 }
0x1319   : > { %v4545_v10 = vpop.xlane.xlu2 %4544 }
0x131a   : > { %v4548_v16 = vmul.f32 %v4545_v10, %v6667_v60 }
0x131c   : > { %v4551_v50 = vadd.f32 1e-06, %v4548_v16 }
0x131e   : > { %6195 = vrsqrt.f32 %v4551_v50  ;;  %vm4578_vm10 = vweird.f32 %v4551_v50 }
0x1324   : > { %v6196_v1 = vpop.eup %6195 }
0x1325   : > { %v4573_v31 = vmul.f32 %v6196_v1, %v4551_v50  ;;  %vm4579_vm1 = vweird.f32 %v6196_v1 }
0x1326   : > { %vm4580_vm11 = vmor %vm4578_vm10, %vm4579_vm1 }
0x1327   : > { %v4574_v61 = vmul.f32 %v6196_v1, %v4573_v31 }
0x1329   : > { %v4575_v33 = vmul.f32 0.5, %v4574_v61 }
0x132b   : > { %v4576_v11 = vsub.f32 1.5, %v4575_v33 }
0x132d   : > { %v4577_v20 = vmul.f32 %v6196_v1, %v4576_v11 }
0x132f   : > { %v4581_v34 = vsel %vm4580_vm11, %v6196_v1, %v4577_v20 }
0x1330   : > { %v4584_v3 = vmul.f32 %v4581_v34, %v4536_v56 }
0x1332   : > { %v4590_v25 = vmul.f32 %v6043_v62, %v4584_v3 }
0x1334   : > { %v4596_v12 = vadd.f32 %v6044_v57, %v4590_v25 }
0x1336   : > { %4599 = vst [vmem:[%s548_s21 + $0x10] sm:$0xff] %v4596_v12 }
0x1337 PF: > { %s27_s24 = sadd.s32 1, %s6203_s24  }
0x1338   : > { %p24_p4 = scmp.ge.s32.totalorder %s27_s24, 4  }
0x133a   :  { %26 = sbr.rel (!%p24_p4) target bundleno = 3 (0x3), region = 130 }

</bundles_post_ra>
